<compile_context>
chip_gen: v7x
topology: tpu7x:2x2x1
jax: 0.10.0
libtpu: 0.0.40
codegen_flags: <defaults>
</compile_context>

<pallas_src>
import functools
import math

import jax
import jax.numpy as jnp
import numpy as np
from jax.experimental import pallas as pl
from jax.experimental.pallas import tpu as pltpu


# ----------------------------------------------------------------------------- kernel helpers
def _conv3x3_im2col(padded, col_ref, w_ref, b_ref):
    """3x3 'same' conv as a single MXU matmul with K = 9*C.

    padded : f32 value (H+2, W+2, C), zero-padded, already activated
    col_ref: VMEM scratch (H*W, >=9*C) f32 -- shared im2col slab
    w_ref  : (9*C, Cout) in the MXU dtype (f32 or bf16), flattened (dh, dw, ci) order
    b_ref  : (1, Cout) f32
    returns: f32 (H*W, Cout)
    """
    Hp2, Wp2, C = padded.shape
    H, W = Hp2 - 2, Wp2 - 2
    for dh in range(3):
        for dw in range(3):
            k = dh * 3 + dw
            col_ref[:, k * C:(k + 1) * C] = (
                padded[dh:dh + H, dw:dw + W, :].reshape(H * W, C))
    col = col_ref[:, :9 * C].astype(w_ref.dtype)     # single cast at the MXU input
    return jnp.dot(col, w_ref[...],
                   preferred_element_type=jnp.float32) + b_ref[...]


def _write_padded(pad_ref, interior):
    """Write `interior` (H*W, C) into pad_ref (H+2, W+2, C) with a zero halo."""
    Hp2, Wp2, C = pad_ref.shape
    H, W = Hp2 - 2, Wp2 - 2
    zrow = jnp.zeros((1, Wp2, C), pad_ref.dtype)
    zcol = jnp.zeros((H, 1, C), pad_ref.dtype)
    pad_ref[0:1, :, :] = zrow                        # halo-only zeroing (no full fill)
    pad_ref[H + 1:H + 2, :, :] = zrow
    pad_ref[1:H + 1, 0:1, :] = zcol
    pad_ref[1:H + 1, W + 1:W + 2, :] = zcol
    pad_ref[1:H + 1, 1:W + 1, :] = interior.reshape(H, W, C)


# ----------------------------------------------------------------------------- kernels
def _resblock_s1_kernel(xp_ref, xt_ref, w1_ref, b1_ref, w2_ref, b2_ref,
                        out_ref, col_ref, pad2_ref):
    """stride == 1 (one image per grid step).

    xp_ref : (1, H+2, W+2, Cin)  zero-padded input (padding done in the wrapper)
    xt_ref : (1, Cin, H*W)       raw input, channel-major (identity skip)
    out_ref: (1, Cout, H*W)      channel-major, lane-dense store
    """
    h1 = jnp.maximum(xp_ref[0], 0.0)                 # relu(pad(x)) == pad(relu(x))
    y1 = _conv3x3_im2col(h1, col_ref, w1_ref, b1_ref)        # (H*W, Cout) f32

    _write_padded(pad2_ref, jnp.maximum(y1, 0.0))
    y2 = _conv3x3_im2col(pad2_ref[...], col_ref, w2_ref, b2_ref)   # slab reused

    out_ref[0] = y2.T + xt_ref[0]                    # (Cout, H*W), identity skip


def _resblock_s2_kernel(xp_ref, xpool_ref, pw_ref, w1_ref, b1_ref, w2_ref, b2_ref,
                        ws_ref, bs_ref, out_ref, col_ref, pad2_ref):
    """stride == 2 (one image per grid step).

    The 2x2 average pool is linear: 0.25 is pre-folded into (w2, b2); the H direction
    is a free leading-dim pairing and the W direction is one small MXU matmul against
    the constant 0/1 matrix pw_ref. The 1x1 skip conv commutes with the pool, so its
    matmul runs on the already-pooled input xpool_ref (channel-major).
    """
    H = xp_ref.shape[1] - 2
    W = xp_ref.shape[2] - 2
    Hh, Wh = H // 2, W // 2
    Cout = b1_ref.shape[1]

    h1 = jnp.maximum(xp_ref[0], 0.0)
    y1 = _conv3x3_im2col(h1, col_ref, w1_ref, b1_ref)

    _write_padded(pad2_ref, jnp.maximum(y1, 0.0))
    y2 = _conv3x3_im2col(pad2_ref[...], col_ref, w2_ref, b2_ref)   # 0.25 pre-folded

    # 2x2 pool: H pairs via free leading-dim split, W pairs via one MXU matmul.
    zh = y2.reshape(Hh, 2, W, Cout)
    th = (zh[:, 0] + zh[:, 1]).reshape(Hh * W, Cout)               # (Hh*W, Cout)
    main_t = jnp.dot(th.T, pw_ref[...],
                     preferred_element_type=jnp.float32)           # (Cout, Hh*Wh)

    # skip path: 1x1 conv (no ReLU) on the pooled raw input.
    skip_t = jnp.dot(ws_ref[...], xpool_ref[0].astype(ws_ref.dtype),
                     preferred_element_type=jnp.float32) + bs_ref[...]

    out_ref[0] = main_t + skip_t                                   # lane-dense store


# ----------------------------------------------------------------------------- wrapper
@functools.partial(jax.jit, static_argnames=("stride", "mxu_dtype"))
def resblock_discriminator_forward(x_nchw, params, stride, mxu_dtype=jnp.bfloat16):
    """Forward pass of ResBlockDiscriminator (feat=False).  x_nchw: (N, Cin, H, W)."""
    N, Cin, H, W = x_nchw.shape
    Cout = params["w1"].shape[-1]
    assert H % 2 == 0 and W % 2 == 0, "even spatial dims required for AvgPool2d(2)"

    x = x_nchw.astype(jnp.float32)
    x_nhwc = jnp.transpose(x, (0, 2, 3, 1))
    xp = jnp.pad(x_nhwc, ((0, 0), (1, 1), (1, 1), (0, 0)))   # 'same' padding in wrapper

    w1f = params["w1"].reshape(9 * Cin, Cout).astype(mxu_dtype)
    b1 = params["b1"].astype(jnp.float32)
    b2 = params["b2"].astype(jnp.float32)

    cparams = pltpu.CompilerParams(
        dimension_semantics=("parallel",),          # batch axis: pipeline + megacore
        vmem_limit_bytes=32 * 1024 * 1024)          # explicit, safe on v5e/v6e/v7x

    def full_spec(shape):
        zeros = (0,) * len(shape)
        return pl.BlockSpec(shape, lambda n: zeros)

    col_width = 9 * max(Cin, Cout)                  # one shared im2col slab for both convs

    if stride == 1:
        assert Cin == Cout, "stride=1 uses an identity skip (needs Cin == Cout)"
        x_t = x.reshape(N, Cin, H * W)              # channel-major (native NCHW order)
        w2f = params["w2"].reshape(9 * Cout, Cout).astype(mxu_dtype)

        out = pl.pallas_call(
            _resblock_s1_kernel,
            grid=(N,),
            out_shape=jax.ShapeDtypeStruct((N, Cout, H * W), jnp.float32),
            in_specs=[
                pl.BlockSpec((1, H + 2, W + 2, Cin), lambda n: (n, 0, 0, 0)),
                pl.BlockSpec((1, Cin, H * W), lambda n: (n, 0, 0)),
                full_spec((9 * Cin, Cout)),
                full_spec((1, Cout)),
                full_spec((9 * Cout, Cout)),
                full_spec((1, Cout)),
            ],
            out_specs=pl.BlockSpec((1, Cout, H * W), lambda n: (n, 0, 0)),
            scratch_shapes=[
                pltpu.VMEM((H * W, col_width), jnp.float32),    # shared im2col slab
                pltpu.VMEM((H + 2, W + 2, Cout), jnp.float32),  # padded relu(conv1)
            ],
            compiler_params=cparams,
        )(xp, x_t, w1f, b1, w2f, b2)
        return out.reshape(N, Cout, H, W)

    else:
        Hh, Wh = H // 2, W // 2
        # pool the raw input for the skip path (avgpool commutes with a 1x1 conv)
        xpool_t = x.reshape(N, Cin, Hh, 2, Wh, 2).mean(axis=(3, 5)).reshape(
            N, Cin, Hh * Wh)
        # constant W-direction pooling matrix (Hh*W, Hh*Wh), 0/1 entries
        pw_small = np.zeros((W, Wh), np.float32)
        pw_small[np.arange(W), np.arange(W) // 2] = 1.0
        pw = jnp.asarray(np.kron(np.eye(Hh, dtype=np.float32), pw_small))
        # fold the 0.25 of AvgPool2d(2) into conv2 (exact scaling)
        w2f = (0.25 * params["w2"].reshape(9 * Cout, Cout)).astype(mxu_dtype)
        b2s = 0.25 * b2
        ws_t = jnp.transpose(params["ws"], (1, 0)).astype(mxu_dtype)    # (Cout, Cin)
        bs_t = params["bs"].reshape(Cout, 1).astype(jnp.float32)

        out = pl.pallas_call(
            _resblock_s2_kernel,
            grid=(N,),
            out_shape=jax.ShapeDtypeStruct((N, Cout, Hh * Wh), jnp.float32),
            in_specs=[
                pl.BlockSpec((1, H + 2, W + 2, Cin), lambda n: (n, 0, 0, 0)),
                pl.BlockSpec((1, Cin, Hh * Wh), lambda n: (n, 0, 0)),
                full_spec((Hh * W, Hh * Wh)),
                full_spec((9 * Cin, Cout)),
                full_spec((1, Cout)),
                full_spec((9 * Cout, Cout)),
                full_spec((1, Cout)),
                full_spec((Cout, Cin)),
                full_spec((Cout, 1)),
            ],
            out_specs=pl.BlockSpec((1, Cout, Hh * Wh), lambda n: (n, 0, 0)),
            scratch_shapes=[
                pltpu.VMEM((H * W, col_width), jnp.float32),    # shared im2col slab
                pltpu.VMEM((H + 2, W + 2, Cout), jnp.float32),
            ],
            compiler_params=cparams,
        )(xp, xpool_t, pw, w1f, b1, w2f, b2s, ws_t, bs_t)
        return out.reshape(N, Cout, Hh, Wh)


# ----------------------------------------------------------------------------- params
def init_params(key, cin, cout, stride):
    """Deterministic synthetic init matching the module's parameter shapes.

    conv1/conv2: 3x3, padding=1, xavier_uniform(gain=1.0); skip_conv (stride!=1):
    1x1, xavier_uniform(gain=sqrt(2)).  Weights stored HWIO as (kh, kw, Cin, Cout) /
    (Cin, Cout); biases as (1, Cout).
    """
    k1, k2, k3, k4, k5, k6 = jax.random.split(key, 6)

    def xavier(k, shape, gain, fan_in, fan_out):
        bound = gain * math.sqrt(6.0 / (fan_in + fan_out))
        return jax.random.uniform(k, shape, jnp.float32, -bound, bound)

    def bias(k, cout_, fan_in):
        b = 1.0 / math.sqrt(fan_in)
        return jax.random.uniform(k, (1, cout_), jnp.float32, -b, b)

    params = {
        "w1": xavier(k1, (3, 3, cin, cout), 1.0, cin * 9, cout * 9),
        "b1": bias(k2, cout, cin * 9),
        "w2": xavier(k3, (3, 3, cout, cout), 1.0, cout * 9, cout * 9),
        "b2": bias(k4, cout, cout * 9),
    }
    if stride != 1:
        params["ws"] = xavier(k5, (cin, cout), math.sqrt(2.0), cin, cout)
        params["bs"] = bias(k6, cout, cin)
    return params


# ----------------------------------------------------------------------------- reference
def _conv2d_same_ref(x, w, b):
    out = jax.lax.conv_general_dilated(
        x, w, window_strides=(1, 1), padding="SAME",
        dimension_numbers=("NHWC", "HWIO", "NHWC"))
    return out + b.reshape(1, 1, 1, -1)


def reference_forward(x_nchw, params, stride):
    x = jnp.transpose(x_nchw, (0, 2, 3, 1)).astype(jnp.float32)
    h = _conv2d_same_ref(jax.nn.relu(x), params["w1"], params["b1"])
    h = _conv2d_same_ref(jax.nn.relu(h), params["w2"], params["b2"])

    def pool(t):
        N, H, W, C = t.shape
        return t.reshape(N, H // 2, 2, W // 2, 2, C).mean(axis=(2, 4))

    if stride == 1:
        out = h + x
    else:
        s = jnp.einsum("nhwc,cd->nhwd", x, params["ws"]) \
            + params["bs"].reshape(1, 1, 1, -1)
        out = pool(h) + pool(s)
    return jnp.transpose(out, (0, 3, 1, 2))


# ----------------------------------------------------------------------------- main
if __name__ == "__main__":
    key = jax.random.PRNGKey(0)
    kx1, kx2, kp1, kp2 = jax.random.split(key, 4)

    # Case 1: stride=1 (identity skip -> Cin == Cout).
    N, C, Hs, Ws = 2, 8, 16, 16
    x1 = jax.random.normal(kx1, (N, C, Hs, Ws), jnp.float32)
    p1 = init_params(kp1, C, C, stride=1)
    ref1 = np.asarray(reference_forward(x1, p1, 1))

    out1_f32 = jax.block_until_ready(
        resblock_discriminator_forward(x1, p1, stride=1, mxu_dtype=jnp.float32))
    np.testing.assert_allclose(np.asarray(out1_f32), ref1, rtol=5e-4, atol=5e-4)
    assert out1_f32.shape == (N, C, Hs, Ws)
    out1_bf16 = jax.block_until_ready(
        resblock_discriminator_forward(x1, p1, stride=1, mxu_dtype=jnp.bfloat16))
    # bf16 MXU operands (f32 accumulation) -> loose tolerance vs. the f32 reference.
    np.testing.assert_allclose(np.asarray(out1_bf16), ref1, rtol=2e-1, atol=2e-1)

    # Case 2: stride=2 (down-sampling block with 1x1 skip conv + avg-pool).
    Cin, Cout = 4, 8
    x2 = jax.random.normal(kx2, (N, Cin, Hs, Ws), jnp.float32)
    p2 = init_params(kp2, Cin, Cout, stride=2)
    ref2 = np.asarray(reference_forward(x2, p2, 2))

    out2_f32 = jax.block_until_ready(
        resblock_discriminator_forward(x2, p2, stride=2, mxu_dtype=jnp.float32))
    np.testing.assert_allclose(np.asarray(out2_f32), ref2, rtol=5e-4, atol=5e-4)
    assert out2_f32.shape == (N, Cout, Hs // 2, Ws // 2)
    out2_bf16 = jax.block_until_ready(
        resblock_discriminator_forward(x2, p2, stride=2, mxu_dtype=jnp.bfloat16))
    np.testing.assert_allclose(np.asarray(out2_bf16), ref2, rtol=2e-1, atol=2e-1)

    print("KERNEL_OK")
</pallas_src>

<mosaic_0001>
module attributes {stable_mosaic.version = 11 : i64} {
  func.func @_resblock_s1_kernel(%arg0: i32, %arg1: memref<1x18x18x8xf32, #tpu.memory_space<vmem>>, %arg2: memref<1x8x256xf32, #tpu.memory_space<vmem>>, %arg3: memref<72x8xf32, #tpu.memory_space<vmem>>, %arg4: memref<1x8xf32, #tpu.memory_space<vmem>>, %arg5: memref<72x8xf32, #tpu.memory_space<vmem>>, %arg6: memref<1x8xf32, #tpu.memory_space<vmem>>, %arg7: memref<1x8x256xf32, #tpu.memory_space<vmem>>, %arg8: memref<256x72xf32, #tpu.memory_space<vmem>>, %arg9: memref<18x18x8xf32, #tpu.memory_space<vmem>>) attributes {dimension_semantics = [#tpu.dimension_semantics<parallel>], iteration_bounds = array<i64: 2>, scalar_prefetch = 0 : i64, scratch_operands = 2 : i64, tpu.core_type = #tpu.core_type<tc>, window_params = [{transform_indices = @transform_0, window_bounds = array<i64: 1, 18, 18, 8>}, {transform_indices = @transform_1, window_bounds = array<i64: 1, 8, 256>}, {pipeline_mode = #tpu.pipeline_mode<synchronous>, transform_indices = @transform_2, window_bounds = array<i64: 72, 8>}, {pipeline_mode = #tpu.pipeline_mode<synchronous>, transform_indices = @transform_3, window_bounds = array<i64: 1, 8>}, {pipeline_mode = #tpu.pipeline_mode<synchronous>, transform_indices = @transform_4, window_bounds = array<i64: 72, 8>}, {pipeline_mode = #tpu.pipeline_mode<synchronous>, transform_indices = @transform_5, window_bounds = array<i64: 1, 8>}, {transform_indices = @transform_6, window_bounds = array<i64: 1, 8, 256>}]} {
    %c0 = arith.constant 0 : index
    %c0_0 = arith.constant 0 : index
    %c0_1 = arith.constant 0 : index
    %c0_2 = arith.constant 0 : index
    %0 = vector.load %arg1[%c0, %c0_0, %c0_1, %c0_2] : memref<1x18x18x8xf32, #tpu.memory_space<vmem>>, vector<1x18x18x8xf32>
    %1 = vector.shape_cast %0 : vector<1x18x18x8xf32> to vector<18x18x8xf32>
    %cst = arith.constant 0.000000e+00 : f32
    %2 = vector.broadcast %cst : f32 to vector<18x18x8xf32>
    %3 = arith.maximumf %1, %2 : vector<18x18x8xf32>
    %4 = vector.extract_strided_slice %3 {offsets = [0, 0, 0], sizes = [16, 16, 8], strides = [1, 1, 1]} : vector<18x18x8xf32> to vector<16x16x8xf32>
    %5 = vector.shape_cast %4 : vector<16x16x8xf32> to vector<256x8xf32>
    %c0_3 = arith.constant 0 : index
    %c0_4 = arith.constant 0 : index
    %6 = vector.load %arg8[%c0_3, %c0_4] : memref<256x72xf32, #tpu.memory_space<vmem>>, vector<256x8xf32>
    tpu.vector_store %arg8[%c0_3, %c0_4], %5 {strides = array<i32>} : memref<256x72xf32, #tpu.memory_space<vmem>>, vector<256x8xf32>,
    %7 = vector.extract_strided_slice %3 {offsets = [0, 1, 0], sizes = [16, 16, 8], strides = [1, 1, 1]} : vector<18x18x8xf32> to vector<16x16x8xf32>
    %8 = vector.shape_cast %7 : vector<16x16x8xf32> to vector<256x8xf32>
    %c0_5 = arith.constant 0 : index
    %c8 = arith.constant 8 : index
    %9 = vector.load %arg8[%c0_5, %c8] : memref<256x72xf32, #tpu.memory_space<vmem>>, vector<256x8xf32>
    tpu.vector_store %arg8[%c0_5, %c8], %8 {strides = array<i32>} : memref<256x72xf32, #tpu.memory_space<vmem>>, vector<256x8xf32>,
    %10 = vector.extract_strided_slice %3 {offsets = [0, 2, 0], sizes = [16, 16, 8], strides = [1, 1, 1]} : vector<18x18x8xf32> to vector<16x16x8xf32>
    %11 = vector.shape_cast %10 : vector<16x16x8xf32> to vector<256x8xf32>
    %c0_6 = arith.constant 0 : index
    %c16 = arith.constant 16 : index
    %12 = vector.load %arg8[%c0_6, %c16] : memref<256x72xf32, #tpu.memory_space<vmem>>, vector<256x8xf32>
    tpu.vector_store %arg8[%c0_6, %c16], %11 {strides = array<i32>} : memref<256x72xf32, #tpu.memory_space<vmem>>, vector<256x8xf32>,
    %13 = vector.extract_strided_slice %3 {offsets = [1, 0, 0], sizes = [16, 16, 8], strides = [1, 1, 1]} : vector<18x18x8xf32> to vector<16x16x8xf32>
    %14 = vector.shape_cast %13 : vector<16x16x8xf32> to vector<256x8xf32>
    %c0_7 = arith.constant 0 : index
    %c24 = arith.constant 24 : index
    %15 = vector.load %arg8[%c0_7, %c24] : memref<256x72xf32, #tpu.memory_space<vmem>>, vector<256x8xf32>
    tpu.vector_store %arg8[%c0_7, %c24], %14 {strides = array<i32>} : memref<256x72xf32, #tpu.memory_space<vmem>>, vector<256x8xf32>,
    %16 = vector.extract_strided_slice %3 {offsets = [1, 1, 0], sizes = [16, 16, 8], strides = [1, 1, 1]} : vector<18x18x8xf32> to vector<16x16x8xf32>
    %17 = vector.shape_cast %16 : vector<16x16x8xf32> to vector<256x8xf32>
    %c0_8 = arith.constant 0 : index
    %c32 = arith.constant 32 : index
    %18 = vector.load %arg8[%c0_8, %c32] : memref<256x72xf32, #tpu.memory_space<vmem>>, vector<256x8xf32>
    tpu.vector_store %arg8[%c0_8, %c32], %17 {strides = array<i32>} : memref<256x72xf32, #tpu.memory_space<vmem>>, vector<256x8xf32>,
    %19 = vector.extract_strided_slice %3 {offsets = [1, 2, 0], sizes = [16, 16, 8], strides = [1, 1, 1]} : vector<18x18x8xf32> to vector<16x16x8xf32>
    %20 = vector.shape_cast %19 : vector<16x16x8xf32> to vector<256x8xf32>
    %c0_9 = arith.constant 0 : index
    %c40 = arith.constant 40 : index
    %21 = vector.load %arg8[%c0_9, %c40] : memref<256x72xf32, #tpu.memory_space<vmem>>, vector<256x8xf32>
    tpu.vector_store %arg8[%c0_9, %c40], %20 {strides = array<i32>} : memref<256x72xf32, #tpu.memory_space<vmem>>, vector<256x8xf32>,
    %22 = vector.extract_strided_slice %3 {offsets = [2, 0, 0], sizes = [16, 16, 8], strides = [1, 1, 1]} : vector<18x18x8xf32> to vector<16x16x8xf32>
    %23 = vector.shape_cast %22 : vector<16x16x8xf32> to vector<256x8xf32>
    %c0_10 = arith.constant 0 : index
    %c48 = arith.constant 48 : index
    %24 = vector.load %arg8[%c0_10, %c48] : memref<256x72xf32, #tpu.memory_space<vmem>>, vector<256x8xf32>
    tpu.vector_store %arg8[%c0_10, %c48], %23 {strides = array<i32>} : memref<256x72xf32, #tpu.memory_space<vmem>>, vector<256x8xf32>,
    %25 = vector.extract_strided_slice %3 {offsets = [2, 1, 0], sizes = [16, 16, 8], strides = [1, 1, 1]} : vector<18x18x8xf32> to vector<16x16x8xf32>
    %26 = vector.shape_cast %25 : vector<16x16x8xf32> to vector<256x8xf32>
    %c0_11 = arith.constant 0 : index
    %c56 = arith.constant 56 : index
    %27 = vector.load %arg8[%c0_11, %c56] : memref<256x72xf32, #tpu.memory_space<vmem>>, vector<256x8xf32>
    tpu.vector_store %arg8[%c0_11, %c56], %26 {strides = array<i32>} : memref<256x72xf32, #tpu.memory_space<vmem>>, vector<256x8xf32>,
    %28 = vector.extract_strided_slice %3 {offsets = [2, 2, 0], sizes = [16, 16, 8], strides = [1, 1, 1]} : vector<18x18x8xf32> to vector<16x16x8xf32>
    %29 = vector.shape_cast %28 : vector<16x16x8xf32> to vector<256x8xf32>
    %c0_12 = arith.constant 0 : index
    %c64 = arith.constant 64 : index
    %30 = vector.load %arg8[%c0_12, %c64] : memref<256x72xf32, #tpu.memory_space<vmem>>, vector<256x8xf32>
    tpu.vector_store %arg8[%c0_12, %c64], %29 {strides = array<i32>} : memref<256x72xf32, #tpu.memory_space<vmem>>, vector<256x8xf32>,
    %c0_13 = arith.constant 0 : index
    %c0_14 = arith.constant 0 : index
    %31 = vector.load %arg8[%c0_13, %c0_14] : memref<256x72xf32, #tpu.memory_space<vmem>>, vector<256x72xf32>
    %c0_15 = arith.constant 0 : index
    %c0_16 = arith.constant 0 : index
    %32 = vector.load %arg3[%c0_15, %c0_16] : memref<72x8xf32, #tpu.memory_space<vmem>>, vector<72x8xf32>
    %cst_17 = arith.constant dense<0.000000e+00> : vector<256x8xf32>
    %33 = tpu.matmul %31, %32, %cst_17 {dimension_numbers = #tpu.dot_dimension_numbers<[1], [0], [0], [1], [0, 0, 1, 1], [], []>} : vector<256x72xf32>, vector<72x8xf32>, vector<256x8xf32> -> vector<256x8xf32>
    %c0_18 = arith.constant 0 : index
    %c0_19 = arith.constant 0 : index
    %34 = vector.load %arg4[%c0_18, %c0_19] : memref<1x8xf32, #tpu.memory_space<vmem>>, vector<1x8xf32>
    %35 = vector.broadcast %34 : vector<1x8xf32> to vector<256x8xf32>
    %36 = arith.addf %33, %35 : vector<256x8xf32>
    %cst_20 = arith.constant 0.000000e+00 : f32
    %37 = vector.broadcast %cst_20 : f32 to vector<256x8xf32>
    %38 = arith.maximumf %36, %37 : vector<256x8xf32>
    %cst_21 = arith.constant 0.000000e+00 : f32
    %39 = vector.broadcast %cst_21 : f32 to vector<1x18x8xf32>
    %cst_22 = arith.constant 0.000000e+00 : f32
    %40 = vector.broadcast %cst_22 : f32 to vector<16x1x8xf32>
    %c0_23 = arith.constant 0 : index
    %c0_24 = arith.constant 0 : index
    %c0_25 = arith.constant 0 : index
    %41 = vector.load %arg9[%c0_23, %c0_24, %c0_25] : memref<18x18x8xf32, #tpu.memory_space<vmem>>, vector<1x18x8xf32>
    tpu.vector_store %arg9[%c0_23, %c0_24, %c0_25], %39 {strides = array<i32>} : memref<18x18x8xf32, #tpu.memory_space<vmem>>, vector<1x18x8xf32>,
    %c17 = arith.constant 17 : index
    %c0_26 = arith.constant 0 : index
    %c0_27 = arith.constant 0 : index
    %42 = vector.load %arg9[%c17, %c0_26, %c0_27] : memref<18x18x8xf32, #tpu.memory_space<vmem>>, vector<1x18x8xf32>
    tpu.vector_store %arg9[%c17, %c0_26, %c0_27], %39 {strides = array<i32>} : memref<18x18x8xf32, #tpu.memory_space<vmem>>, vector<1x18x8xf32>,
    %c1 = arith.constant 1 : index
    %c0_28 = arith.constant 0 : index
    %c0_29 = arith.constant 0 : index
    %43 = vector.load %arg9[%c1, %c0_28, %c0_29] : memref<18x18x8xf32, #tpu.memory_space<vmem>>, vector<16x1x8xf32>
    tpu.vector_store %arg9[%c1, %c0_28, %c0_29], %40 {strides = array<i32>} : memref<18x18x8xf32, #tpu.memory_space<vmem>>, vector<16x1x8xf32>,
    %c1_30 = arith.constant 1 : index
    %c17_31 = arith.constant 17 : index
    %c0_32 = arith.constant 0 : index
    %44 = vector.load %arg9[%c1_30, %c17_31, %c0_32] : memref<18x18x8xf32, #tpu.memory_space<vmem>>, vector<16x1x8xf32>
    tpu.vector_store %arg9[%c1_30, %c17_31, %c0_32], %40 {strides = array<i32>} : memref<18x18x8xf32, #tpu.memory_space<vmem>>, vector<16x1x8xf32>,
    %45 = vector.shape_cast %38 : vector<256x8xf32> to vector<16x16x8xf32>
    %c1_33 = arith.constant 1 : index
    %c1_34 = arith.constant 1 : index
    %c0_35 = arith.constant 0 : index
    %46 = vector.load %arg9[%c1_33, %c1_34, %c0_35] : memref<18x18x8xf32, #tpu.memory_space<vmem>>, vector<16x16x8xf32>
    tpu.vector_store %arg9[%c1_33, %c1_34, %c0_35], %45 {strides = array<i32>} : memref<18x18x8xf32, #tpu.memory_space<vmem>>, vector<16x16x8xf32>,
    %c0_36 = arith.constant 0 : index
    %c0_37 = arith.constant 0 : index
    %c0_38 = arith.constant 0 : index
    %47 = vector.load %arg9[%c0_36, %c0_37, %c0_38] : memref<18x18x8xf32, #tpu.memory_space<vmem>>, vector<18x18x8xf32>
    %48 = vector.extract_strided_slice %47 {offsets = [0, 0, 0], sizes = [16, 16, 8], strides = [1, 1, 1]} : vector<18x18x8xf32> to vector<16x16x8xf32>
    %49 = vector.shape_cast %48 : vector<16x16x8xf32> to vector<256x8xf32>
    %c0_39 = arith.constant 0 : index
    %c0_40 = arith.constant 0 : index
    %50 = vector.load %arg8[%c0_39, %c0_40] : memref<256x72xf32, #tpu.memory_space<vmem>>, vector<256x8xf32>
    tpu.vector_store %arg8[%c0_39, %c0_40], %49 {strides = array<i32>} : memref<256x72xf32, #tpu.memory_space<vmem>>, vector<256x8xf32>,
    %51 = vector.extract_strided_slice %47 {offsets = [0, 1, 0], sizes = [16, 16, 8], strides = [1, 1, 1]} : vector<18x18x8xf32> to vector<16x16x8xf32>
    %52 = vector.shape_cast %51 : vector<16x16x8xf32> to vector<256x8xf32>
    %c0_41 = arith.constant 0 : index
    %c8_42 = arith.constant 8 : index
    %53 = vector.load %arg8[%c0_41, %c8_42] : memref<256x72xf32, #tpu.memory_space<vmem>>, vector<256x8xf32>
    tpu.vector_store %arg8[%c0_41, %c8_42], %52 {strides = array<i32>} : memref<256x72xf32, #tpu.memory_space<vmem>>, vector<256x8xf32>,
    %54 = vector.extract_strided_slice %47 {offsets = [0, 2, 0], sizes = [16, 16, 8], strides = [1, 1, 1]} : vector<18x18x8xf32> to vector<16x16x8xf32>
    %55 = vector.shape_cast %54 : vector<16x16x8xf32> to vector<256x8xf32>
    %c0_43 = arith.constant 0 : index
    %c16_44 = arith.constant 16 : index
    %56 = vector.load %arg8[%c0_43, %c16_44] : memref<256x72xf32, #tpu.memory_space<vmem>>, vector<256x8xf32>
    tpu.vector_store %arg8[%c0_43, %c16_44], %55 {strides = array<i32>} : memref<256x72xf32, #tpu.memory_space<vmem>>, vector<256x8xf32>,
    %57 = vector.extract_strided_slice %47 {offsets = [1, 0, 0], sizes = [16, 16, 8], strides = [1, 1, 1]} : vector<18x18x8xf32> to vector<16x16x8xf32>
    %58 = vector.shape_cast %57 : vector<16x16x8xf32> to vector<256x8xf32>
    %c0_45 = arith.constant 0 : index
    %c24_46 = arith.constant 24 : index
    %59 = vector.load %arg8[%c0_45, %c24_46] : memref<256x72xf32, #tpu.memory_space<vmem>>, vector<256x8xf32>
    tpu.vector_store %arg8[%c0_45, %c24_46], %58 {strides = array<i32>} : memref<256x72xf32, #tpu.memory_space<vmem>>, vector<256x8xf32>,
    %60 = vector.extract_strided_slice %47 {offsets = [1, 1, 0], sizes = [16, 16, 8], strides = [1, 1, 1]} : vector<18x18x8xf32> to vector<16x16x8xf32>
    %61 = vector.shape_cast %60 : vector<16x16x8xf32> to vector<256x8xf32>
    %c0_47 = arith.constant 0 : index
    %c32_48 = arith.constant 32 : index
    %62 = vector.load %arg8[%c0_47, %c32_48] : memref<256x72xf32, #tpu.memory_space<vmem>>, vector<256x8xf32>
    tpu.vector_store %arg8[%c0_47, %c32_48], %61 {strides = array<i32>} : memref<256x72xf32, #tpu.memory_space<vmem>>, vector<256x8xf32>,
    %63 = vector.extract_strided_slice %47 {offsets = [1, 2, 0], sizes = [16, 16, 8], strides = [1, 1, 1]} : vector<18x18x8xf32> to vector<16x16x8xf32>
    %64 = vector.shape_cast %63 : vector<16x16x8xf32> to vector<256x8xf32>
    %c0_49 = arith.constant 0 : index
    %c40_50 = arith.constant 40 : index
    %65 = vector.load %arg8[%c0_49, %c40_50] : memref<256x72xf32, #tpu.memory_space<vmem>>, vector<256x8xf32>
    tpu.vector_store %arg8[%c0_49, %c40_50], %64 {strides = array<i32>} : memref<256x72xf32, #tpu.memory_space<vmem>>, vector<256x8xf32>,
    %66 = vector.extract_strided_slice %47 {offsets = [2, 0, 0], sizes = [16, 16, 8], strides = [1, 1, 1]} : vector<18x18x8xf32> to vector<16x16x8xf32>
    %67 = vector.shape_cast %66 : vector<16x16x8xf32> to vector<256x8xf32>
    %c0_51 = arith.constant 0 : index
    %c48_52 = arith.constant 48 : index
    %68 = vector.load %arg8[%c0_51, %c48_52] : memref<256x72xf32, #tpu.memory_space<vmem>>, vector<256x8xf32>
    tpu.vector_store %arg8[%c0_51, %c48_52], %67 {strides = array<i32>} : memref<256x72xf32, #tpu.memory_space<vmem>>, vector<256x8xf32>,
    %69 = vector.extract_strided_slice %47 {offsets = [2, 1, 0], sizes = [16, 16, 8], strides = [1, 1, 1]} : vector<18x18x8xf32> to vector<16x16x8xf32>
    %70 = vector.shape_cast %69 : vector<16x16x8xf32> to vector<256x8xf32>
    %c0_53 = arith.constant 0 : index
    %c56_54 = arith.constant 56 : index
    %71 = vector.load %arg8[%c0_53, %c56_54] : memref<256x72xf32, #tpu.memory_space<vmem>>, vector<256x8xf32>
    tpu.vector_store %arg8[%c0_53, %c56_54], %70 {strides = array<i32>} : memref<256x72xf32, #tpu.memory_space<vmem>>, vector<256x8xf32>,
    %72 = vector.extract_strided_slice %47 {offsets = [2, 2, 0], sizes = [16, 16, 8], strides = [1, 1, 1]} : vector<18x18x8xf32> to vector<16x16x8xf32>
    %73 = vector.shape_cast %72 : vector<16x16x8xf32> to vector<256x8xf32>
    %c0_55 = arith.constant 0 : index
    %c64_56 = arith.constant 64 : index
    %74 = vector.load %arg8[%c0_55, %c64_56] : memref<256x72xf32, #tpu.memory_space<vmem>>, vector<256x8xf32>
    tpu.vector_store %arg8[%c0_55, %c64_56], %73 {strides = array<i32>} : memref<256x72xf32, #tpu.memory_space<vmem>>, vector<256x8xf32>,
    %c0_57 = arith.constant 0 : index
    %c0_58 = arith.constant 0 : index
    %75 = vector.load %arg8[%c0_57, %c0_58] : memref<256x72xf32, #tpu.memory_space<vmem>>, vector<256x72xf32>
    %c0_59 = arith.constant 0 : index
    %c0_60 = arith.constant 0 : index
    %76 = vector.load %arg5[%c0_59, %c0_60] : memref<72x8xf32, #tpu.memory_space<vmem>>, vector<72x8xf32>
    %cst_61 = arith.constant dense<0.000000e+00> : vector<256x8xf32>
    %77 = tpu.matmul %75, %76, %cst_61 {dimension_numbers = #tpu.dot_dimension_numbers<[1], [0], [0], [1], [0, 0, 1, 1], [], []>} : vector<256x72xf32>, vector<72x8xf32>, vector<256x8xf32> -> vector<256x8xf32>
    %c0_62 = arith.constant 0 : index
    %c0_63 = arith.constant 0 : index
    %78 = vector.load %arg6[%c0_62, %c0_63] : memref<1x8xf32, #tpu.memory_space<vmem>>, vector<1x8xf32>
    %79 = vector.broadcast %78 : vector<1x8xf32> to vector<256x8xf32>
    %80 = arith.addf %77, %79 : vector<256x8xf32>
    %81 = tpu.transpose %80, [1, 0] : vector<256x8xf32> -> vector<8x256xf32>
    %c0_64 = arith.constant 0 : index
    %c0_65 = arith.constant 0 : index
    %c0_66 = arith.constant 0 : index
    %82 = vector.load %arg2[%c0_64, %c0_65, %c0_66] : memref<1x8x256xf32, #tpu.memory_space<vmem>>, vector<1x8x256xf32>
    %83 = vector.shape_cast %82 : vector<1x8x256xf32> to vector<8x256xf32>
    %84 = arith.addf %81, %83 : vector<8x256xf32>
    %c0_67 = arith.constant 0 : index
    %c0_68 = arith.constant 0 : index
    %c0_69 = arith.constant 0 : index
    %85 = vector.load %arg7[%c0_67, %c0_68, %c0_69] : memref<1x8x256xf32, #tpu.memory_space<vmem>>, vector<1x8x256xf32>
    %86 = vector.shape_cast %85 : vector<1x8x256xf32> to vector<8x256xf32>
    %87 = vector.shape_cast %84 : vector<8x256xf32> to vector<1x8x256xf32>
    tpu.vector_store %arg7[%c0_67, %c0_68, %c0_69], %87 {strides = array<i32>} : memref<1x8x256xf32, #tpu.memory_space<vmem>>, vector<1x8x256xf32>,
    return
  }
  func.func @transform_0(%arg0: i32) -> (i32, i32, i32, i32) {
    %c0_i32 = arith.constant 0 : i32
    %c0_i32_0 = arith.constant 0 : i32
    %c0_i32_1 = arith.constant 0 : i32
    %c0_i32_2 = arith.constant 0 : i32
    return %arg0, %c0_i32, %c0_i32_0, %c0_i32_1 : i32, i32, i32, i32
  }
  func.func @transform_1(%arg0: i32) -> (i32, i32, i32) {
    %c0_i32 = arith.constant 0 : i32
    %c0_i32_0 = arith.constant 0 : i32
    %c0_i32_1 = arith.constant 0 : i32
    return %arg0, %c0_i32, %c0_i32_0 : i32, i32, i32
  }
  func.func @transform_2(%arg0: i32) -> (i32, i32) {
    %c0_i32 = arith.constant 0 : i32
    %c0_i32_0 = arith.constant 0 : i32
    %c0_i32_1 = arith.constant 0 : i32
    return %c0_i32, %c0_i32_0 : i32, i32
  }
  func.func @transform_3(%arg0: i32) -> (i32, i32) {
    %c0_i32 = arith.constant 0 : i32
    %c0_i32_0 = arith.constant 0 : i32
    %c0_i32_1 = arith.constant 0 : i32
    return %c0_i32, %c0_i32_0 : i32, i32
  }
  func.func @transform_4(%arg0: i32) -> (i32, i32) {
    %c0_i32 = arith.constant 0 : i32
    %c0_i32_0 = arith.constant 0 : i32
    %c0_i32_1 = arith.constant 0 : i32
    return %c0_i32, %c0_i32_0 : i32, i32
  }
  func.func @transform_5(%arg0: i32) -> (i32, i32) {
    %c0_i32 = arith.constant 0 : i32
    %c0_i32_0 = arith.constant 0 : i32
    %c0_i32_1 = arith.constant 0 : i32
    return %c0_i32, %c0_i32_0 : i32, i32
  }
  func.func @transform_6(%arg0: i32) -> (i32, i32, i32) {
    %c0_i32 = arith.constant 0 : i32
    %c0_i32_0 = arith.constant 0 : i32
    %c0_i32_1 = arith.constant 0 : i32
    return %arg0, %c0_i32, %c0_i32_0 : i32, i32, i32
  }
}

</mosaic_0001>

<bundles_post_ra>
// kernel: resblock_discriminator_forward.1
= control target key start
LH: loop header
LB: loop body
LE: loop exit
PB: predicated region body
PF: predicated region fallthrough
CT: control target
= control target key end

     0   :  { %s4403_s21 = smov 0   ;;  %s7243_s0 = inlined_call_operand.vmem [shape: f32[2,18,18,8], index: 0, kind: input, shape index: {}]   ;;  %s7244_s1 = inlined_call_operand.vmem [shape: f32[2,8,256], index: 1, kind: input, shape index: {}]   ;;  %s7245_s2 = inlined_call_operand.vmem [shape: f32[72,8], index: 2, kind: input, shape index: {}]   ;;  %s7246_s3 = inlined_call_operand.vmem [shape: f32[1,8], index: 3, kind: input, shape index: {}]   ;;  %s7247_s4 = inlined_call_operand.vmem [shape: f32[72,8], index: 4, kind: input, shape index: {}]   ;;  %s7248_s5 = inlined_call_operand.vmem [shape: f32[1,8], index: 5, kind: input, shape index: {}]   ;;  %s7249_s6 = inlined_call_operand.vmem [shape: f32[2,8,256], index: 6, kind: output, shape index: {}]  }
   0x1 LB: > { %s4007_s22 = sadd.s32 4294967295, %s4357_s21   ;;  %p4011_p0 = scmp.ge.s32.totalorder %s4357_s21, 1  ;;  %s4357_s21 = sphi %s4403_s21, %s16_s21  }
   0x2   : > { %p222_p1 = scmp.lt.s32.totalorder %s4357_s21, 3 }
   0x4   : > { %p223_p2 = pnand %p4011_p0, %p222_p1 }
   0x6   : > { %226 = sbr.rel (%p223_p2) target bundleno = 1741 (0x6cd), region = 44 }
   0xd   : > { %p257_p3 = scmp.lt.s32.totalorder %s4007_s22, 1  ;;  %vm461_vm0 = vcmask 1046528   ;;  %vm380_vm1 = vcmask 64512   ;;  %s4359_s27 = smov 8   ;;  %vm671_vm2 = vcmask 1045504   ;;  %vm638_vm3 = vcmask 130112  }
   0xe   : > { %s4360_s28 = smov 16   ;;  %s4361_s29 = smov 24   ;;  %vm848_vm4 = vcmask 195712   ;;  %vm979_vm5 = vcmask 261312   ;;  %vm1114_vm6 = vcmask 326912   ;;  %vm1248_vm7 = vcmask 392512  }
   0xf   : > { %s7615_s22 = smov (!%p257_p3, %s4007_s22), 1  ;;  %s4362_s30 = smov 32   ;;  %vm1379_vm8 = vcmask 458112   ;;  %vm1514_vm9 = vcmask 523712   ;;  %vm1648_vm10 = vcmask 589312   ;;  %vm1729_vm11 = vcmask 588800  }
  0x10   : > { %s4333_s23 = smul.u32 432, %s7615_s22  ;;  %s4363_s7 = smov 40   ;;  %vm2085_vm12 = vcmask 58368   ;;  %vm2092_vm13 = vcmask 57344  }
  0x11   : > { %s4364_s8 = smov 48   ;;  %s4365_s9 = smov 56  }
  0x12   : > { %s4417_s26 = scalar_lea.vmem %s7243_s0, %s4333_s23  ;;  %s4366_s14 = smov 64  }
  0x13   : > { %v272_v0 = vld [vmem:[%s4417_s26] sm:$0xff]  ;;  %v273_v1 = vld [vmem:[%s4417_s26 + $0x8] sm:$0xff]  ;;  %v275_v2 = vld [vmem:[%s4417_s26 + $0x18] sm:$0xff] }
  0x14   : > { %v4422_v3 = vmax.f32 %v272_v0, 0.0  ;;  %v4424_v4 = vmax.f32 %v273_v1, 0.0  ;;  %v276_v5 = vld [vmem:[%s4417_s26 + $0x20] sm:$0xff]  ;;  %v4427_v6 = vmax.f32 %v275_v2, 0.0  ;;  %v4430_v7 = vld [vmem:[%s4417_s26 + $0x10] sm:$0x3] }
  0x15   : > { %v4432_v8 = vmax.f32 %v276_v5, 0.0  ;;  %v7257_v9 = vmax.f32 %v4430_v7, 0.0  ;;  %v4436_v10 = vld [vmem:[%s4417_s26 + $0x28] sm:$0x3]  ;;  %v278_v11 = vld [vmem:[%s4417_s26 + $0x30] sm:$0xff]  ;;  %v279_v12 = vld [vmem:[%s4417_s26 + $0x38] sm:$0xff] }
  0x16   : > { %v462_v13 = vrot.slane %v4422_v3, 1  ;;  %v463_v14 = vrot.slane %v4424_v4, 1  ;;  %v467_v15 = vrot.slane %v4427_v6, 1  ;;  %v7255_v16 = vmax.f32 %v4436_v10, 0.0  ;;  %v4445_v17 = vld [vmem:[%s4417_s26 + $0x40] sm:$0x3] }
  0x17   : > { %381 = vst.msk [vmem:[#allocation2] sm:$0xff] %vm380_vm1, %v4422_v3  ;;  %382 = vst.msk [vmem:[#allocation2 + $0x8] sm:$0xff] %vm380_vm1, %v4424_v4  ;;  %v468_v18 = vrot.slane %v4432_v8, 1  ;;  %v465_v19 = vrot.slane %v7257_v9, 1  ;;  %v4456_v20 = vmax.f32 %v278_v11, 0.0  ;;  %v4458_v21 = vmax.f32 %v279_v12, 0.0 }
  0x18   : > { %383 = vst.msk [vmem:[#allocation2 + $0x10] sm:$0xff] %vm380_vm1, %v4427_v6  ;;  %v281_v22 = vld [vmem:[%s4417_s26 + $0x48] sm:$0xff]  ;;  %v282_v23 = vld [vmem:[%s4417_s26 + $0x50] sm:$0xff]  ;;  %384 = vst.msk [vmem:[#allocation2 + $0x18] sm:$0xff] %vm380_vm1, %v4432_v8  ;;  %v464_v24 = vsel %vm461_vm0, %v462_v13, %v463_v14  ;;  %v470_v25 = vrot.slane %v7255_v16, 1  ;;  %v7254_v26 = vmax.f32 %v4445_v17, 0.0 }
  0x19   : > { %v4468_v27 = vmax.f32 %v281_v22, 0.0  ;;  %v4471_v28 = vld [vmem:[%s4417_s26 + $0x58] sm:$0x3]  ;;  %v284_v29 = vld [vmem:[%s4417_s26 + $0x60] sm:$0xff]  ;;  %542 = vrot.lane.b32.xlu0 %v464_v24, %s4359_s27  ;;  %v4476_v30 = vsel %vm461_vm0, %v467_v15, %v468_v18  ;;  %v466_v31 = vsel %vm461_vm0, %v463_v14, %v465_v19  ;;  %v285_v32 = vld [vmem:[%s4417_s26 + $0x68] sm:$0xff]  ;;  %385 = vst.msk [vmem:[#allocation2 + $0x20] sm:$0xff] %vm380_vm1, %v4456_v20 }
  0x1a   : > { %v287_v33 = vld [vmem:[%s4417_s26 + $0x78] sm:$0xff]  ;;  %386 = vst.msk [vmem:[#allocation2 + $0x28] sm:$0xff] %vm380_vm1, %v4458_v21  ;;  %546 = vrot.lane.b32.xlu1 %v4476_v30, %s4359_s27  ;;  %v4488_v34 = vsel %vm461_vm0, %v468_v18, %v470_v25  ;;  %v472_v35 = vrot.slane %v4456_v20, 1  ;;  %v473_v36 = vrot.slane %v4458_v21, 1  ;;  %v4492_v37 = vmax.f32 %v282_v23, 0.0  ;;  %v288_v38 = vld [vmem:[%s4417_s26 + $0x80] sm:$0xff] }
  0x1b   : > { %387 = vst.msk [vmem:[#allocation2 + $0x30] sm:$0xff] %vm380_vm1, %v4468_v27  ;;  %v475_v39 = vrot.slane %v7254_v26, 1  ;;  %v7253_v40 = vmax.f32 %v4471_v28, 0.0  ;;  %v4500_v41 = vmax.f32 %v284_v29, 0.0  ;;  %v4502_v42 = vmax.f32 %v285_v32, 0.0  ;;  %v290_v45 = vld [vmem:[%s4417_s26 + $0x90] sm:$0xff] }
  0x1c   : > { %v4505_v43 = vld [vmem:[%s4417_s26 + $0x70] sm:$0x3]  ;;  %v4507_v44 = vmax.f32 %v287_v33, 0.0  ;;  %388 = vst.msk [vmem:[#allocation2 + $0x38] sm:$0xff] %vm380_vm1, %v4492_v37  ;;  %v4513_v46 = vmax.f32 %v288_v38, 0.0  ;;  %v291_v47 = vld [vmem:[%s4417_s26 + $0x98] sm:$0xff]  ;;  %v4523_v48 = vsel %vm461_vm0, %v472_v35, %v473_v36 }
  0x1d   : > { %544 = vrot.lane.b32.xlu0 %v466_v31, %s4359_s27  ;;  %389 = vst.msk [vmem:[#allocation2 + $0x40] sm:$0xff] %vm380_vm1, %v4500_v41  ;;  %390 = vst.msk [vmem:[#allocation2 + $0x48] sm:$0xff] %vm380_vm1, %v4502_v42  ;;  %v477_v49 = vrot.slane %v4468_v27, 1  ;;  %v478_v50 = vrot.slane %v4492_v37, 1  ;;  %v7252_v51 = vmax.f32 %v4505_v43, 0.0  ;;  %v293_v52 = vld [vmem:[%s4417_s26 + $0xa8] sm:$0xff]  ;;  %v4533_v54 = vsel %vm461_vm0, %v473_v36, %v475_v39 }
  0x1e   : > { %548 = vrot.lane.b32.xlu1 %v4488_v34, %s4359_s27  ;;  %v294_v53 = vld [vmem:[%s4417_s26 + $0xb0] sm:$0xff]  ;;  %391 = vst.msk [vmem:[#allocation2 + $0x50] sm:$0xff] %vm380_vm1, %v4507_v44  ;;  %v480_v55 = vrot.slane %v7253_v40, 1  ;;  %v4537_v56 = vmax.f32 %v290_v45, 0.0  ;;  %392 = vst.msk [vmem:[#allocation2 + $0x58] sm:$0xff] %vm380_vm1, %v4513_v46  ;;  %v4544_v58 = vmax.f32 %v291_v47, 0.0 }
  0x1f   : > { %v4542_v57 = vld [vmem:[%s4417_s26 + $0x88] sm:$0x3]  ;;  %v296_v59 = vld [vmem:[%s4417_s26 + $0xc0] sm:$0xff]  ;;  %v4550_v61 = vmax.f32 %v293_v52, 0.0  ;;  %v4552_v62 = vmax.f32 %v294_v53, 0.0  ;;  %v4559_v63 = vsel %vm461_vm0, %v477_v49, %v478_v50  ;;  %v482_v0 = vrot.slane %v4500_v41, 1 }
  0x20   : > { %v297_v60 = vld [vmem:[%s4417_s26 + $0xc8] sm:$0xff]  ;;  %393 = vst.msk [vmem:[#allocation2 + $0x60] sm:$0xff] %vm380_vm1, %v4537_v56  ;;  %7414 = vst [vmem:[#allocation4_spill] sm:$0xff] %v4559_v63  ;;  %v483_v1 = vrot.slane %v4502_v42, 1  ;;  %v485_v2 = vrot.slane %v7252_v51, 1  ;;  %v299_v5 = vld [vmem:[%s4417_s26 + $0xd8] sm:$0xff]  ;;  %v4569_v11 = vsel %vm461_vm0, %v478_v50, %v480_v55 }
  0x21   : > { %550 = vrot.lane.b32.xlu0 %v4523_v48, %s4359_s27  ;;  %394 = vst.msk [vmem:[#allocation2 + $0x68] sm:$0xff] %vm380_vm1, %v4544_v58  ;;  %7415 = vst [vmem:[#allocation5_spill] sm:$0xff] %v4569_v11  ;;  %v7251_v12 = vmax.f32 %v4542_v57, 0.0  ;;  %v4572_v13 = vmax.f32 %v296_v59, 0.0  ;;  %v4574_v14 = vmax.f32 %v297_v60, 0.0  ;;  %v300_v15 = vld [vmem:[%s4417_s26 + $0xe0] sm:$0xff] }
  0x22   : > { %552 = vrot.lane.b32.xlu1 %v4533_v54, %s4359_s27  ;;  %395 = vst.msk [vmem:[#allocation2 + $0x70] sm:$0xff] %vm380_vm1, %v4550_v61  ;;  %396 = vst.msk [vmem:[#allocation2 + $0x78] sm:$0xff] %vm380_vm1, %v4552_v62  ;;  %v4582_v18 = vld [vmem:[%s4417_s26 + $0xa0] sm:$0x3]  ;;  %v302_v19 = vld [vmem:[%s4417_s26 + $0xf0] sm:$0xff]  ;;  %v487_v23 = vrot.slane %v4507_v44, 1  ;;  %v4598_v25 = vsel %vm461_vm0, %v482_v0, %v483_v1  ;;  %v4601_v29 = vsel %vm461_vm0, %v483_v1, %v485_v2 }
  0x23   : > { %v303_v22 = vld [vmem:[%s4417_s26 + $0xf8] sm:$0xff]  ;;  %v4589_v24 = vmax.f32 %v299_v5, 0.0  ;;  %397 = vst.msk [vmem:[#allocation2 + $0x80] sm:$0xff] %vm380_vm1, %v4572_v13  ;;  %398 = vst.msk [vmem:[#allocation2 + $0x88] sm:$0xff] %vm380_vm1, %v4574_v14  ;;  %v488_v31 = vrot.slane %v4513_v46, 1  ;;  %v4604_v32 = vmax.f32 %v300_v15, 0.0 }
  0x24   : > { %7416 = vst [vmem:[#allocation6_spill] sm:$0xff] %v4598_v25  ;;  %7417 = vst [vmem:[#allocation7_spill] sm:$0xff] %v4601_v29  ;;  %v305_v33 = vld [vmem:[%s4417_s26 + $0x108] sm:$0xff]  ;;  %v306_v35 = vld [vmem:[%s4417_s26 + $0x110] sm:$0xff]  ;;  %v490_v36 = vrot.slane %v7251_v12, 1  ;;  %v7250_v38 = vmax.f32 %v4582_v18, 0.0 }
  0x25   : > { %554 = vrot.lane.b32.xlu0 %v4559_v63, %s4359_s27  ;;  %v4612_v39 = vld [vmem:[%s4417_s26 + $0xb8] sm:$0x3]  ;;  %v4614_v45 = vmax.f32 %v302_v19, 0.0  ;;  %v4616_v47 = vmax.f32 %v303_v22, 0.0  ;;  %399 = vst.msk [vmem:[#allocation2 + $0x90] sm:$0xff] %vm380_vm1, %v4589_v24  ;;  %v308_v49 = vld [vmem:[%s4417_s26 + $0x120] sm:$0xff]  ;;  %v4637_v55 = vsel %vm461_vm0, %v487_v23, %v488_v31 }
  0x26   : > { %556 = vrot.lane.b32.xlu1 %v4569_v11, %s4359_s27  ;;  %400 = vst.msk [vmem:[#allocation2 + $0x98] sm:$0xff] %vm380_vm1, %v4604_v32  ;;  %v4625_v50 = vmax.f32 %v305_v33, 0.0  ;;  %v4627_v52 = vmax.f32 %v306_v35, 0.0  ;;  %v309_v53 = vld [vmem:[%s4417_s26 + $0x128] sm:$0xff]  ;;  %7418 = vst [vmem:[#allocation8_spill] sm:$0xff] %v4637_v55  ;;  %v492_v59 = vrot.slane %v4537_v56, 1  ;;  %v4645_v5 = vsel %vm461_vm0, %v488_v31, %v490_v36 }
  0x27   : > { %401 = vst.msk [vmem:[#allocation2 + $0xa0] sm:$0xff] %vm380_vm1, %v4614_v45  ;;  %402 = vst.msk [vmem:[#allocation2 + $0xa8] sm:$0xff] %vm380_vm1, %v4616_v47  ;;  %v493_v60 = vrot.slane %v4544_v58, 1  ;;  %v7256_v0 = vmax.f32 %v4612_v39, 0.0  ;;  %v311_v1 = vld [vmem:[%s4417_s26 + $0x138] sm:$0xff]  ;;  %v312_v2 = vld [vmem:[%s4417_s26 + $0x140] sm:$0xff] }
  0x28   : > { %7419 = vst [vmem:[#allocation9_spill] sm:$0xff] %v4645_v5  ;;  %v495_v15 = vrot.slane %v7250_v38, 1  ;;  %v4649_v19 = vmax.f32 %v308_v49, 0.0  ;;  %403 = vst.msk [vmem:[#allocation2 + $0xb0] sm:$0xff] %vm380_vm1, %v4625_v50  ;;  %v4656_v22 = vld [vmem:[%s4417_s26 + $0xd0] sm:$0x3] }
  0x29   : > { %558 = vrot.lane.b32.xlu0 %v4598_v25, %s4359_s27  ;;  %404 = vst.msk [vmem:[#allocation2 + $0xb8] sm:$0xff] %vm380_vm1, %v4627_v52  ;;  %v4658_v23 = vmax.f32 %v309_v53, 0.0  ;;  %v314_v33 = vld [vmem:[%s4417_s26 + $0x150] sm:$0xff]  ;;  %v315_v35 = vld [vmem:[%s4417_s26 + $0x158] sm:$0xff]  ;;  %v497_v31 = vrot.slane %v4550_v61, 1  ;;  %v498_v36 = vrot.slane %v4552_v62, 1  ;;  %v4675_v53 = vsel %vm461_vm0, %v492_v59, %v493_v60 }
  0x2a   : > { %560 = vrot.lane.b32.xlu1 %v4601_v29, %s4359_s27  ;;  %v4666_v49 = vmax.f32 %v311_v1, 0.0  ;;  %v4668_v38 = vmax.f32 %v312_v2, 0.0  ;;  %405 = vst.msk [vmem:[#allocation2 + $0xc0] sm:$0xff] %vm380_vm1, %v4649_v19  ;;  %7420 = vst [vmem:[#allocation10_spill] sm:$0xff] %v4675_v53  ;;  %v500_v12 = vrot.slane %v7256_v0, 1  ;;  %v317_v51 = vld [vmem:[%s4417_s26 + $0x168] sm:$0xff]  ;;  %v4683_v1 = vsel %vm461_vm0, %v493_v60, %v495_v15 }
  0x2b   : > { %406 = vst.msk [vmem:[#allocation2 + $0xc8] sm:$0xff] %vm380_vm1, %v4658_v23  ;;  %7421 = vst [vmem:[#allocation11_spill] sm:$0xff] %v4683_v1  ;;  %v7262_v2 = vmax.f32 %v4656_v22, 0.0  ;;  %v4686_v40 = vmax.f32 %v314_v33, 0.0  ;;  %v4688_v26 = vmax.f32 %v315_v35, 0.0  ;;  %v318_v16 = vld [vmem:[%s4417_s26 + $0x170] sm:$0xff]  ;;  %v4701_v60 = vsel %vm461_vm0, %v497_v31, %v498_v36 }
  0x2c   : > { %407 = vst.msk [vmem:[#allocation2 + $0xd0] sm:$0xff] %vm380_vm1, %v4666_v49  ;;  %408 = vst.msk [vmem:[#allocation2 + $0xd8] sm:$0xff] %vm380_vm1, %v4668_v38  ;;  %v4696_v59 = vld [vmem:[%s4417_s26 + $0xe8] sm:$0x3]  ;;  %v4703_v15 = vmax.f32 %v317_v51, 0.0  ;;  %v4712_v33 = vsel %vm461_vm0, %v498_v36, %v500_v12  ;;  %v502_v35 = vrot.slane %v4572_v13, 1 }
  0x2d   : > { %562 = vrot.lane.b32.xlu0 %v4637_v55, %s4359_s27  ;;  %7422 = vst [vmem:[#allocation12_spill] sm:$0xff] %v4701_v60  ;;  %409 = vst.msk [vmem:[#allocation2 + $0xe0] sm:$0xff] %vm380_vm1, %v4686_v40  ;;  %v503_v31 = vrot.slane %v4574_v14, 1  ;;  %v4716_v0 = vmax.f32 %v318_v16, 0.0  ;;  %v505_v51 = vrot.slane %v7262_v2, 1  ;;  %v507_v36 = vrot.slane %v4589_v24, 1 }
  0x2e   : > { %564 = vrot.lane.b32.xlu1 %v4645_v5, %s4359_s27  ;;  %410 = vst.msk [vmem:[#allocation2 + $0xe8] sm:$0xff] %vm380_vm1, %v4688_v26  ;;  %7423 = vst [vmem:[#allocation13_spill] sm:$0xff] %v4712_v33  ;;  %v7267_v5 = vrot.slane %v4424_v4, 2  ;;  %v4726_v12 = vld [vmem:[%s4417_s26 + $0x100] sm:$0x3]  ;;  %v508_v2 = vrot.slane %v4604_v32, 1 }
  0x2f   : > { %411 = vst.msk [vmem:[#allocation2 + $0xf0] sm:$0xff] %vm380_vm1, %v4703_v15  ;;  %412 = vst.msk [vmem:[#allocation2 + $0xf8] sm:$0xff] %vm380_vm1, %v4716_v0  ;;  %v4745_v9 = vsel %vm461_vm0, %v503_v31, %v505_v51  ;;  %v513_v51 = vrot.slane %v4616_v47, 1  ;;  %v4823_v63 = vld [vmem:[%s4417_s26 + $0x178] sm:$0x3] }
  0x30   : > { %7425 = vst [vmem:[#allocation15_spill] sm:$0xff] %v4745_v9 }
  0x31   : > { %566 = vrot.lane.b32.xlu0 %v4675_v53, %s4359_s27  ;;  %v672_v53 = vrot.slane %v4422_v3, 2  ;;  %v4740_v3 = vsel %vm461_vm0, %v502_v35, %v503_v31  ;;  %v4758_v35 = vsel %vm461_vm0, %v507_v36, %v508_v2  ;;  %v512_v31 = vrot.slane %v4614_v45, 1 }
  0x32   : > { %568 = vrot.lane.b32.xlu1 %v4683_v1, %s4359_s27  ;;  %7424 = vst [vmem:[#allocation14_spill] sm:$0xff] %v4740_v3  ;;  %7427 = vst [vmem:[#allocation16_spill] sm:$0xff] %v4758_v35 }
  0x33   : > { %v4735_v16 = vsel %vm671_vm2, %v672_v53, %v7267_v5  ;;  %v7274_v53 = vmax.f32 %v4726_v12, 0.0  ;;  %v4751_v5 = vld [vmem:[%s4417_s26 + $0x118] sm:$0x3]  ;;  %v4776_v36 = vsel %vm461_vm0, %v512_v31, %v513_v51 }
  0x34   : > { %v7281_v55 = vmax.f32 %v4751_v5, 0.0  ;;  %7429 = vst [vmem:[#allocation18_spill] sm:$0xff] %v4776_v36 }
  0x35   : > { %570 = vrot.lane.b32.xlu0 %v4701_v60, %s4359_s27  ;;  %v7426_v60 = vmax.f32 %v4696_v59, 0.0 }
  0x36   : > { %572 = vrot.lane.b32.xlu1 %v4712_v33, %s4359_s27  ;;  %v515_v33 = vrot.slane %v7274_v53, 1 }
  0x37   : > { %v510_v1 = vrot.slane %v7426_v60, 1 }
  0x38   : > { %v4781_v53 = vsel %vm461_vm0, %v513_v51, %v515_v33  ;;  %v522_v33 = vrot.slane %v4649_v19, 1  ;;  %v523_v51 = vrot.slane %v4658_v23, 1 }
  0x39   : > { %574 = vrot.lane.b32.xlu0 %v4740_v3, %s4359_s27  ;;  %v4763_v60 = vsel %vm461_vm0, %v508_v2, %v510_v1  ;;  %v4769_v3 = vld [vmem:[%s4417_s26 + $0x130] sm:$0x3]  ;;  %v517_v1 = vrot.slane %v4625_v50, 1  ;;  %v518_v2 = vrot.slane %v4627_v52, 1  ;;  %7430 = vst [vmem:[#allocation19_spill] sm:$0xff] %v4781_v53 }
  0x3a   : > { %576 = vrot.lane.b32.xlu1 %v4745_v9, %s4359_s27  ;;  %7428 = vst [vmem:[#allocation17_spill] sm:$0xff] %v4763_v60  ;;  %v520_v9 = vrot.slane %v7281_v55, 1  ;;  %v7290_v29 = vmax.f32 %v4769_v3, 0.0 }
  0x3b   : > { %v4794_v31 = vsel %vm461_vm0, %v517_v1, %v518_v2  ;;  %v4812_v1 = vsel %vm461_vm0, %v522_v33, %v523_v51 }
  0x3c   : > { %7431 = vst [vmem:[#allocation20_spill] sm:$0xff] %v4794_v31  ;;  %v4799_v55 = vsel %vm461_vm0, %v518_v2, %v520_v9  ;;  %7433 = vst [vmem:[#allocation22_spill] sm:$0xff] %v4812_v1  ;;  %v528_v9 = vrot.slane %v4668_v38, 1 }
  0x3d   : > { %578 = vrot.lane.b32.xlu0 %v4758_v35, %s4359_s27  ;;  %v4787_v35 = vld [vmem:[%s4417_s26 + $0x148] sm:$0x3]  ;;  %7432 = vst [vmem:[#allocation21_spill] sm:$0xff] %v4799_v55 }
  0x3e   : > { %580 = vrot.lane.b32.xlu1 %v4763_v60, %s4359_s27  ;;  %v525_v60 = vrot.slane %v7290_v29, 1  ;;  %v7297_v25 = vmax.f32 %v4787_v35, 0.0 }
  0x40   : > { %v4817_v2 = vsel %vm461_vm0, %v523_v51, %v525_v60  ;;  %v530_v29 = vrot.slane %v7297_v25, 1  ;;  %v533_v60 = vrot.slane %v4688_v26, 1 }
  0x41   : > { %582 = vrot.lane.b32.xlu0 %v4776_v36, %s4359_s27  ;;  %v4805_v36 = vld [vmem:[%s4417_s26 + $0x160] sm:$0x3]  ;;  %7434 = vst [vmem:[#allocation23_spill] sm:$0xff] %v4817_v2 }
  0x42   : > { %584 = vrot.lane.b32.xlu1 %v4781_v53, %s4359_s27  ;;  %v527_v53 = vrot.slane %v4666_v49, 1  ;;  %v7304_v11 = vmax.f32 %v4805_v36, 0.0  ;;  %v4835_v51 = vsel %vm461_vm0, %v528_v9, %v530_v29 }
  0x43   : > { %7436 = vst [vmem:[#allocation25_spill] sm:$0xff] %v4835_v51 }
  0x44   : > { %v4830_v33 = vsel %vm461_vm0, %v527_v53, %v528_v9  ;;  %v535_v25 = vrot.slane %v7304_v11, 1 }
  0x45   : > { %586 = vrot.lane.b32.xlu0 %v4794_v31, %s4359_s27  ;;  %7435 = vst [vmem:[#allocation24_spill] sm:$0xff] %v4830_v33  ;;  %v7309_v31 = vmax.f32 %v4823_v63, 0.0 }
  0x46   : > { %588 = vrot.lane.b32.xlu1 %v4799_v55, %s4359_s27  ;;  %v532_v55 = vrot.slane %v4686_v40, 1  ;;  %v4850_v29 = vsel %vm461_vm0, %v533_v60, %v535_v25  ;;  %v677_v25 = vrot.slane %v4427_v6, 2 }
  0x47   : > { %7438 = vst [vmem:[#allocation27_spill] sm:$0xff] %v4850_v29  ;;  %v540_v9 = vrot.slane %v7309_v31, 1  ;;  %v7442_v31 = vrot.slane %v4424_v4, 2 }
  0x48   : > { %v4845_v53 = vsel %vm461_vm0, %v532_v55, %v533_v60  ;;  %v678_v60 = vrot.slane %v4432_v8, 2 }
  0x49   : > { %590 = vrot.lane.b32.xlu0 %v4812_v1, %s4359_s27  ;;  %7437 = vst [vmem:[#allocation26_spill] sm:$0xff] %v4845_v53  ;;  %v538_v1 = vrot.slane %v4716_v0, 1 }
  0x4a   : > { %592 = vrot.lane.b32.xlu1 %v4817_v2, %s4359_s27  ;;  %v537_v2 = vrot.slane %v4703_v15, 1 }
  0x4b   : > { %v4862_v55 = vsel %vm461_vm0, %v538_v1, %v540_v9 }
  0x4c   : > { %v4859_v11 = vsel %vm461_vm0, %v537_v2, %v538_v1  ;;  %7440 = vst [vmem:[#allocation29_spill] sm:$0xff] %v4862_v55  ;;  %v7443_v1 = vmax.f32 %v4436_v10, 0.0 }
  0x4d   : > { %594 = vrot.lane.b32.xlu0 %v4830_v33, %s4359_s27  ;;  %7439 = vst [vmem:[#allocation28_spill] sm:$0xff] %v4859_v11 }
  0x4e   : > { %596 = vrot.lane.b32.xlu1 %v4835_v51, %s4359_s27  ;;  %v7441_v51 = vmax.f32 %v4430_v7, 0.0  ;;  %v680_v9 = vrot.slane %v7443_v1, 2  ;;  %v4881_v7 = vsel %vm671_vm2, %v677_v25, %v678_v60  ;;  %v688_v25 = vrot.slane %v4492_v37, 2 }
  0x50   : > { %v675_v33 = vrot.slane %v7441_v51, 2  ;;  %v682_v51 = vrot.slane %v4456_v20, 2  ;;  %v4886_v4 = vsel %vm671_vm2, %v678_v60, %v680_v9  ;;  %v7446_v60 = vmax.f32 %v4471_v28, 0.0 }
  0x51   : > { %598 = vrot.lane.b32.xlu0 %v4845_v53, %s4359_s27  ;;  %v692_v9 = vrot.slane %v4500_v41, 2 }
  0x52   : > { %600 = vrot.lane.b32.xlu1 %v4850_v29, %s4359_s27  ;;  %v676_v2 = vsel %vm671_vm2, %v7442_v31, %v675_v33  ;;  %v7444_v31 = vmax.f32 %v4445_v17, 0.0  ;;  %v687_v33 = vrot.slane %v4468_v27, 2  ;;  %v690_v17 = vrot.slane %v7446_v60, 2 }
  0x53   : > { %v698_v60 = vrot.slane %v4513_v46, 2 }
  0x54   : > { %v685_v10 = vrot.slane %v7444_v31, 2  ;;  %v4909_v1 = vsel %vm671_vm2, %v687_v33, %v688_v25  ;;  %v4914_v31 = vsel %vm671_vm2, %v688_v25, %v690_v17  ;;  %v697_v33 = vrot.slane %v4507_v44, 2 }
  0x55   : > { %602 = vrot.lane.b32.xlu0 %v4859_v11, %s4359_s27  ;;  %7447 = vst [vmem:[#allocation31_spill] sm:$0xff] %v4914_v31  ;;  %v7450_v25 = vmax.f32 %v4542_v57, 0.0 }
  0x56   : > { %604 = vrot.lane.b32.xlu1 %v4862_v55, %s4359_s27  ;;  %v683_v55 = vrot.slane %v4458_v21, 2  ;;  %v4937_v17 = vsel %vm671_vm2, %v697_v33, %v698_v60  ;;  %v707_v33 = vrot.slane %v4550_v61, 2 }
  0x59   : > { %752 = vrot.lane.b32.xlu0 %v4735_v16, %s4360_s28  ;;  %v4895_v16 = vsel %vm671_vm2, %v682_v51, %v683_v55  ;;  %v693_v51 = vrot.slane %v4502_v42, 2 }
  0x5a   : > { %754 = vrot.lane.b32.xlu1 %v676_v2, %s4360_s28  ;;  %v4900_v2 = vsel %vm671_vm2, %v683_v55, %v685_v10  ;;  %v7448_v55 = vmax.f32 %v4505_v43, 0.0  ;;  %v700_v43 = vrot.slane %v7450_v25, 2  ;;  %v708_v25 = vrot.slane %v4552_v62, 2 }
  0x5b   : > { %7445 = vst [vmem:[#allocation30_spill] sm:$0xff] %v4900_v2  ;;  %v4923_v10 = vsel %vm671_vm2, %v692_v9, %v693_v51  ;;  %v702_v9 = vrot.slane %v4537_v56, 2 }
  0x5c   : > { %v695_v28 = vrot.slane %v7448_v55, 2  ;;  %v703_v55 = vrot.slane %v4544_v58, 2 }
  0x5d   : > { %756 = vrot.lane.b32.xlu0 %v4881_v7, %s4360_s28 }
  0x5e   : > { %758 = vrot.lane.b32.xlu1 %v4886_v4, %s4360_s28 }
  0x61   : > { %760 = vrot.lane.b32.xlu0 %v4895_v16, %s4360_s28 }
  0x62   : > { %762 = vrot.lane.b32.xlu1 %v4900_v2, %s4360_s28  ;;  %v4928_v2 = vsel %vm671_vm2, %v693_v51, %v695_v28  ;;  %v7452_v51 = vmax.f32 %v4582_v18, 0.0  ;;  %v4951_v28 = vsel %vm671_vm2, %v702_v9, %v703_v55  ;;  %v712_v9 = vrot.slane %v4572_v13, 2 }
  0x63   : > { %7449 = vst [vmem:[#allocation32_spill] sm:$0xff] %v4928_v2 }
  0x64   : > { %v705_v57 = vrot.slane %v7452_v51, 2  ;;  %v713_v51 = vrot.slane %v4574_v14, 2 }
  0x65   : > { %764 = vrot.lane.b32.xlu0 %v4909_v1, %s4360_s28 }
  0x66   : > { %766 = vrot.lane.b32.xlu1 %v4914_v31, %s4360_s28  ;;  %v4942_v31 = vsel %vm671_vm2, %v698_v60, %v700_v43  ;;  %v7454_v60 = vmax.f32 %v4612_v39, 0.0  ;;  %v4965_v43 = vsel %vm671_vm2, %v707_v33, %v708_v25  ;;  %v717_v33 = vrot.slane %v4589_v24, 2 }
  0x67   : > { %7451 = vst [vmem:[#allocation33_spill] sm:$0xff] %v4942_v31 }
  0x68   : > { %v710_v18 = vrot.slane %v7454_v60, 2  ;;  %v718_v60 = vrot.slane %v4604_v32, 2 }
  0x69   : > { %768 = vrot.lane.b32.xlu0 %v4923_v10, %s4360_s28 }
  0x6a   : > { %770 = vrot.lane.b32.xlu1 %v4928_v2, %s4360_s28  ;;  %v4956_v2 = vsel %vm671_vm2, %v703_v55, %v705_v57  ;;  %v7456_v55 = vmax.f32 %v4656_v22, 0.0  ;;  %v4979_v57 = vsel %vm671_vm2, %v712_v9, %v713_v51  ;;  %v722_v9 = vrot.slane %v4614_v45, 2 }
  0x6b   : > { %7453 = vst [vmem:[#allocation34_spill] sm:$0xff] %v4956_v2 }
  0x6c   : > { %v715_v39 = vrot.slane %v7456_v55, 2  ;;  %v723_v55 = vrot.slane %v4616_v47, 2 }
  0x6d   : > { %772 = vrot.lane.b32.xlu0 %v4937_v17, %s4360_s28 }
  0x6e   : > { %774 = vrot.lane.b32.xlu1 %v4942_v31, %s4360_s28  ;;  %v4970_v31 = vsel %vm671_vm2, %v708_v25, %v710_v18  ;;  %v7458_v25 = vmax.f32 %v4696_v59, 0.0  ;;  %v4993_v18 = vsel %vm671_vm2, %v717_v33, %v718_v60  ;;  %v727_v33 = vrot.slane %v4625_v50, 2 }
  0x6f   : > { %7455 = vst [vmem:[#allocation35_spill] sm:$0xff] %v4970_v31 }
  0x70   : > { %v720_v22 = vrot.slane %v7458_v25, 2  ;;  %v728_v25 = vrot.slane %v4627_v52, 2 }
  0x71   : > { %776 = vrot.lane.b32.xlu0 %v4951_v28, %s4360_s28 }
  0x72   : > { %778 = vrot.lane.b32.xlu1 %v4956_v2, %s4360_s28  ;;  %v4984_v2 = vsel %vm671_vm2, %v713_v51, %v715_v39  ;;  %v7460_v51 = vmax.f32 %v4726_v12, 0.0  ;;  %v5007_v39 = vsel %vm671_vm2, %v722_v9, %v723_v55  ;;  %v732_v9 = vrot.slane %v4649_v19, 2 }
  0x73   : > { %7457 = vst [vmem:[#allocation36_spill] sm:$0xff] %v4984_v2 }
  0x74   : > { %v725_v59 = vrot.slane %v7460_v51, 2  ;;  %v733_v51 = vrot.slane %v4658_v23, 2 }
  0x75   : > { %780 = vrot.lane.b32.xlu0 %v4965_v43, %s4360_s28 }
  0x76   : > { %782 = vrot.lane.b32.xlu1 %v4970_v31, %s4360_s28  ;;  %v4998_v31 = vsel %vm671_vm2, %v718_v60, %v720_v22  ;;  %v7462_v60 = vmax.f32 %v4751_v5, 0.0  ;;  %v5021_v22 = vsel %vm671_vm2, %v727_v33, %v728_v25  ;;  %v737_v33 = vrot.slane %v4666_v49, 2 }
  0x77   : > { %7459 = vst [vmem:[#allocation37_spill] sm:$0xff] %v4998_v31 }
  0x78   : > { %v730_v12 = vrot.slane %v7462_v60, 2  ;;  %v738_v60 = vrot.slane %v4668_v38, 2 }
  0x79   : > { %784 = vrot.lane.b32.xlu0 %v4979_v57, %s4360_s28 }
  0x7a   : > { %786 = vrot.lane.b32.xlu1 %v4984_v2, %s4360_s28  ;;  %v5012_v2 = vsel %vm671_vm2, %v723_v55, %v725_v59  ;;  %v7464_v55 = vmax.f32 %v4769_v3, 0.0  ;;  %v5035_v59 = vsel %vm671_vm2, %v732_v9, %v733_v51  ;;  %v742_v9 = vrot.slane %v4686_v40, 2 }
  0x7b   : > { %7461 = vst [vmem:[#allocation38_spill] sm:$0xff] %v5012_v2  ;;  %7465 = vst [vmem:[#allocation40_spill] sm:$0xff] %v5035_v59 }
  0x7c   : > { %v735_v5 = vrot.slane %v7464_v55, 2  ;;  %v743_v55 = vrot.slane %v4688_v26, 2 }
  0x7d   : > { %788 = vrot.lane.b32.xlu0 %v4993_v18, %s4360_s28 }
  0x7e   : > { %790 = vrot.lane.b32.xlu1 %v4998_v31, %s4360_s28  ;;  %v5026_v31 = vsel %vm671_vm2, %v728_v25, %v730_v12  ;;  %v7467_v25 = vmax.f32 %v4787_v35, 0.0  ;;  %v5049_v12 = vsel %vm671_vm2, %v737_v33, %v738_v60  ;;  %v7470_v35 = vmax.f32 %v4805_v36, 0.0 }
  0x7f   : > { %7463 = vst [vmem:[#allocation39_spill] sm:$0xff] %v5026_v31  ;;  %7468 = vst [vmem:[#allocation42_spill] sm:$0xff] %v5049_v12  ;;  %v5065_v33 = vsel %vm671_vm2, %v742_v9, %v743_v55 }
  0x80   : > { %v740_v3 = vrot.slane %v7467_v25, 2  ;;  %7471 = vst [vmem:[#allocation44_spill] sm:$0xff] %v5065_v33 }
  0x81   : > { %792 = vrot.lane.b32.xlu0 %v5007_v39, %s4360_s28 }
  0x82   : > { %794 = vrot.lane.b32.xlu1 %v5012_v2, %s4360_s28  ;;  %v5040_v2 = vsel %vm671_vm2, %v733_v51, %v735_v5  ;;  %v5054_v51 = vsel %vm671_vm2, %v738_v60, %v740_v3  ;;  %v745_v5 = vrot.slane %v7470_v35, 2  ;;  %v747_v60 = vrot.slane %v4703_v15, 2 }
  0x83   : > { %7466 = vst [vmem:[#allocation41_spill] sm:$0xff] %v5040_v2  ;;  %7469 = vst [vmem:[#allocation43_spill] sm:$0xff] %v5054_v51  ;;  %v748_v3 = vrot.slane %v4716_v0, 2 }
  0x84   : > { %v5070_v35 = vsel %vm671_vm2, %v743_v55, %v745_v5 }
  0x85   : > { %796 = vrot.lane.b32.xlu0 %v5021_v22, %s4360_s28  ;;  %7472 = vst [vmem:[#allocation45_spill] sm:$0xff] %v5070_v35  ;;  %v5081_v9 = vsel %vm671_vm2, %v747_v60, %v748_v3 }
  0x86   : > { %798 = vrot.lane.b32.xlu1 %v5026_v31, %s4360_s28 }
  0x89   : > { %800 = vrot.lane.b32.xlu0 %v5035_v59, %s4360_s28 }
  0x8a   : > { %802 = vrot.lane.b32.xlu1 %v5040_v2, %s4360_s28 }
  0x8b   : > { %v543_v31 = vpop.permute.xlu0 %542 }
  0x8c   : > { %639 = vst.msk [vmem:[#allocation2] sm:$0xff] %vm638_vm3, %v543_v31  ;;  %v547_v25 = vpop.permute.xlu1 %546  ;;  %v7473_v31 = vmax.f32 %v4823_v63, 0.0 }
  0x8d   : > { %641 = vst.msk [vmem:[#allocation2 + $0x10] sm:$0xff] %vm638_vm3, %v547_v25  ;;  %804 = vrot.lane.b32.xlu0 %v5049_v12, %s4360_s28 }
  0x8e   : > { %806 = vrot.lane.b32.xlu1 %v5054_v51, %s4360_s28  ;;  %v750_v25 = vrot.slane %v7473_v31, 2 }
  0x8f   : > { %v545_v36 = vpop.permute.xlu0 %544 }
  0x90   : > { %640 = vst.msk [vmem:[#allocation2 + $0x8] sm:$0xff] %vm638_vm3, %v545_v36  ;;  %v549_v12 = vpop.permute.xlu1 %548  ;;  %v5084_v55 = vsel %vm671_vm2, %v748_v3, %v750_v25 }
  0x91   : > { %642 = vst.msk [vmem:[#allocation2 + $0x18] sm:$0xff] %vm638_vm3, %v549_v12  ;;  %808 = vrot.lane.b32.xlu0 %v5065_v33, %s4360_s28 }
  0x92   : > { %810 = vrot.lane.b32.xlu1 %v5070_v35, %s4360_s28 }
  0x93   : > { %v551_v51 = vpop.permute.xlu0 %550 }
  0x94   : > { %643 = vst.msk [vmem:[#allocation2 + $0x20] sm:$0xff] %vm638_vm3, %v551_v51  ;;  %v553_v63 = vpop.permute.xlu1 %552 }
  0x95   : > { %644 = vst.msk [vmem:[#allocation2 + $0x28] sm:$0xff] %vm638_vm3, %v553_v63  ;;  %812 = vrot.lane.b32.xlu0 %v5081_v9, %s4360_s28 }
  0x96   : > { %814 = vrot.lane.b32.xlu1 %v5084_v55, %s4360_s28 }
  0x97   : > { %v555_v12 = vpop.permute.xlu0 %554 }
  0x98   : > { %645 = vst.msk [vmem:[#allocation2 + $0x30] sm:$0xff] %vm638_vm3, %v555_v12  ;;  %v557_v5 = vpop.permute.xlu1 %556 }
  0x99   : > { %646 = vst.msk [vmem:[#allocation2 + $0x38] sm:$0xff] %vm638_vm3, %v557_v5  ;;  %883 = vrot.lane.b32.xlu0 %v4427_v6, %s4361_s29 }
  0x9a   : > { %885 = vrot.lane.b32.xlu1 %v4432_v8, %s4361_s29 }
  0x9b   : > { %v559_v51 = vpop.permute.xlu0 %558 }
  0x9c   : > { %647 = vst.msk [vmem:[#allocation2 + $0x40] sm:$0xff] %vm638_vm3, %v559_v51  ;;  %v561_v60 = vpop.permute.xlu1 %560 }
  0x9d   : > { %648 = vst.msk [vmem:[#allocation2 + $0x48] sm:$0xff] %vm638_vm3, %v561_v60  ;;  %887 = vrot.lane.b32.xlu0 %v4456_v20, %s4361_s29 }
  0x9e   : > { %889 = vrot.lane.b32.xlu1 %v4458_v21, %s4361_s29 }
  0x9f   : > { %v563_v3 = vpop.permute.xlu0 %562 }
  0xa0   : > { %649 = vst.msk [vmem:[#allocation2 + $0x50] sm:$0xff] %vm638_vm3, %v563_v3  ;;  %v565_v36 = vpop.permute.xlu1 %564 }
  0xa1   : > { %650 = vst.msk [vmem:[#allocation2 + $0x58] sm:$0xff] %vm638_vm3, %v565_v36  ;;  %891 = vrot.lane.b32.xlu0 %v4468_v27, %s4361_s29 }
  0xa2   : > { %893 = vrot.lane.b32.xlu1 %v4492_v37, %s4361_s29 }
  0xa3   : > { %v567_v6 = vpop.permute.xlu0 %566 }
  0xa4   : > { %651 = vst.msk [vmem:[#allocation2 + $0x60] sm:$0xff] %vm638_vm3, %v567_v6  ;;  %v569_v8 = vpop.permute.xlu1 %568 }
  0xa5   : > { %652 = vst.msk [vmem:[#allocation2 + $0x68] sm:$0xff] %vm638_vm3, %v569_v8  ;;  %895 = vrot.lane.b32.xlu0 %v4500_v41, %s4361_s29 }
  0xa6   : > { %897 = vrot.lane.b32.xlu1 %v4502_v42, %s4361_s29 }
  0xa7   : > { %v571_v31 = vpop.permute.xlu0 %570 }
  0xa8   : > { %653 = vst.msk [vmem:[#allocation2 + $0x70] sm:$0xff] %vm638_vm3, %v571_v31  ;;  %v573_v25 = vpop.permute.xlu1 %572 }
  0xa9   : > { %654 = vst.msk [vmem:[#allocation2 + $0x78] sm:$0xff] %vm638_vm3, %v573_v25  ;;  %899 = vrot.lane.b32.xlu0 %v4507_v44, %s4361_s29 }
  0xaa   : > { %901 = vrot.lane.b32.xlu1 %v4513_v46, %s4361_s29 }
  0xab   : > { %v575_v63 = vpop.permute.xlu0 %574 }
  0xac   : > { %655 = vst.msk [vmem:[#allocation2 + $0x80] sm:$0xff] %vm638_vm3, %v575_v63  ;;  %v577_v12 = vpop.permute.xlu1 %576 }
  0xad   : > { %656 = vst.msk [vmem:[#allocation2 + $0x88] sm:$0xff] %vm638_vm3, %v577_v12  ;;  %903 = vrot.lane.b32.xlu0 %v4537_v56, %s4361_s29 }
  0xae   : > { %905 = vrot.lane.b32.xlu1 %v4544_v58, %s4361_s29 }
  0xaf   : > { %v579_v5 = vpop.permute.xlu0 %578 }
  0xb0   : > { %657 = vst.msk [vmem:[#allocation2 + $0x90] sm:$0xff] %vm638_vm3, %v579_v5  ;;  %v581_v51 = vpop.permute.xlu1 %580 }
  0xb1   : > { %658 = vst.msk [vmem:[#allocation2 + $0x98] sm:$0xff] %vm638_vm3, %v581_v51  ;;  %907 = vrot.lane.b32.xlu0 %v4550_v61, %s4361_s29 }
  0xb2   : > { %909 = vrot.lane.b32.xlu1 %v4552_v62, %s4361_s29 }
  0xb3   : > { %v583_v60 = vpop.permute.xlu0 %582 }
  0xb4   : > { %659 = vst.msk [vmem:[#allocation2 + $0xa0] sm:$0xff] %vm638_vm3, %v583_v60  ;;  %v585_v3 = vpop.permute.xlu1 %584 }
  0xb5   : > { %660 = vst.msk [vmem:[#allocation2 + $0xa8] sm:$0xff] %vm638_vm3, %v585_v3  ;;  %911 = vrot.lane.b32.xlu0 %v4572_v13, %s4361_s29 }
  0xb6   : > { %913 = vrot.lane.b32.xlu1 %v4574_v14, %s4361_s29 }
  0xb7   : > { %v587_v36 = vpop.permute.xlu0 %586 }
  0xb8   : > { %661 = vst.msk [vmem:[#allocation2 + $0xb0] sm:$0xff] %vm638_vm3, %v587_v36  ;;  %v589_v6 = vpop.permute.xlu1 %588 }
  0xb9   : > { %662 = vst.msk [vmem:[#allocation2 + $0xb8] sm:$0xff] %vm638_vm3, %v589_v6  ;;  %915 = vrot.lane.b32.xlu0 %v4589_v24, %s4361_s29  ;;  %v320_v6 = vld [vmem:[%s4417_s26 + $0x180] sm:$0xff] }
  0xba   : > { %917 = vrot.lane.b32.xlu1 %v4604_v32, %s4361_s29 }
  0xbb   : > { %v591_v8 = vpop.permute.xlu0 %590 }
  0xbc   : > { %663 = vst.msk [vmem:[#allocation2 + $0xc0] sm:$0xff] %vm638_vm3, %v591_v8  ;;  %v593_v31 = vpop.permute.xlu1 %592 }
  0xbd   : > { %664 = vst.msk [vmem:[#allocation2 + $0xc8] sm:$0xff] %vm638_vm3, %v593_v31  ;;  %919 = vrot.lane.b32.xlu0 %v4614_v45, %s4361_s29  ;;  %v321_v31 = vld [vmem:[%s4417_s26 + $0x188] sm:$0xff] }
  0xbe   : > { %921 = vrot.lane.b32.xlu1 %v4616_v47, %s4361_s29 }
  0xbf   : > { %v595_v25 = vpop.permute.xlu0 %594 }
  0xc0   : > { %665 = vst.msk [vmem:[#allocation2 + $0xd0] sm:$0xff] %vm638_vm3, %v595_v25  ;;  %v597_v63 = vpop.permute.xlu1 %596 }
  0xc1   : > { %666 = vst.msk [vmem:[#allocation2 + $0xd8] sm:$0xff] %vm638_vm3, %v597_v63  ;;  %923 = vrot.lane.b32.xlu0 %v4625_v50, %s4361_s29  ;;  %v5182_v63 = vmax.f32 %v320_v6, 0.0 }
  0xc2   : > { %925 = vrot.lane.b32.xlu1 %v4627_v52, %s4361_s29 }
  0xc3   : > { %v599_v12 = vpop.permute.xlu0 %598 }
  0xc4   : > { %667 = vst.msk [vmem:[#allocation2 + $0xe0] sm:$0xff] %vm638_vm3, %v599_v12  ;;  %v601_v5 = vpop.permute.xlu1 %600  ;;  %v5186_v12 = vmax.f32 %v321_v31, 0.0 }
  0xc5   : > { %668 = vst.msk [vmem:[#allocation2 + $0xe8] sm:$0xff] %vm638_vm3, %v601_v5  ;;  %927 = vrot.lane.b32.xlu0 %v4649_v19, %s4361_s29 }
  0xc6   : > { %929 = vrot.lane.b32.xlu1 %v4658_v23, %s4361_s29 }
  0xc7   : > { %v603_v51 = vpop.permute.xlu0 %602 }
  0xc8   : > { %669 = vst.msk [vmem:[#allocation2 + $0xf0] sm:$0xff] %vm638_vm3, %v603_v51  ;;  %v605_v60 = vpop.permute.xlu1 %604 }
  0xc9   : > { %670 = vst.msk [vmem:[#allocation2 + $0xf8] sm:$0xff] %vm638_vm3, %v605_v60  ;;  %931 = vrot.lane.b32.xlu0 %v4666_v49, %s4361_s29 }
  0xca   : > { %933 = vrot.lane.b32.xlu1 %v4668_v38, %s4361_s29 }
  0xcb   : > { %v753_v3 = vpop.permute.xlu0 %752 }
  0xcc   : > { %849 = vst.msk [vmem:[#allocation2] sm:$0xff] %vm848_vm4, %v753_v3  ;;  %v755_v36 = vpop.permute.xlu1 %754 }
  0xcd   : > { %850 = vst.msk [vmem:[#allocation2 + $0x8] sm:$0xff] %vm848_vm4, %v755_v36  ;;  %935 = vrot.lane.b32.xlu0 %v4686_v40, %s4361_s29 }
  0xce   : > { %937 = vrot.lane.b32.xlu1 %v4688_v26, %s4361_s29 }
  0xcf   : > { %v757_v8 = vpop.permute.xlu0 %756 }
  0xd0   : > { %851 = vst.msk [vmem:[#allocation2 + $0x10] sm:$0xff] %vm848_vm4, %v757_v8  ;;  %v759_v25 = vpop.permute.xlu1 %758 }
  0xd1   : > { %852 = vst.msk [vmem:[#allocation2 + $0x18] sm:$0xff] %vm848_vm4, %v759_v25  ;;  %939 = vrot.lane.b32.xlu0 %v4703_v15, %s4361_s29 }
  0xd2   : > { %941 = vrot.lane.b32.xlu1 %v4716_v0, %s4361_s29 }
  0xd3   : > { %v761_v5 = vpop.permute.xlu0 %760 }
  0xd4   : > { %853 = vst.msk [vmem:[#allocation2 + $0x20] sm:$0xff] %vm848_vm4, %v761_v5  ;;  %v763_v51 = vpop.permute.xlu1 %762 }
  0xd5   : > { %854 = vst.msk [vmem:[#allocation2 + $0x28] sm:$0xff] %vm848_vm4, %v763_v51  ;;  %943 = vrot.lane.b32.xlu0 %v5182_v63, %s4361_s29  ;;  %v7476_v51 = vld [vmem:[#allocation6_spill] sm:$0xff] }
  0xd6   : > { %945 = vrot.lane.b32.xlu1 %v5186_v12, %s4361_s29 }
  0xd7   : > { %v765_v60 = vpop.permute.xlu0 %764 }
  0xd8   : > { %855 = vst.msk [vmem:[#allocation2 + $0x30] sm:$0xff] %vm848_vm4, %v765_v60  ;;  %v767_v3 = vpop.permute.xlu1 %766  ;;  %v7477_v60 = vld [vmem:[#allocation7_spill] sm:$0xff] }
  0xd9   : > { %856 = vst.msk [vmem:[#allocation2 + $0x38] sm:$0xff] %vm848_vm4, %v767_v3  ;;  %1018 = vrot.lane.b32.xlu0 %v4476_v30, %s4362_s30  ;;  %v7474_v30 = vld [vmem:[#allocation4_spill] sm:$0xff] }
  0xda   : > { %1020 = vrot.lane.b32.xlu1 %v4488_v34, %s4362_s30  ;;  %v7475_v34 = vld [vmem:[#allocation5_spill] sm:$0xff] }
  0xdb   : > { %v769_v36 = vpop.permute.xlu0 %768 }
  0xdc   : > { %857 = vst.msk [vmem:[#allocation2 + $0x40] sm:$0xff] %vm848_vm4, %v769_v36  ;;  %v771_v6 = vpop.permute.xlu1 %770 }
  0xdd   : > { %858 = vst.msk [vmem:[#allocation2 + $0x48] sm:$0xff] %vm848_vm4, %v771_v6  ;;  %1022 = vrot.lane.b32.xlu0 %v4523_v48, %s4362_s30  ;;  %v7478_v6 = vld [vmem:[#allocation8_spill] sm:$0xff] }
  0xde   : > { %1024 = vrot.lane.b32.xlu1 %v4533_v54, %s4362_s30 }
  0xdf   : > { %v773_v8 = vpop.permute.xlu0 %772 }
  0xe0   : > { %859 = vst.msk [vmem:[#allocation2 + $0x50] sm:$0xff] %vm848_vm4, %v773_v8  ;;  %v775_v31 = vpop.permute.xlu1 %774  ;;  %v7479_v8 = vld [vmem:[#allocation9_spill] sm:$0xff] }
  0xe1   : > { %860 = vst.msk [vmem:[#allocation2 + $0x58] sm:$0xff] %vm848_vm4, %v775_v31  ;;  %1026 = vrot.lane.b32.xlu0 %v7474_v30, %s4362_s30 }
  0xe2   : > { %1028 = vrot.lane.b32.xlu1 %v7475_v34, %s4362_s30 }
  0xe3   : > { %v777_v25 = vpop.permute.xlu0 %776 }
  0xe4   : > { %861 = vst.msk [vmem:[#allocation2 + $0x60] sm:$0xff] %vm848_vm4, %v777_v25  ;;  %v779_v5 = vpop.permute.xlu1 %778 }
  0xe5   : > { %862 = vst.msk [vmem:[#allocation2 + $0x68] sm:$0xff] %vm848_vm4, %v779_v5  ;;  %1030 = vrot.lane.b32.xlu0 %v7476_v51, %s4362_s30  ;;  %v7480_v5 = vld [vmem:[#allocation10_spill] sm:$0xff] }
  0xe6   : > { %1032 = vrot.lane.b32.xlu1 %v7477_v60, %s4362_s30 }
  0xe7   : > { %v781_v3 = vpop.permute.xlu0 %780 }
  0xe8   : > { %863 = vst.msk [vmem:[#allocation2 + $0x70] sm:$0xff] %vm848_vm4, %v781_v3  ;;  %v783_v36 = vpop.permute.xlu1 %782  ;;  %v7481_v3 = vld [vmem:[#allocation11_spill] sm:$0xff] }
  0xe9   : > { %864 = vst.msk [vmem:[#allocation2 + $0x78] sm:$0xff] %vm848_vm4, %v783_v36  ;;  %1034 = vrot.lane.b32.xlu0 %v7478_v6, %s4362_s30 }
  0xea   : > { %1036 = vrot.lane.b32.xlu1 %v7479_v8, %s4362_s30  ;;  %v7482_v8 = vld [vmem:[#allocation12_spill] sm:$0xff] }
  0xeb   : > { %v785_v31 = vpop.permute.xlu0 %784 }
  0xec   : > { %865 = vst.msk [vmem:[#allocation2 + $0x80] sm:$0xff] %vm848_vm4, %v785_v31  ;;  %v787_v25 = vpop.permute.xlu1 %786  ;;  %v7483_v31 = vld [vmem:[#allocation13_spill] sm:$0xff] }
  0xed   : > { %866 = vst.msk [vmem:[#allocation2 + $0x88] sm:$0xff] %vm848_vm4, %v787_v25  ;;  %1038 = vrot.lane.b32.xlu0 %v7480_v5, %s4362_s30 }
  0xee   : > { %1040 = vrot.lane.b32.xlu1 %v7481_v3, %s4362_s30  ;;  %v7484_v3 = vld [vmem:[#allocation14_spill] sm:$0xff] }
  0xef   : > { %v789_v60 = vpop.permute.xlu0 %788 }
  0xf0   : > { %867 = vst.msk [vmem:[#allocation2 + $0x90] sm:$0xff] %vm848_vm4, %v789_v60  ;;  %v791_v36 = vpop.permute.xlu1 %790  ;;  %v7485_v60 = vld [vmem:[#allocation15_spill] sm:$0xff] }
  0xf1   : > { %868 = vst.msk [vmem:[#allocation2 + $0x98] sm:$0xff] %vm848_vm4, %v791_v36  ;;  %1042 = vrot.lane.b32.xlu0 %v7482_v8, %s4362_s30 }
  0xf2   : > { %1044 = vrot.lane.b32.xlu1 %v7483_v31, %s4362_s30  ;;  %v7486_v31 = vld [vmem:[#allocation16_spill] sm:$0xff] }
  0xf3   : > { %v793_v6 = vpop.permute.xlu0 %792 }
  0xf4   : > { %869 = vst.msk [vmem:[#allocation2 + $0xa0] sm:$0xff] %vm848_vm4, %v793_v6  ;;  %v795_v25 = vpop.permute.xlu1 %794  ;;  %v7487_v6 = vld [vmem:[#allocation17_spill] sm:$0xff] }
  0xf5   : > { %870 = vst.msk [vmem:[#allocation2 + $0xa8] sm:$0xff] %vm848_vm4, %v795_v25  ;;  %1046 = vrot.lane.b32.xlu0 %v7484_v3, %s4362_s30 }
  0xf6   : > { %1048 = vrot.lane.b32.xlu1 %v7485_v60, %s4362_s30  ;;  %v7488_v60 = vld [vmem:[#allocation18_spill] sm:$0xff] }
  0xf7   : > { %v797_v5 = vpop.permute.xlu0 %796 }
  0xf8   : > { %871 = vst.msk [vmem:[#allocation2 + $0xb0] sm:$0xff] %vm848_vm4, %v797_v5  ;;  %v799_v36 = vpop.permute.xlu1 %798  ;;  %v7489_v5 = vld [vmem:[#allocation19_spill] sm:$0xff] }
  0xf9   : > { %872 = vst.msk [vmem:[#allocation2 + $0xb8] sm:$0xff] %vm848_vm4, %v799_v36  ;;  %1050 = vrot.lane.b32.xlu0 %v7486_v31, %s4362_s30 }
  0xfa   : > { %1052 = vrot.lane.b32.xlu1 %v7487_v6, %s4362_s30  ;;  %v7490_v6 = vld [vmem:[#allocation20_spill] sm:$0xff] }
  0xfb   : > { %v801_v8 = vpop.permute.xlu0 %800 }
  0xfc   : > { %873 = vst.msk [vmem:[#allocation2 + $0xc0] sm:$0xff] %vm848_vm4, %v801_v8  ;;  %v803_v25 = vpop.permute.xlu1 %802  ;;  %v7491_v8 = vld [vmem:[#allocation21_spill] sm:$0xff] }
  0xfd   : > { %874 = vst.msk [vmem:[#allocation2 + $0xc8] sm:$0xff] %vm848_vm4, %v803_v25  ;;  %1054 = vrot.lane.b32.xlu0 %v7488_v60, %s4362_s30 }
  0xfe   : > { %1056 = vrot.lane.b32.xlu1 %v7489_v5, %s4362_s30  ;;  %v7492_v5 = vld [vmem:[#allocation22_spill] sm:$0xff] }
  0xff   : > { %v805_v36 = vpop.permute.xlu0 %804 }
 0x100   : > { %875 = vst.msk [vmem:[#allocation2 + $0xd0] sm:$0xff] %vm848_vm4, %v805_v36  ;;  %v807_v31 = vpop.permute.xlu1 %806  ;;  %v7493_v36 = vld [vmem:[#allocation23_spill] sm:$0xff] }
 0x101   : > { %876 = vst.msk [vmem:[#allocation2 + $0xd8] sm:$0xff] %vm848_vm4, %v807_v31  ;;  %1058 = vrot.lane.b32.xlu0 %v7490_v6, %s4362_s30  ;;  %v5268_v6 = vld [vmem:[%s4417_s26 + $0x190] sm:$0x3] }
 0x102   : > { %1060 = vrot.lane.b32.xlu1 %v7491_v8, %s4362_s30  ;;  %v7494_v8 = vld [vmem:[#allocation24_spill] sm:$0xff] }
 0x103   : > { %v809_v25 = vpop.permute.xlu0 %808 }
 0x104   : > { %877 = vst.msk [vmem:[#allocation2 + $0xe0] sm:$0xff] %vm848_vm4, %v809_v25  ;;  %v811_v60 = vpop.permute.xlu1 %810 }
 0x105   : > { %878 = vst.msk [vmem:[#allocation2 + $0xe8] sm:$0xff] %vm848_vm4, %v811_v60  ;;  %1062 = vrot.lane.b32.xlu0 %v7492_v5, %s4362_s30  ;;  %v7495_v60 = vld [vmem:[#allocation25_spill] sm:$0xff]  ;;  %v7338_v5 = vmax.f32 %v5268_v6, 0.0 }
 0x106   : > { %1064 = vrot.lane.b32.xlu1 %v7493_v36, %s4362_s30 }
 0x107   : > { %v813_v3 = vpop.permute.xlu0 %812 }
 0x108   : > { %879 = vst.msk [vmem:[#allocation2 + $0xf0] sm:$0xff] %vm848_vm4, %v813_v3  ;;  %v815_v31 = vpop.permute.xlu1 %814  ;;  %v1013_v3 = vrot.slane %v5182_v63, 1 }
 0x109   : > { %880 = vst.msk [vmem:[#allocation2 + $0xf8] sm:$0xff] %vm848_vm4, %v815_v31  ;;  %1066 = vrot.lane.b32.xlu0 %v7494_v8, %s4362_s30  ;;  %v1014_v31 = vrot.slane %v5186_v12, 1 }
 0x10a   : > { %1068 = vrot.lane.b32.xlu1 %v7495_v60, %s4362_s30  ;;  %v1016_v60 = vrot.slane %v7338_v5, 1 }
 0x10b   : > { %v884_v25 = vpop.permute.xlu0 %883 }
 0x10c   : > { %980 = vst.msk [vmem:[#allocation2] sm:$0xff] %vm979_vm5, %v884_v25  ;;  %v886_v36 = vpop.permute.xlu1 %885  ;;  %v5296_v51 = vsel %vm461_vm0, %v1014_v31, %v1016_v60  ;;  %v7499_v60 = vld [vmem:[#allocation30_spill] sm:$0xff] }
 0x10d   : > { %981 = vst.msk [vmem:[#allocation2 + $0x8] sm:$0xff] %vm979_vm5, %v886_v36  ;;  %1070 = vrot.lane.b32.xlu0 %v4845_v53, %s4362_s30  ;;  %v7496_v36 = vld [vmem:[#allocation29_spill] sm:$0xff]  ;;  %7498 = vst [vmem:[#allocation5_spill] sm:$0xff] %v5296_v51 }
 0x10e   : > { %1072 = vrot.lane.b32.xlu1 %v4850_v29, %s4362_s30  ;;  %v5293_v29 = vsel %vm461_vm0, %v1013_v3, %v1014_v31 }
 0x10f   : > { %v888_v8 = vpop.permute.xlu0 %887  ;;  %7497 = vst [vmem:[#allocation4_spill] sm:$0xff] %v5293_v29 }
 0x110   : > { %982 = vst.msk [vmem:[#allocation2 + $0x10] sm:$0xff] %vm979_vm5, %v888_v8  ;;  %v890_v25 = vpop.permute.xlu1 %889 }
 0x111   : > { %983 = vst.msk [vmem:[#allocation2 + $0x18] sm:$0xff] %vm979_vm5, %v890_v25  ;;  %1074 = vrot.lane.b32.xlu0 %v4859_v11, %s4362_s30 }
 0x112   : > { %1076 = vrot.lane.b32.xlu1 %v7496_v36, %s4362_s30 }
 0x113   : > { %v892_v53 = vpop.permute.xlu0 %891 }
 0x114   : > { %984 = vst.msk [vmem:[#allocation2 + $0x20] sm:$0xff] %vm979_vm5, %v892_v53  ;;  %v894_v5 = vpop.permute.xlu1 %893 }
 0x115   : > { %985 = vst.msk [vmem:[#allocation2 + $0x28] sm:$0xff] %vm979_vm5, %v894_v5  ;;  %1078 = vrot.lane.b32.xlu0 %v5293_v29, %s4362_s30 }
 0x116   : > { %1080 = vrot.lane.b32.xlu1 %v5296_v51, %s4362_s30 }
 0x117   : > { %v896_v8 = vpop.permute.xlu0 %895 }
 0x118   : > { %986 = vst.msk [vmem:[#allocation2 + $0x30] sm:$0xff] %vm979_vm5, %v896_v8  ;;  %v898_v3 = vpop.permute.xlu1 %897 }
 0x119   : > { %987 = vst.msk [vmem:[#allocation2 + $0x38] sm:$0xff] %vm979_vm5, %v898_v3  ;;  %1152 = vrot.lane.b32.xlu0 %v4881_v7, %s4363_s7  ;;  %v7500_v7 = vld [vmem:[#allocation31_spill] sm:$0xff]  ;;  %v7501_v3 = vld [vmem:[#allocation32_spill] sm:$0xff] }
 0x11a   : > { %1154 = vrot.lane.b32.xlu1 %v4886_v4, %s4363_s7 }
 0x11b   : > { %v900_v53 = vpop.permute.xlu0 %899 }
 0x11c   : > { %988 = vst.msk [vmem:[#allocation2 + $0x40] sm:$0xff] %vm979_vm5, %v900_v53  ;;  %v902_v5 = vpop.permute.xlu1 %901 }
 0x11d   : > { %989 = vst.msk [vmem:[#allocation2 + $0x48] sm:$0xff] %vm979_vm5, %v902_v5  ;;  %1156 = vrot.lane.b32.xlu0 %v4895_v16, %s4363_s7 }
 0x11e   : > { %1158 = vrot.lane.b32.xlu1 %v7499_v60, %s4363_s7 }
 0x11f   : > { %v904_v31 = vpop.permute.xlu0 %903 }
 0x120   : > { %990 = vst.msk [vmem:[#allocation2 + $0x50] sm:$0xff] %vm979_vm5, %v904_v31  ;;  %v906_v25 = vpop.permute.xlu1 %905  ;;  %v7502_v31 = vld [vmem:[#allocation33_spill] sm:$0xff] }
 0x121   : > { %991 = vst.msk [vmem:[#allocation2 + $0x58] sm:$0xff] %vm979_vm5, %v906_v25  ;;  %1160 = vrot.lane.b32.xlu0 %v4909_v1, %s4363_s7 }
 0x122   : > { %1162 = vrot.lane.b32.xlu1 %v7500_v7, %s4363_s7 }
 0x123   : > { %v908_v4 = vpop.permute.xlu0 %907 }
 0x124   : > { %992 = vst.msk [vmem:[#allocation2 + $0x60] sm:$0xff] %vm979_vm5, %v908_v4  ;;  %v910_v8 = vpop.permute.xlu1 %909 }
 0x125   : > { %993 = vst.msk [vmem:[#allocation2 + $0x68] sm:$0xff] %vm979_vm5, %v910_v8  ;;  %1164 = vrot.lane.b32.xlu0 %v4923_v10, %s4363_s7  ;;  %v7503_v8 = vld [vmem:[#allocation34_spill] sm:$0xff] }
 0x126   : > { %1166 = vrot.lane.b32.xlu1 %v7501_v3, %s4363_s7 }
 0x127   : > { %v912_v53 = vpop.permute.xlu0 %911 }
 0x128   : > { %994 = vst.msk [vmem:[#allocation2 + $0x70] sm:$0xff] %vm979_vm5, %v912_v53  ;;  %v914_v5 = vpop.permute.xlu1 %913 }
 0x129   : > { %995 = vst.msk [vmem:[#allocation2 + $0x78] sm:$0xff] %vm979_vm5, %v914_v5  ;;  %1168 = vrot.lane.b32.xlu0 %v4937_v17, %s4363_s7 }
 0x12a   : > { %1170 = vrot.lane.b32.xlu1 %v7502_v31, %s4363_s7 }
 0x12b   : > { %v916_v25 = vpop.permute.xlu0 %915 }
 0x12c   : > { %996 = vst.msk [vmem:[#allocation2 + $0x80] sm:$0xff] %vm979_vm5, %v916_v25  ;;  %v918_v4 = vpop.permute.xlu1 %917  ;;  %v7504_v25 = vld [vmem:[#allocation35_spill] sm:$0xff] }
 0x12d   : > { %997 = vst.msk [vmem:[#allocation2 + $0x88] sm:$0xff] %vm979_vm5, %v918_v4  ;;  %1172 = vrot.lane.b32.xlu0 %v4951_v28, %s4363_s7 }
 0x12e   : > { %1174 = vrot.lane.b32.xlu1 %v7503_v8, %s4363_s7 }
 0x12f   : > { %v920_v53 = vpop.permute.xlu0 %919 }
 0x130   : > { %998 = vst.msk [vmem:[#allocation2 + $0x90] sm:$0xff] %vm979_vm5, %v920_v53  ;;  %v922_v5 = vpop.permute.xlu1 %921  ;;  %v7505_v53 = vld [vmem:[#allocation36_spill] sm:$0xff] }
 0x131   : > { %999 = vst.msk [vmem:[#allocation2 + $0x98] sm:$0xff] %vm979_vm5, %v922_v5  ;;  %1176 = vrot.lane.b32.xlu0 %v4965_v43, %s4363_s7 }
 0x132   : > { %1178 = vrot.lane.b32.xlu1 %v7504_v25, %s4363_s7 }
 0x133   : > { %v924_v51 = vpop.permute.xlu0 %923 }
 0x134   : > { %1000 = vst.msk [vmem:[#allocation2 + $0xa0] sm:$0xff] %vm979_vm5, %v924_v51  ;;  %v926_v4 = vpop.permute.xlu1 %925  ;;  %v7506_v51 = vld [vmem:[#allocation37_spill] sm:$0xff] }
 0x135   : > { %1001 = vst.msk [vmem:[#allocation2 + $0xa8] sm:$0xff] %vm979_vm5, %v926_v4  ;;  %1180 = vrot.lane.b32.xlu0 %v4979_v57, %s4363_s7 }
 0x136   : > { %1182 = vrot.lane.b32.xlu1 %v7505_v53, %s4363_s7 }
 0x137   : > { %v928_v29 = vpop.permute.xlu0 %927 }
 0x138   : > { %1002 = vst.msk [vmem:[#allocation2 + $0xb0] sm:$0xff] %vm979_vm5, %v928_v29  ;;  %v930_v5 = vpop.permute.xlu1 %929  ;;  %v7507_v29 = vld [vmem:[#allocation38_spill] sm:$0xff] }
 0x139   : > { %1003 = vst.msk [vmem:[#allocation2 + $0xb8] sm:$0xff] %vm979_vm5, %v930_v5  ;;  %1184 = vrot.lane.b32.xlu0 %v4993_v18, %s4363_s7 }
 0x13a   : > { %1186 = vrot.lane.b32.xlu1 %v7506_v51, %s4363_s7 }
 0x13b   : > { %v932_v36 = vpop.permute.xlu0 %931 }
 0x13c   : > { %1004 = vst.msk [vmem:[#allocation2 + $0xc0] sm:$0xff] %vm979_vm5, %v932_v36  ;;  %v934_v4 = vpop.permute.xlu1 %933  ;;  %v7508_v36 = vld [vmem:[#allocation39_spill] sm:$0xff] }
 0x13d   : > { %1005 = vst.msk [vmem:[#allocation2 + $0xc8] sm:$0xff] %vm979_vm5, %v934_v4  ;;  %1188 = vrot.lane.b32.xlu0 %v5007_v39, %s4363_s7 }
 0x13e   : > { %1190 = vrot.lane.b32.xlu1 %v7507_v29, %s4363_s7 }
 0x13f   : > { %v936_v11 = vpop.permute.xlu0 %935 }
 0x140   : > { %1006 = vst.msk [vmem:[#allocation2 + $0xd0] sm:$0xff] %vm979_vm5, %v936_v11  ;;  %v938_v5 = vpop.permute.xlu1 %937 }
 0x141   : > { %1007 = vst.msk [vmem:[#allocation2 + $0xd8] sm:$0xff] %vm979_vm5, %v938_v5  ;;  %1192 = vrot.lane.b32.xlu0 %v5021_v22, %s4363_s7 }
 0x142   : > { %1194 = vrot.lane.b32.xlu1 %v7508_v36, %s4363_s7  ;;  %v7509_v36 = vld [vmem:[#allocation42_spill] sm:$0xff] }
 0x143   : > { %v940_v51 = vpop.permute.xlu0 %939 }
 0x144   : > { %1008 = vst.msk [vmem:[#allocation2 + $0xe0] sm:$0xff] %vm979_vm5, %v940_v51  ;;  %v942_v4 = vpop.permute.xlu1 %941  ;;  %v7510_v51 = vld [vmem:[#allocation43_spill] sm:$0xff] }
 0x145   : > { %1009 = vst.msk [vmem:[#allocation2 + $0xe8] sm:$0xff] %vm979_vm5, %v942_v4  ;;  %1196 = vrot.lane.b32.xlu0 %v5035_v59, %s4363_s7 }
 0x146   : > { %1198 = vrot.lane.b32.xlu1 %v5040_v2, %s4363_s7  ;;  %v7511_v2 = vmax.f32 %v5268_v6, 0.0 }
 0x147   : > { %v944_v11 = vpop.permute.xlu0 %943 }
 0x148   : > { %1010 = vst.msk [vmem:[#allocation2 + $0xf0] sm:$0xff] %vm979_vm5, %v944_v11  ;;  %v946_v5 = vpop.permute.xlu1 %945  ;;  %v1147_v11 = vrot.slane %v5182_v63, 2 }
 0x149   : > { %1011 = vst.msk [vmem:[#allocation2 + $0xf8] sm:$0xff] %vm979_vm5, %v946_v5  ;;  %1200 = vrot.lane.b32.xlu0 %v7509_v36, %s4363_s7  ;;  %v1148_v5 = vrot.slane %v5186_v12, 2 }
 0x14a   : > { %1202 = vrot.lane.b32.xlu1 %v7510_v51, %s4363_s7  ;;  %v1150_v51 = vrot.slane %v7511_v2, 2 }
 0x14b   : > { %v1019_v4 = vpop.permute.xlu0 %1018 }
 0x14c   : > { %1115 = vst.msk [vmem:[#allocation2] sm:$0xff] %vm1114_vm6, %v1019_v4  ;;  %v1021_v59 = vpop.permute.xlu1 %1020 }
 0x14d   : > { %1116 = vst.msk [vmem:[#allocation2 + $0x8] sm:$0xff] %vm1114_vm6, %v1021_v59  ;;  %1204 = vrot.lane.b32.xlu0 %v5065_v33, %s4363_s7  ;;  %v5399_v59 = vsel %vm671_vm2, %v1147_v11, %v1148_v5  ;;  %v5402_v33 = vsel %vm671_vm2, %v1148_v5, %v1150_v51 }
 0x14e   : > { %1206 = vrot.lane.b32.xlu1 %v5070_v35, %s4363_s7 }
 0x14f   : > { %v1023_v36 = vpop.permute.xlu0 %1022 }
 0x150   : > { %1117 = vst.msk [vmem:[#allocation2 + $0x10] sm:$0xff] %vm1114_vm6, %v1023_v36  ;;  %v1025_v4 = vpop.permute.xlu1 %1024 }
 0x151   : > { %1118 = vst.msk [vmem:[#allocation2 + $0x18] sm:$0xff] %vm1114_vm6, %v1025_v4  ;;  %1208 = vrot.lane.b32.xlu0 %v5081_v9, %s4363_s7  ;;  %v324_v4 = vld [vmem:[%s4417_s26 + $0x1a0] sm:$0xff] }
 0x152   : > { %1210 = vrot.lane.b32.xlu1 %v5084_v55, %s4363_s7 }
 0x153   : > { %v1027_v35 = vpop.permute.xlu0 %1026 }
 0x154   : > { %1119 = vst.msk [vmem:[#allocation2 + $0x20] sm:$0xff] %vm1114_vm6, %v1027_v35  ;;  %v1029_v2 = vpop.permute.xlu1 %1028 }
 0x155   : > { %1120 = vst.msk [vmem:[#allocation2 + $0x28] sm:$0xff] %vm1114_vm6, %v1029_v2  ;;  %1212 = vrot.lane.b32.xlu0 %v5399_v59, %s4363_s7 }
 0x156   : > { %1214 = vrot.lane.b32.xlu1 %v5402_v33, %s4363_s7 }
 0x157   : > { %v1031_v6 = vpop.permute.xlu0 %1030 }
 0x158   : > { %1121 = vst.msk [vmem:[#allocation2 + $0x30] sm:$0xff] %vm1114_vm6, %v1031_v6  ;;  %v1033_v36 = vpop.permute.xlu1 %1032 }
 0x159   : > { %1122 = vst.msk [vmem:[#allocation2 + $0x38] sm:$0xff] %vm1114_vm6, %v1033_v36  ;;  %1283 = vrot.lane.b32.xlu0 %v4456_v20, %s4364_s8 }
 0x15a   : > { %1285 = vrot.lane.b32.xlu1 %v4458_v21, %s4364_s8 }
 0x15b   : > { %v1035_v35 = vpop.permute.xlu0 %1034 }
 0x15c   : > { %1123 = vst.msk [vmem:[#allocation2 + $0x40] sm:$0xff] %vm1114_vm6, %v1035_v35  ;;  %v1037_v51 = vpop.permute.xlu1 %1036 }
 0x15d   : > { %1124 = vst.msk [vmem:[#allocation2 + $0x48] sm:$0xff] %vm1114_vm6, %v1037_v51  ;;  %1287 = vrot.lane.b32.xlu0 %v4468_v27, %s4364_s8 }
 0x15e   : > { %1289 = vrot.lane.b32.xlu1 %v4492_v37, %s4364_s8 }
 0x15f   : > { %v1039_v11 = vpop.permute.xlu0 %1038 }
 0x160   : > { %1125 = vst.msk [vmem:[#allocation2 + $0x50] sm:$0xff] %vm1114_vm6, %v1039_v11  ;;  %v1041_v5 = vpop.permute.xlu1 %1040 }
 0x161   : > { %1126 = vst.msk [vmem:[#allocation2 + $0x58] sm:$0xff] %vm1114_vm6, %v1041_v5  ;;  %1291 = vrot.lane.b32.xlu0 %v4500_v41, %s4364_s8 }
 0x162   : > { %1293 = vrot.lane.b32.xlu1 %v4502_v42, %s4364_s8 }
 0x163   : > { %v1043_v20 = vpop.permute.xlu0 %1042 }
 0x164   : > { %1127 = vst.msk [vmem:[#allocation2 + $0x60] sm:$0xff] %vm1114_vm6, %v1043_v20  ;;  %v1045_v21 = vpop.permute.xlu1 %1044  ;;  %v7514_v20 = vld [vmem:[#allocation8_spill] sm:$0xff] }
 0x165   : > { %1128 = vst.msk [vmem:[#allocation2 + $0x68] sm:$0xff] %vm1114_vm6, %v1045_v21  ;;  %1295 = vrot.lane.b32.xlu0 %v4507_v44, %s4364_s8 }
 0x166   : > { %1297 = vrot.lane.b32.xlu1 %v4513_v46, %s4364_s8 }
 0x167   : > { %v1047_v27 = vpop.permute.xlu0 %1046 }
 0x168   : > { %1129 = vst.msk [vmem:[#allocation2 + $0x70] sm:$0xff] %vm1114_vm6, %v1047_v27  ;;  %v1049_v37 = vpop.permute.xlu1 %1048  ;;  %v7515_v27 = vld [vmem:[#allocation9_spill] sm:$0xff] }
 0x169   : > { %1130 = vst.msk [vmem:[#allocation2 + $0x78] sm:$0xff] %vm1114_vm6, %v1049_v37  ;;  %1299 = vrot.lane.b32.xlu0 %v4537_v56, %s4364_s8 }
 0x16a   : > { %1301 = vrot.lane.b32.xlu1 %v4544_v58, %s4364_s8 }
 0x16b   : > { %v1051_v41 = vpop.permute.xlu0 %1050 }
 0x16c   : > { %1131 = vst.msk [vmem:[#allocation2 + $0x80] sm:$0xff] %vm1114_vm6, %v1051_v41  ;;  %v1053_v42 = vpop.permute.xlu1 %1052 }
 0x16d   : > { %1132 = vst.msk [vmem:[#allocation2 + $0x88] sm:$0xff] %vm1114_vm6, %v1053_v42  ;;  %1303 = vrot.lane.b32.xlu0 %v4550_v61, %s4364_s8  ;;  %v1715_v42 = vld [vmem:[%s7245_s2 + $0x10] sm:$0xff] }
 0x16e   : > { %1305 = vrot.lane.b32.xlu1 %v4552_v62, %s4364_s8 }
 0x16f   : > { %v1055_v44 = vpop.permute.xlu0 %1054 }
 0x170   : > { %1133 = vst.msk [vmem:[#allocation2 + $0x90] sm:$0xff] %vm1114_vm6, %v1055_v44  ;;  %v1057_v46 = vpop.permute.xlu1 %1056  ;;  %v1716_v44 = vld [vmem:[%s7245_s2 + $0x18] sm:$0xff] }
 0x171   : > { %1134 = vst.msk [vmem:[#allocation2 + $0x98] sm:$0xff] %vm1114_vm6, %v1057_v46  ;;  %1307 = vrot.lane.b32.xlu0 %v4572_v13, %s4364_s8  ;;  %v7516_v46 = vld [vmem:[#allocation10_spill] sm:$0xff] }
 0x172   : > { %1309 = vrot.lane.b32.xlu1 %v4574_v14, %s4364_s8 }
 0x173   : > { %v1059_v56 = vpop.permute.xlu0 %1058 }
 0x174   : > { %1135 = vst.msk [vmem:[#allocation2 + $0xa0] sm:$0xff] %vm1114_vm6, %v1059_v56  ;;  %v1061_v58 = vpop.permute.xlu1 %1060  ;;  %v4305_v56 = vpack.c.bf16 %v1716_v44, %v1715_v42  ;;  %v7531_v42 = vld [vmem:[#allocation23_spill] sm:$0xff] }
 0x175   : > { %1136 = vst.msk [vmem:[#allocation2 + $0xa8] sm:$0xff] %vm1114_vm6, %v1061_v58  ;;  %1311 = vrot.lane.b32.xlu0 %v4589_v24, %s4364_s8  ;;  %v7517_v58 = vld [vmem:[#allocation11_spill] sm:$0xff] }
 0x176   : > { %1313 = vrot.lane.b32.xlu1 %v4604_v32, %s4364_s8 }
 0x177   : > { %v1063_v61 = vpop.permute.xlu0 %1062 }
 0x178   : > { %1137 = vst.msk [vmem:[#allocation2 + $0xb0] sm:$0xff] %vm1114_vm6, %v1063_v61  ;;  %v1065_v62 = vpop.permute.xlu1 %1064 }
 0x179   : > { %1138 = vst.msk [vmem:[#allocation2 + $0xb8] sm:$0xff] %vm1114_vm6, %v1065_v62  ;;  %1315 = vrot.lane.b32.xlu0 %v4614_v45, %s4364_s8 }
 0x17a   : > { %1317 = vrot.lane.b32.xlu1 %v4616_v47, %s4364_s8 }
 0x17b   : > { %v1067_v13 = vpop.permute.xlu0 %1066 }
 0x17c   : > { %1139 = vst.msk [vmem:[#allocation2 + $0xc0] sm:$0xff] %vm1114_vm6, %v1067_v13  ;;  %v1069_v14 = vpop.permute.xlu1 %1068  ;;  %v1717_v13 = vld [vmem:[%s7245_s2 + $0x20] sm:$0xff] }
 0x17d   : > { %1140 = vst.msk [vmem:[#allocation2 + $0xc8] sm:$0xff] %vm1114_vm6, %v1069_v14  ;;  %1319 = vrot.lane.b32.xlu0 %v4625_v50, %s4364_s8  ;;  %v1718_v14 = vld [vmem:[%s7245_s2 + $0x28] sm:$0xff] }
 0x17e   : > { %1321 = vrot.lane.b32.xlu1 %v4627_v52, %s4364_s8 }
 0x17f   : > { %v1071_v24 = vpop.permute.xlu0 %1070 }
 0x180   : > { %1141 = vst.msk [vmem:[#allocation2 + $0xd0] sm:$0xff] %vm1114_vm6, %v1071_v24  ;;  %v1073_v32 = vpop.permute.xlu1 %1072  ;;  %v7518_v24 = vld [vmem:[#allocation12_spill] sm:$0xff] }
 0x181   : > { %1142 = vst.msk [vmem:[#allocation2 + $0xd8] sm:$0xff] %vm1114_vm6, %v1073_v32  ;;  %1323 = vrot.lane.b32.xlu0 %v4649_v19, %s4364_s8  ;;  %v4309_v32 = vpack.c.bf16 %v1718_v14, %v1717_v13  ;;  %v7535_v13 = vld [vmem:[#allocation25_spill] sm:$0xff] }
 0x182   : > { %1325 = vrot.lane.b32.xlu1 %v4658_v23, %s4364_s8 }
 0x183   : > { %v1075_v45 = vpop.permute.xlu0 %1074 }
 0x184   : > { %1143 = vst.msk [vmem:[#allocation2 + $0xe0] sm:$0xff] %vm1114_vm6, %v1075_v45  ;;  %v1077_v47 = vpop.permute.xlu1 %1076  ;;  %v7519_v45 = vld [vmem:[#allocation13_spill] sm:$0xff] }
 0x185   : > { %1144 = vst.msk [vmem:[#allocation2 + $0xe8] sm:$0xff] %vm1114_vm6, %v1077_v47  ;;  %1327 = vrot.lane.b32.xlu0 %v4666_v49, %s4364_s8 }
 0x186   : > { %1329 = vrot.lane.b32.xlu1 %v4668_v38, %s4364_s8  ;;  %v323_v38 = vld [vmem:[%s4417_s26 + $0x198] sm:$0xff] }
 0x187   : > { %v1079_v50 = vpop.permute.xlu0 %1078 }
 0x188   : > { %1145 = vst.msk [vmem:[#allocation2 + $0xf0] sm:$0xff] %vm1114_vm6, %v1079_v50  ;;  %v1081_v52 = vpop.permute.xlu1 %1080 }
 0x189   : > { %1146 = vst.msk [vmem:[#allocation2 + $0xf8] sm:$0xff] %vm1114_vm6, %v1081_v52  ;;  %1331 = vrot.lane.b32.xlu0 %v4686_v40, %s4364_s8  ;;  %v1719_v52 = vld [vmem:[%s7245_s2 + $0x30] sm:$0xff] }
 0x18a   : > { %1333 = vrot.lane.b32.xlu1 %v4688_v26, %s4364_s8  ;;  %v5500_v26 = vmax.f32 %v323_v38, 0.0 }
 0x18b   : > { %v1153_v19 = vpop.permute.xlu0 %1152 }
 0x18c   : > { %1249 = vst.msk [vmem:[#allocation2] sm:$0xff] %vm1248_vm7, %v1153_v19  ;;  %v1155_v23 = vpop.permute.xlu1 %1154  ;;  %v1720_v19 = vld [vmem:[%s7245_s2 + $0x38] sm:$0xff] }
 0x18d   : > { %1250 = vst.msk [vmem:[#allocation2 + $0x8] sm:$0xff] %vm1248_vm7, %v1155_v23  ;;  %1335 = vrot.lane.b32.xlu0 %v4703_v15, %s4364_s8  ;;  %v5504_v15 = vmax.f32 %v324_v4, 0.0  ;;  %v7520_v23 = vld [vmem:[#allocation14_spill] sm:$0xff]  ;;  %v4313_v38 = vpack.c.bf16 %v1720_v19, %v1719_v52  ;;  %v7539_v19 = vld [vmem:[#allocation27_spill] sm:$0xff] }
 0x18e   : > { %1337 = vrot.lane.b32.xlu1 %v4716_v0, %s4364_s8  ;;  %v7538_v52 = vld [vmem:[#allocation26_spill] sm:$0xff] }
 0x18f   : > { %v1157_v49 = vpop.permute.xlu0 %1156 }
 0x190   : > { %1251 = vst.msk [vmem:[#allocation2 + $0x10] sm:$0xff] %vm1248_vm7, %v1157_v49  ;;  %v1159_v40 = vpop.permute.xlu1 %1158  ;;  %v7521_v49 = vld [vmem:[#allocation15_spill] sm:$0xff] }
 0x191   : > { %1252 = vst.msk [vmem:[#allocation2 + $0x18] sm:$0xff] %vm1248_vm7, %v1159_v40  ;;  %1339 = vrot.lane.b32.xlu0 %v5182_v63, %s4364_s8 }
 0x192   : > { %1341 = vrot.lane.b32.xlu1 %v5186_v12, %s4364_s8 }
 0x193   : > { %v1161_v2 = vpop.permute.xlu0 %1160 }
 0x194   : > { %1253 = vst.msk [vmem:[#allocation2 + $0x20] sm:$0xff] %vm1248_vm7, %v1161_v2  ;;  %v1163_v0 = vpop.permute.xlu1 %1162  ;;  %v7522_v2 = vld [vmem:[#allocation16_spill] sm:$0xff] }
 0x195   : > { %1254 = vst.msk [vmem:[#allocation2 + $0x28] sm:$0xff] %vm1248_vm7, %v1163_v0  ;;  %1343 = vrot.lane.b32.xlu0 %v5500_v26, %s4364_s8  ;;  %v1721_v0 = vld [vmem:[%s7245_s2 + $0x40] sm:$0xff] }
 0x196   : > { %1345 = vrot.lane.b32.xlu1 %v5504_v15, %s4364_s8 }
 0x197   : > { %v1165_v63 = vpop.permute.xlu0 %1164 }
 0x198   : > { %1255 = vst.msk [vmem:[#allocation2 + $0x30] sm:$0xff] %vm1248_vm7, %v1165_v63  ;;  %v1167_v6 = vpop.permute.xlu1 %1166  ;;  %v7523_v63 = vld [vmem:[#allocation17_spill] sm:$0xff] }
 0x199   : > { %1256 = vst.msk [vmem:[#allocation2 + $0x38] sm:$0xff] %vm1248_vm7, %v1167_v6  ;;  %1418 = vrot.lane.b32.xlu0 %v4523_v48, %s4365_s9  ;;  %v7512_v48 = vld [vmem:[#allocation6_spill] sm:$0xff] }
 0x19a   : > { %1420 = vrot.lane.b32.xlu1 %v4533_v54, %s4365_s9  ;;  %v7513_v54 = vld [vmem:[#allocation7_spill] sm:$0xff] }
 0x19b   : > { %v1169_v12 = vpop.permute.xlu0 %1168 }
 0x19c   : > { %1257 = vst.msk [vmem:[#allocation2 + $0x40] sm:$0xff] %vm1248_vm7, %v1169_v12  ;;  %v1171_v36 = vpop.permute.xlu1 %1170 }
 0x19d   : > { %1258 = vst.msk [vmem:[#allocation2 + $0x48] sm:$0xff] %vm1248_vm7, %v1171_v36  ;;  %1422 = vrot.lane.b32.xlu0 %v7474_v30, %s4365_s9  ;;  %v1713_v30 = vld [vmem:[%s7245_s2] sm:$0xff] }
 0x19e   : > { %1424 = vrot.lane.b32.xlu1 %v7475_v34, %s4365_s9  ;;  %v1714_v34 = vld [vmem:[%s7245_s2 + $0x8] sm:$0xff]  ;;  %v7524_v36 = vld [vmem:[#allocation18_spill] sm:$0xff] }
 0x19f   : > { %v1173_v35 = vpop.permute.xlu0 %1172  ;;  %v4301_v21 = vpack.c.bf16 %v1714_v34, %v1713_v30 }
 0x1a0   : > { %1259 = vst.msk [vmem:[#allocation2 + $0x50] sm:$0xff] %vm1248_vm7, %v1173_v35  ;;  %v1175_v51 = vpop.permute.xlu1 %1174  ;;  %v7525_v35 = vld [vmem:[#allocation19_spill] sm:$0xff] }
 0x1a1   : > { %1260 = vst.msk [vmem:[#allocation2 + $0x58] sm:$0xff] %vm1248_vm7, %v1175_v51  ;;  %1426 = vrot.lane.b32.xlu0 %v7512_v48, %s4365_s9  ;;  %4302 = vmatprep.subr.bf16.mxu0 %v4301_v21 }
 0x1a2   : > { %1428 = vrot.lane.b32.xlu1 %v7513_v54, %s4365_s9  ;;  %4304 = vmatpush3.bf16.msra.mxu0 %v4301_v21 }
 0x1a3   : > { %v1177_v11 = vpop.permute.xlu0 %1176  ;;  %4306 = vmatprep.subr.bf16.mxu0 %v4305_v56 }
 0x1a4   : > { %1261 = vst.msk [vmem:[#allocation2 + $0x60] sm:$0xff] %vm1248_vm7, %v1177_v11  ;;  %v1179_v5 = vpop.permute.xlu1 %1178 }
 0x1a5   : > { %1262 = vst.msk [vmem:[#allocation2 + $0x68] sm:$0xff] %vm1248_vm7, %v1179_v5  ;;  %1430 = vrot.lane.b32.xlu0 %v7514_v20, %s4365_s9  ;;  %v7528_v20 = vld [vmem:[#allocation21_spill] sm:$0xff] }
 0x1a6   : > { %1432 = vrot.lane.b32.xlu1 %v7515_v27, %s4365_s9  ;;  %4308 = vmatpush3.bf16.msra.mxu0 %v4305_v56  ;;  %v7533_v56 = vld [vmem:[#allocation41_spill] sm:$0xff] }
 0x1a7   : > { %v1181_v37 = vpop.permute.xlu0 %1180  ;;  %4310 = vmatprep.subr.bf16.mxu0 %v4309_v32 }
 0x1a8   : > { %1263 = vst.msk [vmem:[#allocation2 + $0x70] sm:$0xff] %vm1248_vm7, %v1181_v37  ;;  %v1183_v41 = vpop.permute.xlu1 %1182 }
 0x1a9   : > { %1264 = vst.msk [vmem:[#allocation2 + $0x78] sm:$0xff] %vm1248_vm7, %v1183_v41  ;;  %1434 = vrot.lane.b32.xlu0 %v7516_v46, %s4365_s9  ;;  %v7530_v41 = vld [vmem:[#allocation22_spill] sm:$0xff] }
 0x1aa   : > { %1436 = vrot.lane.b32.xlu1 %v7517_v58, %s4365_s9  ;;  %4312 = vmatpush3.bf16.msra.mxu0 %v4309_v32  ;;  %v7536_v32 = vld [vmem:[#allocation42_spill] sm:$0xff] }
 0x1ab   : > { %v1185_v61 = vpop.permute.xlu0 %1184  ;;  %4314 = vmatprep.subr.bf16.mxu0 %v4313_v38 }
 0x1ac   : > { %1265 = vst.msk [vmem:[#allocation2 + $0x80] sm:$0xff] %vm1248_vm7, %v1185_v61  ;;  %v1187_v62 = vpop.permute.xlu1 %1186 }
 0x1ad   : > { %1266 = vst.msk [vmem:[#allocation2 + $0x88] sm:$0xff] %vm1248_vm7, %v1187_v62  ;;  %1438 = vrot.lane.b32.xlu0 %v7518_v24, %s4365_s9  ;;  %v7534_v62 = vld [vmem:[#allocation24_spill] sm:$0xff] }
 0x1ae   : > { %1440 = vrot.lane.b32.xlu1 %v7519_v45, %s4365_s9  ;;  %4316 = vmatpush3.bf16.msra.mxu0 %v4313_v38  ;;  %v7537_v45 = vld [vmem:[#allocation43_spill] sm:$0xff] }
 0x1af   : > { %v1189_v47 = vpop.permute.xlu0 %1188  ;;  %4185 = vmatprep.subr.mxu0 %v1721_v0 }
 0x1b0   : > { %1267 = vst.msk [vmem:[#allocation2 + $0x90] sm:$0xff] %vm1248_vm7, %v1189_v47  ;;  %v1191_v50 = vpop.permute.xlu1 %1190 }
 0x1b1   : > { %1268 = vst.msk [vmem:[#allocation2 + $0x98] sm:$0xff] %vm1248_vm7, %v1191_v50  ;;  %1442 = vrot.lane.b32.xlu0 %v7520_v23, %s4365_s9 }
 0x1b2   : > { %1444 = vrot.lane.b32.xlu1 %v7521_v49, %s4365_s9  ;;  %4186 = vmatpush3.msra.mxu0 %v1721_v0  ;;  %v7540_v49 = vld [vmem:[#allocation44_spill] sm:$0xff] }
 0x1b3   : > { %v1193_v4 = vpop.permute.xlu0 %1192  ;;  %v7542_v0 = vld [vmem:[#allocation28_spill] sm:$0xff] }
 0x1b4   : > { %1269 = vst.msk [vmem:[#allocation2 + $0xa0] sm:$0xff] %vm1248_vm7, %v1193_v4  ;;  %v1195_v40 = vpop.permute.xlu1 %1194  ;;  %v7541_v4 = vld [vmem:[#allocation45_spill] sm:$0xff] }
 0x1b5   : > { %1270 = vst.msk [vmem:[#allocation2 + $0xa8] sm:$0xff] %vm1248_vm7, %v1195_v40  ;;  %1446 = vrot.lane.b32.xlu0 %v7522_v2, %s4365_s9 }
 0x1b6   : > { %1448 = vrot.lane.b32.xlu1 %v7523_v63, %s4365_s9  ;;  %v7543_v63 = vld [vmem:[#allocation29_spill] sm:$0xff] }
 0x1b7   : > { %v1197_v6 = vpop.permute.xlu0 %1196 }
 0x1b8   : > { %1271 = vst.msk [vmem:[#allocation2 + $0xb0] sm:$0xff] %vm1248_vm7, %v1197_v6  ;;  %v1199_v12 = vpop.permute.xlu1 %1198 }
 0x1b9   : > { %1272 = vst.msk [vmem:[#allocation2 + $0xb8] sm:$0xff] %vm1248_vm7, %v1199_v12  ;;  %1450 = vrot.lane.b32.xlu0 %v7524_v36, %s4365_s9  ;;  %v325_v36 = vld [vmem:[%s4417_s26 + $0x1a8] sm:$0x3] }
 0x1ba   : > { %1452 = vrot.lane.b32.xlu1 %v7525_v35, %s4365_s9 }
 0x1bb   : > { %v1201_v51 = vpop.permute.xlu0 %1200 }
 0x1bc   : > { %1273 = vst.msk [vmem:[#allocation2 + $0xc0] sm:$0xff] %vm1248_vm7, %v1201_v51  ;;  %v1203_v48 = vpop.permute.xlu1 %1202  ;;  %v379_v51 = vmax.f32 %v325_v36, 0.0 }
 0x1bd   : > { %1274 = vst.msk [vmem:[#allocation2 + $0xc8] sm:$0xff] %vm1248_vm7, %v1203_v48  ;;  %1552 = vrot.lane.b32.xlu0 %v4895_v16, %s4366_s14 }
 0x1be   : > { %1554 = vrot.lane.b32.xlu1 %v7499_v60, %s4366_s14 }
 0x1bf   : > { %v1205_v54 = vpop.permute.xlu0 %1204 }
 0x1c0   : > { %1275 = vst.msk [vmem:[#allocation2 + $0xd0] sm:$0xff] %vm1248_vm7, %v1205_v54  ;;  %v1207_v11 = vpop.permute.xlu1 %1206  ;;  %v7544_v54 = vld [vmem:[#allocation4_spill] sm:$0xff] }
 0x1c1   : > { %1276 = vst.msk [vmem:[#allocation2 + $0xd8] sm:$0xff] %vm1248_vm7, %v1207_v11  ;;  %1556 = vrot.lane.b32.xlu0 %v4909_v1, %s4366_s14  ;;  %v7545_v11 = vld [vmem:[#allocation5_spill] sm:$0xff] }
 0x1c2   : > { %1558 = vrot.lane.b32.xlu1 %v7500_v7, %s4366_s14 }
 0x1c3   : > { %v1209_v5 = vpop.permute.xlu0 %1208 }
 0x1c4   : > { %1277 = vst.msk [vmem:[#allocation2 + $0xe0] sm:$0xff] %vm1248_vm7, %v1209_v5  ;;  %v1211_v30 = vpop.permute.xlu1 %1210  ;;  %v1414_v5 = vrot.slane %v5504_v15, 1 }
 0x1c5   : > { %1278 = vst.msk [vmem:[#allocation2 + $0xe8] sm:$0xff] %vm1248_vm7, %v1211_v30  ;;  %1560 = vrot.lane.b32.xlu0 %v4923_v10, %s4366_s14  ;;  %v1416_v30 = vrot.slane %v379_v51, 1 }
 0x1c6   : > { %1562 = vrot.lane.b32.xlu1 %v7501_v3, %s4366_s14 }
 0x1c7   : > { %v1213_v16 = vpop.permute.xlu0 %1212 }
 0x1c8   : > { %1279 = vst.msk [vmem:[#allocation2 + $0xf0] sm:$0xff] %vm1248_vm7, %v1213_v16  ;;  %v1215_v60 = vpop.permute.xlu1 %1214 }
 0x1c9   : > { %1280 = vst.msk [vmem:[#allocation2 + $0xf8] sm:$0xff] %vm1248_vm7, %v1215_v60  ;;  %1564 = vrot.lane.b32.xlu0 %v4937_v17, %s4366_s14 }
 0x1ca   : > { %1566 = vrot.lane.b32.xlu1 %v7502_v31, %s4366_s14 }
 0x1cb   : > { %v1284_v1 = vpop.permute.xlu0 %1283 }
 0x1cc   : > { %1380 = vst.msk [vmem:[#allocation2] sm:$0xff] %vm1379_vm8, %v1284_v1  ;;  %v1286_v10 = vpop.permute.xlu1 %1285  ;;  %v1547_v1 = vrot.slane %v5500_v26, 2 }
 0x1cd   : > { %1381 = vst.msk [vmem:[#allocation2 + $0x8] sm:$0xff] %vm1379_vm8, %v1286_v10  ;;  %1568 = vrot.lane.b32.xlu0 %v4951_v28, %s4366_s14  ;;  %v1548_v10 = vrot.slane %v5504_v15, 2 }
 0x1ce   : > { %1570 = vrot.lane.b32.xlu1 %v7503_v8, %s4366_s14 }
 0x1cf   : > { %v1288_v7 = vpop.permute.xlu0 %1287 }
 0x1d0   : > { %1382 = vst.msk [vmem:[#allocation2 + $0x10] sm:$0xff] %vm1379_vm8, %v1288_v7  ;;  %v1290_v17 = vpop.permute.xlu1 %1289 }
 0x1d1   : > { %1383 = vst.msk [vmem:[#allocation2 + $0x18] sm:$0xff] %vm1379_vm8, %v1290_v17  ;;  %1572 = vrot.lane.b32.xlu0 %v4965_v43, %s4366_s14  ;;  %v7526_v43 = vld [vmem:[#allocation37_spill] sm:$0xff]  ;;  %v1417_v17 = vsel %vm461_vm0, %v1414_v5, %v1416_v30 }
 0x1d2   : > { %1574 = vrot.lane.b32.xlu1 %v7504_v25, %s4366_s14 }
 0x1d3   : > { %v1292_v3 = vpop.permute.xlu0 %1291 }
 0x1d4   : > { %1384 = vst.msk [vmem:[#allocation2 + $0x20] sm:$0xff] %vm1379_vm8, %v1292_v3  ;;  %v1294_v31 = vpop.permute.xlu1 %1293  ;;  %v1550_v3 = vrot.slane %v379_v51, 2 }
 0x1d5   : > { %1385 = vst.msk [vmem:[#allocation2 + $0x28] sm:$0xff] %vm1379_vm8, %v1294_v31  ;;  %1576 = vrot.lane.b32.xlu0 %v4979_v57, %s4366_s14 }
 0x1d6   : > { %1578 = vrot.lane.b32.xlu1 %v7505_v53, %s4366_s14 }
 0x1d7   : > { %v1296_v28 = vpop.permute.xlu0 %1295 }
 0x1d8   : > { %1386 = vst.msk [vmem:[#allocation2 + $0x30] sm:$0xff] %vm1379_vm8, %v1296_v28  ;;  %v1298_v8 = vpop.permute.xlu1 %1297 }
 0x1d9   : > { %1387 = vst.msk [vmem:[#allocation2 + $0x38] sm:$0xff] %vm1379_vm8, %v1298_v8  ;;  %1580 = vrot.lane.b32.xlu0 %v4993_v18, %s4366_s14  ;;  %v7527_v18 = vld [vmem:[#allocation20_spill] sm:$0xff] }
 0x1da   : > { %1582 = vrot.lane.b32.xlu1 %v7526_v43, %s4366_s14 }
 0x1db   : > { %v1300_v25 = vpop.permute.xlu0 %1299 }
 0x1dc   : > { %1388 = vst.msk [vmem:[#allocation2 + $0x40] sm:$0xff] %vm1379_vm8, %v1300_v25  ;;  %v1302_v34 = vpop.permute.xlu1 %1301 }
 0x1dd   : > { %1389 = vst.msk [vmem:[#allocation2 + $0x48] sm:$0xff] %vm1379_vm8, %v1302_v34  ;;  %1584 = vrot.lane.b32.xlu0 %v5007_v39, %s4366_s14  ;;  %v7529_v39 = vld [vmem:[#allocation39_spill] sm:$0xff] }
 0x1de   : > { %1586 = vrot.lane.b32.xlu1 %v7507_v29, %s4366_s14 }
 0x1df   : > { %v1304_v57 = vpop.permute.xlu0 %1303 }
 0x1e0   : > { %1390 = vst.msk [vmem:[#allocation2 + $0x50] sm:$0xff] %vm1379_vm8, %v1304_v57  ;;  %v1306_v53 = vpop.permute.xlu1 %1305 }
 0x1e1   : > { %1391 = vst.msk [vmem:[#allocation2 + $0x58] sm:$0xff] %vm1379_vm8, %v1306_v53  ;;  %1454 = vrot.lane.b32.xlu0 %v7527_v18, %s4365_s9 }
 0x1e2   : > { %1456 = vrot.lane.b32.xlu1 %v7528_v20, %s4365_s9 }
 0x1e3   : > { %v1308_v21 = vpop.permute.xlu0 %1307 }
 0x1e4   : > { %1392 = vst.msk [vmem:[#allocation2 + $0x60] sm:$0xff] %vm1379_vm8, %v1308_v21  ;;  %v1310_v27 = vpop.permute.xlu1 %1309 }
 0x1e5   : > { %1393 = vst.msk [vmem:[#allocation2 + $0x68] sm:$0xff] %vm1379_vm8, %v1310_v27  ;;  %1588 = vrot.lane.b32.xlu0 %v5021_v22, %s4366_s14  ;;  %v7532_v22 = vld [vmem:[#allocation40_spill] sm:$0xff] }
 0x1e6   : > { %1590 = vrot.lane.b32.xlu1 %v7529_v39, %s4366_s14 }
 0x1e7   : > { %v1312_v29 = vpop.permute.xlu0 %1311 }
 0x1e8   : > { %1394 = vst.msk [vmem:[#allocation2 + $0x70] sm:$0xff] %vm1379_vm8, %v1312_v29  ;;  %v1314_v37 = vpop.permute.xlu1 %1313 }
 0x1e9   : > { %1395 = vst.msk [vmem:[#allocation2 + $0x78] sm:$0xff] %vm1379_vm8, %v1314_v37  ;;  %1458 = vrot.lane.b32.xlu0 %v7530_v41, %s4365_s9 }
 0x1ea   : > { %1460 = vrot.lane.b32.xlu1 %v7531_v42, %s4365_s9 }
 0x1eb   : > { %v1316_v44 = vpop.permute.xlu0 %1315 }
 0x1ec   : > { %1396 = vst.msk [vmem:[#allocation2 + $0x80] sm:$0xff] %vm1379_vm8, %v1316_v44  ;;  %v1318_v46 = vpop.permute.xlu1 %1317 }
 0x1ed   : > { %1397 = vst.msk [vmem:[#allocation2 + $0x88] sm:$0xff] %vm1379_vm8, %v1318_v46  ;;  %1592 = vrot.lane.b32.xlu0 %v7532_v22, %s4366_s14 }
 0x1ee   : > { %1594 = vrot.lane.b32.xlu1 %v7533_v56, %s4366_s14 }
 0x1ef   : > { %v1320_v58 = vpop.permute.xlu0 %1319 }
 0x1f0   : > { %1398 = vst.msk [vmem:[#allocation2 + $0x90] sm:$0xff] %vm1379_vm8, %v1320_v58  ;;  %v1322_v61 = vpop.permute.xlu1 %1321 }
 0x1f1   : > { %1399 = vst.msk [vmem:[#allocation2 + $0x98] sm:$0xff] %vm1379_vm8, %v1322_v61  ;;  %1462 = vrot.lane.b32.xlu0 %v7534_v62, %s4365_s9 }
 0x1f2   : > { %1464 = vrot.lane.b32.xlu1 %v7535_v13, %s4365_s9 }
 0x1f3   : > { %v1324_v14 = vpop.permute.xlu0 %1323 }
 0x1f4   : > { %1400 = vst.msk [vmem:[#allocation2 + $0xa0] sm:$0xff] %vm1379_vm8, %v1324_v14  ;;  %v1326_v24 = vpop.permute.xlu1 %1325 }
 0x1f5   : > { %1401 = vst.msk [vmem:[#allocation2 + $0xa8] sm:$0xff] %vm1379_vm8, %v1326_v24  ;;  %1596 = vrot.lane.b32.xlu0 %v7536_v32, %s4366_s14 }
 0x1f6   : > { %1598 = vrot.lane.b32.xlu1 %v7537_v45, %s4366_s14 }
 0x1f7   : > { %v1328_v47 = vpop.permute.xlu0 %1327 }
 0x1f8   : > { %1402 = vst.msk [vmem:[#allocation2 + $0xb0] sm:$0xff] %vm1379_vm8, %v1328_v47  ;;  %v1330_v50 = vpop.permute.xlu1 %1329 }
 0x1f9   : > { %1403 = vst.msk [vmem:[#allocation2 + $0xb8] sm:$0xff] %vm1379_vm8, %v1330_v50  ;;  %1466 = vrot.lane.b32.xlu0 %v7538_v52, %s4365_s9 }
 0x1fa   : > { %1468 = vrot.lane.b32.xlu1 %v7539_v19, %s4365_s9 }
 0x1fb   : > { %v1332_v23 = vpop.permute.xlu0 %1331 }
 0x1fc   : > { %1404 = vst.msk [vmem:[#allocation2 + $0xc0] sm:$0xff] %vm1379_vm8, %v1332_v23  ;;  %v1334_v38 = vpop.permute.xlu1 %1333 }
 0x1fd   : > { %1405 = vst.msk [vmem:[#allocation2 + $0xc8] sm:$0xff] %vm1379_vm8, %v1334_v38  ;;  %1600 = vrot.lane.b32.xlu0 %v7540_v49, %s4366_s14 }
 0x1fe   : > { %1602 = vrot.lane.b32.xlu1 %v7541_v4, %s4366_s14 }
 0x1ff   : > { %v1336_v40 = vpop.permute.xlu0 %1335 }
 0x200   : > { %1406 = vst.msk [vmem:[#allocation2 + $0xd0] sm:$0xff] %vm1379_vm8, %v1336_v40  ;;  %v1338_v2 = vpop.permute.xlu1 %1337 }
 0x201   : > { %1407 = vst.msk [vmem:[#allocation2 + $0xd8] sm:$0xff] %vm1379_vm8, %v1338_v2  ;;  %1470 = vrot.lane.b32.xlu0 %v7542_v0, %s4365_s9 }
 0x202   : > { %1472 = vrot.lane.b32.xlu1 %v7543_v63, %s4365_s9 }
 0x203   : > { %v1340_v6 = vpop.permute.xlu0 %1339 }
 0x204   : > { %1408 = vst.msk [vmem:[#allocation2 + $0xe0] sm:$0xff] %vm1379_vm8, %v1340_v6  ;;  %v1342_v12 = vpop.permute.xlu1 %1341 }
 0x205   : > { %1409 = vst.msk [vmem:[#allocation2 + $0xe8] sm:$0xff] %vm1379_vm8, %v1342_v12  ;;  %1604 = vrot.lane.b32.xlu0 %v5081_v9, %s4366_s14  ;;  %v1413_v9 = vrot.slane %v5500_v26, 1  ;;  %v1551_v26 = vsel %vm671_vm2, %v1548_v10, %v1550_v3 }
 0x206   : > { %1606 = vrot.lane.b32.xlu1 %v5084_v55, %s4366_s14 }
 0x207   : > { %v1344_v35 = vpop.permute.xlu0 %1343  ;;  %v1415_v60 = vsel %vm461_vm0, %v1413_v9, %v1414_v5 }
 0x208   : > { %1410 = vst.msk [vmem:[#allocation2 + $0xf0] sm:$0xff] %vm1379_vm8, %v1344_v35  ;;  %v1346_v48 = vpop.permute.xlu1 %1345 }
 0x209   : > { %1411 = vst.msk [vmem:[#allocation2 + $0xf8] sm:$0xff] %vm1379_vm8, %v1346_v48  ;;  %1474 = vrot.lane.b32.xlu0 %v7544_v54, %s4365_s9 }
 0x20a   : > { %1476 = vrot.lane.b32.xlu1 %v7545_v11, %s4365_s9 }
 0x20b   : > { %v1419_v55 = vpop.permute.xlu0 %1418 }
 0x20c   : > { %1515 = vst.msk [vmem:[#allocation2] sm:$0xff] %vm1514_vm9, %v1419_v55  ;;  %v1421_v16 = vpop.permute.xlu1 %1420 }
 0x20d   : > { %1516 = vst.msk [vmem:[#allocation2 + $0x8] sm:$0xff] %vm1514_vm9, %v1421_v16  ;;  %1608 = vrot.lane.b32.xlu0 %v5399_v59, %s4366_s14 }
 0x20e   : > { %1610 = vrot.lane.b32.xlu1 %v5402_v33, %s4366_s14  ;;  %v1549_v33 = vsel %vm671_vm2, %v1547_v1, %v1548_v10 }
 0x20f   : > { %v1423_v7 = vpop.permute.xlu0 %1422 }
 0x210   : > { %1517 = vst.msk [vmem:[#allocation2 + $0x10] sm:$0xff] %vm1514_vm9, %v1423_v7  ;;  %v1425_v31 = vpop.permute.xlu1 %1424 }
 0x211   : > { %1518 = vst.msk [vmem:[#allocation2 + $0x18] sm:$0xff] %vm1514_vm9, %v1425_v31  ;;  %1478 = vrot.lane.b32.xlu0 %v1415_v60, %s4365_s9 }
 0x212   : > { %1480 = vrot.lane.b32.xlu1 %v1417_v17, %s4365_s9 }
 0x213   : > { %v1427_v59 = vpop.permute.xlu0 %1426 }
 0x214   : > { %1519 = vst.msk [vmem:[#allocation2 + $0x20] sm:$0xff] %vm1514_vm9, %v1427_v59  ;;  %v1429_v15 = vpop.permute.xlu1 %1428 }
 0x215   : > { %1520 = vst.msk [vmem:[#allocation2 + $0x28] sm:$0xff] %vm1514_vm9, %v1429_v15  ;;  %1612 = vrot.lane.b32.xlu0 %v1549_v33, %s4366_s14 }
 0x216   : > { %1614 = vrot.lane.b32.xlu1 %v1551_v26, %s4366_s14 }
 0x217   : > { %v1431_v28 = vpop.permute.xlu0 %1430 }
 0x218   : > { %1521 = vst.msk [vmem:[#allocation2 + $0x30] sm:$0xff] %vm1514_vm9, %v1431_v28  ;;  %v1433_v8 = vpop.permute.xlu1 %1432 }
 0x219   : > { %1522 = vst.msk [vmem:[#allocation2 + $0x38] sm:$0xff] %vm1514_vm9, %v1433_v8 }
 0x21b   : > { %v1435_v43 = vpop.permute.xlu0 %1434 }
 0x21c   : > { %1523 = vst.msk [vmem:[#allocation2 + $0x40] sm:$0xff] %vm1514_vm9, %v1435_v43  ;;  %v1437_v25 = vpop.permute.xlu1 %1436 }
 0x21d   : > { %1524 = vst.msk [vmem:[#allocation2 + $0x48] sm:$0xff] %vm1514_vm9, %v1437_v25 }
 0x21f   : > { %v1439_v34 = vpop.permute.xlu0 %1438 }
 0x220   : > { %1525 = vst.msk [vmem:[#allocation2 + $0x50] sm:$0xff] %vm1514_vm9, %v1439_v34  ;;  %v1441_v57 = vpop.permute.xlu1 %1440 }
 0x221   : > { %1526 = vst.msk [vmem:[#allocation2 + $0x58] sm:$0xff] %vm1514_vm9, %v1441_v57 }
 0x223   : > { %v1443_v53 = vpop.permute.xlu0 %1442 }
 0x224   : > { %1527 = vst.msk [vmem:[#allocation2 + $0x60] sm:$0xff] %vm1514_vm9, %v1443_v53  ;;  %v1445_v18 = vpop.permute.xlu1 %1444 }
 0x225   : > { %1528 = vst.msk [vmem:[#allocation2 + $0x68] sm:$0xff] %vm1514_vm9, %v1445_v18 }
 0x227   : > { %v1447_v20 = vpop.permute.xlu0 %1446 }
 0x228   : > { %1529 = vst.msk [vmem:[#allocation2 + $0x70] sm:$0xff] %vm1514_vm9, %v1447_v20  ;;  %v1449_v21 = vpop.permute.xlu1 %1448 }
 0x229   : > { %1530 = vst.msk [vmem:[#allocation2 + $0x78] sm:$0xff] %vm1514_vm9, %v1449_v21 }
 0x22b   : > { %v1451_v27 = vpop.permute.xlu0 %1450 }
 0x22c   : > { %1531 = vst.msk [vmem:[#allocation2 + $0x80] sm:$0xff] %vm1514_vm9, %v1451_v27  ;;  %v1453_v39 = vpop.permute.xlu1 %1452 }
 0x22d   : > { %1532 = vst.msk [vmem:[#allocation2 + $0x88] sm:$0xff] %vm1514_vm9, %v1453_v39 }
 0x22f   : > { %v1553_v29 = vpop.permute.xlu0 %1552 }
 0x230   : > { %1649 = vst.msk [vmem:[#allocation2] sm:$0xff] %vm1648_vm10, %v1553_v29  ;;  %v1555_v37 = vpop.permute.xlu1 %1554 }
 0x231   : > { %1650 = vst.msk [vmem:[#allocation2 + $0x8] sm:$0xff] %vm1648_vm10, %v1555_v37 }
 0x233   : > { %v1557_v41 = vpop.permute.xlu0 %1556 }
 0x234   : > { %1651 = vst.msk [vmem:[#allocation2 + $0x10] sm:$0xff] %vm1648_vm10, %v1557_v41  ;;  %v1559_v42 = vpop.permute.xlu1 %1558 }
 0x235   : > { %1652 = vst.msk [vmem:[#allocation2 + $0x18] sm:$0xff] %vm1648_vm10, %v1559_v42 }
 0x237   : > { %v1561_v44 = vpop.permute.xlu0 %1560  ;;  %v1681_v46 = vld [vmem:[#allocation2] sm:$0xff] }
 0x238   : > { %1653 = vst.msk [vmem:[#allocation2 + $0x20] sm:$0xff] %vm1648_vm10, %v1561_v44  ;;  %v1563_v22 = vpop.permute.xlu1 %1562  ;;  %4187 = vmatprep.mubr.msk.f32.mxu0 %vm1729_vm11, %v1681_v46  ;;  %v1682_v56 = vld [vmem:[#allocation2 + $0x8] sm:$0xff] }
 0x239   : > { %1654 = vst.msk [vmem:[#allocation2 + $0x28] sm:$0xff] %vm1648_vm10, %v1563_v22  ;;  %4188 = vmatmul.mubr.msk.f32.vlgmr.msra.gmra.mrb[0].mxu0 %vm1729_vm11, %v1682_v56 }
 0x23b   : > { %v1565_v58 = vpop.permute.xlu0 %1564  ;;  %v1683_v61 = vld [vmem:[#allocation2 + $0x10] sm:$0xff] }
 0x23c   : > { %1655 = vst.msk [vmem:[#allocation2 + $0x30] sm:$0xff] %vm1648_vm10, %v1565_v58  ;;  %v1567_v62 = vpop.permute.xlu1 %1566  ;;  %4190 = vmatprep.mubr.msk.f32.mxu0 %vm1729_vm11, %v1683_v61  ;;  %v1684_v13 = vld [vmem:[#allocation2 + $0x18] sm:$0xff] }
 0x23d   : > { %1656 = vst.msk [vmem:[#allocation2 + $0x38] sm:$0xff] %vm1648_vm10, %v1567_v62  ;;  %4191 = vmatmul.mubr.msk.f32.gmra.mrb[2].mxu0 %vm1729_vm11, %v1684_v13 }
 0x23f   : > { %v1569_v14 = vpop.permute.xlu0 %1568  ;;  %v1685_v24 = vld [vmem:[#allocation2 + $0x20] sm:$0xff] }
 0x240   : > { %1657 = vst.msk [vmem:[#allocation2 + $0x40] sm:$0xff] %vm1648_vm10, %v1569_v14  ;;  %v1571_v32 = vpop.permute.xlu1 %1570  ;;  %4193 = vmatprep.mubr.msk.f32.mxu0 %vm1729_vm11, %v1685_v24  ;;  %v1686_v45 = vld [vmem:[#allocation2 + $0x28] sm:$0xff]  ;;  %v4367_v14 = vmov 0.0  }
 0x241   : > { %1658 = vst.msk [vmem:[#allocation2 + $0x48] sm:$0xff] %vm1648_vm10, %v1571_v32  ;;  %4194 = vmatmul.mubr.msk.f32.gmra.mrb[4].mxu0 %vm1729_vm11, %v1686_v45 }
 0x242   : > { %2084 = vst.msk [vmem:[#allocation3 + $0x8] sm:$0xff] %vm380_vm1, %v4367_v14  ;;  %2083 = vst.msk [vmem:[#allocation3] sm:$0xff] %vm380_vm1, %v4367_v14 }
 0x243   : > { %v1573_v47 = vpop.permute.xlu0 %1572  ;;  %v1687_v50 = vld [vmem:[#allocation2 + $0x30] sm:$0xff]  ;;  %2086 = vst.msk [vmem:[#allocation3 + $0x10] sm:$0x3] %vm2085_vm12, %v4367_v14  ;;  %2090 = vst.msk [vmem:[#allocation3 + $0x1a8] sm:$0x3] %vm2085_vm12, %v4367_v14 }
 0x244   : > { %1659 = vst.msk [vmem:[#allocation2 + $0x50] sm:$0xff] %vm1648_vm10, %v1573_v47  ;;  %v1575_v52 = vpop.permute.xlu1 %1574  ;;  %4196 = vmatprep.mubr.msk.f32.mxu0 %vm1729_vm11, %v1687_v50  ;;  %v1688_v19 = vld [vmem:[#allocation2 + $0x38] sm:$0xff] }
 0x245   : > { %1660 = vst.msk [vmem:[#allocation2 + $0x58] sm:$0xff] %vm1648_vm10, %v1575_v52  ;;  %4197 = vmatmul.mubr.msk.f32.gmra.mrb[6].mxu0 %vm1729_vm11, %v1688_v19 }
 0x246   : > { %2088 = vst.msk [vmem:[#allocation3 + $0x198] sm:$0xff] %vm380_vm1, %v4367_v14  ;;  %2089 = vst.msk [vmem:[#allocation3 + $0x1a0] sm:$0xff] %vm380_vm1, %v4367_v14 }
 0x247   : > { %v1577_v23 = vpop.permute.xlu0 %1576  ;;  %v1689_v38 = vld [vmem:[#allocation2 + $0x40] sm:$0xff]  ;;  %2109 = vst.msk [vmem:[#allocation3 + $0x29] sm:$0x1] %vm2092_vm13, %v4367_v14  ;;  %2093 = vst.msk [vmem:[#allocation3 + $0x18] sm:$0x1] %vm2092_vm13, %v4367_v14 }
 0x248   : > { %1661 = vst.msk [vmem:[#allocation2 + $0x60] sm:$0xff] %vm1648_vm10, %v1577_v23  ;;  %v1579_v49 = vpop.permute.xlu1 %1578  ;;  %4199 = vmatprep.mubr.msk.f32.mxu0 %vm1729_vm11, %v1689_v38  ;;  %v1690_v4 = vld [vmem:[#allocation2 + $0x48] sm:$0xff] }
 0x249   : > { %1662 = vst.msk [vmem:[#allocation2 + $0x68] sm:$0xff] %vm1648_vm10, %v1579_v49  ;;  %4200 = vmatmul.mubr.msk.f32.gmra.mrb[8].mxu0 %vm1729_vm11, %v1690_v4  ;;  %v5862_v45 = vld [vmem:[#allocation3 + $0x8] sm:$0xff]  ;;  %v5866_v50 = vld [vmem:[#allocation3] sm:$0xff] }
 0x24a   : > { %2094 = vst.msk [vmem:[#allocation3 + $0x30] sm:$0x1] %vm2092_vm13, %v4367_v14  ;;  %2095 = vst.msk [vmem:[#allocation3 + $0x48] sm:$0x1] %vm2092_vm13, %v4367_v14  ;;  %v5864_v47 = vld [vmem:[#allocation3 + $0x10] sm:$0x3] }
 0x24b   : > { %v1581_v40 = vpop.permute.xlu0 %1580  ;;  %v1691_v2 = vld [vmem:[#allocation2 + $0x50] sm:$0xff]  ;;  %2096 = vst.msk [vmem:[#allocation3 + $0x60] sm:$0x1] %vm2092_vm13, %v4367_v14  ;;  %2097 = vst.msk [vmem:[#allocation3 + $0x78] sm:$0x1] %vm2092_vm13, %v4367_v14  ;;  %v2292_v52 = vrot.slane %v5862_v45, 1 }
 0x24c   : > { %1663 = vst.msk [vmem:[#allocation2 + $0x70] sm:$0xff] %vm1648_vm10, %v1581_v40  ;;  %v1583_v0 = vpop.permute.xlu1 %1582  ;;  %4202 = vmatprep.mubr.msk.f32.mxu0 %vm1729_vm11, %v1691_v2  ;;  %v1692_v63 = vld [vmem:[#allocation2 + $0x58] sm:$0xff]  ;;  %v2294_v19 = vrot.slane %v5864_v47, 1  ;;  %v2291_v23 = vrot.slane %v5866_v50, 1  ;;  %v5882_v4 = vld [vmem:[%s7246_s3] ss:$0 sm:$0xff] }
 0x24d   : > { %1664 = vst.msk [vmem:[#allocation2 + $0x78] sm:$0xff] %vm1648_vm10, %v1583_v0  ;;  %4203 = vmatmul.mubr.msk.f32.gmra.mrb[10].mxu0 %vm1729_vm11, %v1692_v63 }
 0x24e   : > { %2098 = vst.msk [vmem:[#allocation3 + $0x90] sm:$0x1] %vm2092_vm13, %v4367_v14  ;;  %2099 = vst.msk [vmem:[#allocation3 + $0xa8] sm:$0x1] %vm2092_vm13, %v4367_v14  ;;  %v2295_v38 = vsel %vm461_vm0, %v2292_v52, %v2294_v19  ;;  %v2293_v49 = vsel %vm461_vm0, %v2291_v23, %v2292_v52 }
 0x24f   : > { %v1585_v6 = vpop.permute.xlu0 %1584  ;;  %v1693_v12 = vld [vmem:[#allocation2 + $0x60] sm:$0xff]  ;;  %2100 = vst.msk [vmem:[#allocation3 + $0xc0] sm:$0x1] %vm2092_vm13, %v4367_v14  ;;  %2101 = vst.msk [vmem:[#allocation3 + $0xd8] sm:$0x1] %vm2092_vm13, %v4367_v14  ;;  %2373 = vrot.lane.b32.xlu1 %v2295_v38, %s4359_s27  ;;  %2371 = vrot.lane.b32.xlu0 %v2293_v49, %s4359_s27 }
 0x250   : > { %1665 = vst.msk [vmem:[#allocation2 + $0x80] sm:$0xff] %vm1648_vm10, %v1585_v6  ;;  %v1587_v36 = vpop.permute.xlu1 %1586  ;;  %4205 = vmatprep.mubr.msk.f32.mxu0 %vm1729_vm11, %v1693_v12  ;;  %v1694_v35 = vld [vmem:[#allocation2 + $0x68] sm:$0xff] }
 0x251   : > { %1666 = vst.msk [vmem:[#allocation2 + $0x88] sm:$0xff] %vm1648_vm10, %v1587_v36  ;;  %4206 = vmatmul.mubr.msk.f32.gmra.mrb[12].mxu0 %vm1729_vm11, %v1694_v35 }
 0x252   : > { %2102 = vst.msk [vmem:[#allocation3 + $0xf0] sm:$0x1] %vm2092_vm13, %v4367_v14  ;;  %2103 = vst.msk [vmem:[#allocation3 + $0x108] sm:$0x1] %vm2092_vm13, %v4367_v14 }
 0x253   : > { %v1455_v51 = vpop.permute.xlu0 %1454  ;;  %v1695_v48 = vld [vmem:[#allocation2 + $0x70] sm:$0xff]  ;;  %2104 = vst.msk [vmem:[#allocation3 + $0x120] sm:$0x1] %vm2092_vm13, %v4367_v14  ;;  %2105 = vst.msk [vmem:[#allocation3 + $0x138] sm:$0x1] %vm2092_vm13, %v4367_v14 }
 0x254   : > { %1533 = vst.msk [vmem:[#allocation2 + $0x90] sm:$0xff] %vm1514_vm9, %v1455_v51  ;;  %v1457_v54 = vpop.permute.xlu1 %1456  ;;  %4208 = vmatprep.mubr.msk.f32.mxu0 %vm1729_vm11, %v1695_v48  ;;  %v1696_v11 = vld [vmem:[#allocation2 + $0x78] sm:$0xff] }
 0x255   : > { %1534 = vst.msk [vmem:[#allocation2 + $0x98] sm:$0xff] %vm1514_vm9, %v1457_v54  ;;  %4209 = vmatmul.mubr.msk.f32.gmra.mrb[14].mxu0 %vm1729_vm11, %v1696_v11 }
 0x256   : > { %2106 = vst.msk [vmem:[#allocation3 + $0x150] sm:$0x1] %vm2092_vm13, %v4367_v14  ;;  %2107 = vst.msk [vmem:[#allocation3 + $0x168] sm:$0x1] %vm2092_vm13, %v4367_v14 }
 0x257   : > { %v1589_v9 = vpop.permute.xlu0 %1588  ;;  %v1697_v5 = vld [vmem:[#allocation2 + $0x80] sm:$0xff]  ;;  %2108 = vst.msk [vmem:[#allocation3 + $0x180] sm:$0x1] %vm2092_vm13, %v4367_v14  ;;  %2110 = vst.msk [vmem:[#allocation3 + $0x41] sm:$0x1] %vm2092_vm13, %v4367_v14 }
 0x258   : > { %1667 = vst.msk [vmem:[#allocation2 + $0x90] sm:$0xff] %vm1648_vm10, %v1589_v9  ;;  %v1591_v55 = vpop.permute.xlu1 %1590  ;;  %4211 = vmatprep.mubr.msk.f32.mxu0 %vm1729_vm11, %v1697_v5  ;;  %v1698_v30 = vld [vmem:[#allocation2 + $0x88] sm:$0xff] }
 0x259   : > { %1668 = vst.msk [vmem:[#allocation2 + $0x98] sm:$0xff] %vm1648_vm10, %v1591_v55  ;;  %4212 = vmatmul.mubr.msk.f32.gmra.mrb[16].mxu0 %vm1729_vm11, %v1698_v30 }
 0x25a   : > { %2111 = vst.msk [vmem:[#allocation3 + $0x59] sm:$0x1] %vm2092_vm13, %v4367_v14  ;;  %2112 = vst.msk [vmem:[#allocation3 + $0x71] sm:$0x1] %vm2092_vm13, %v4367_v14 }
 0x25b   : > { %v1459_v16 = vpop.permute.xlu0 %1458  ;;  %2113 = vst.msk [vmem:[#allocation3 + $0x89] sm:$0x1] %vm2092_vm13, %v4367_v14  ;;  %2114 = vst.msk [vmem:[#allocation3 + $0xa1] sm:$0x1] %vm2092_vm13, %v4367_v14 }
 0x25c   : > { %1535 = vst.msk [vmem:[#allocation2 + $0xa0] sm:$0xff] %vm1514_vm9, %v1459_v16  ;;  %v1461_v60 = vpop.permute.xlu1 %1460 }
 0x25d   : > { %1536 = vst.msk [vmem:[#allocation2 + $0xa8] sm:$0xff] %vm1514_vm9, %v1461_v60 }
 0x25e   : > { %2115 = vst.msk [vmem:[#allocation3 + $0xb9] sm:$0x1] %vm2092_vm13, %v4367_v14  ;;  %2116 = vst.msk [vmem:[#allocation3 + $0xd1] sm:$0x1] %vm2092_vm13, %v4367_v14 }
 0x25f   : > { %v1593_v1 = vpop.permute.xlu0 %1592  ;;  %v1699_v10 = vld [vmem:[#allocation2 + $0x90] sm:$0xff]  ;;  %2117 = vst.msk [vmem:[#allocation3 + $0xe9] sm:$0x1] %vm2092_vm13, %v4367_v14  ;;  %2118 = vst.msk [vmem:[#allocation3 + $0x101] sm:$0x1] %vm2092_vm13, %v4367_v14 }
 0x260   : > { %1669 = vst.msk [vmem:[#allocation2 + $0xa0] sm:$0xff] %vm1648_vm10, %v1593_v1  ;;  %v1595_v7 = vpop.permute.xlu1 %1594  ;;  %4214 = vmatprep.mubr.msk.f32.mxu0 %vm1729_vm11, %v1699_v10  ;;  %v1700_v17 = vld [vmem:[#allocation2 + $0x98] sm:$0xff] }
 0x261   : > { %1670 = vst.msk [vmem:[#allocation2 + $0xa8] sm:$0xff] %vm1648_vm10, %v1595_v7  ;;  %4215 = vmatmul.mubr.msk.f32.gmra.mrb[18].mxu0 %vm1729_vm11, %v1700_v17 }
 0x262   : > { %2119 = vst.msk [vmem:[#allocation3 + $0x119] sm:$0x1] %vm2092_vm13, %v4367_v14  ;;  %2120 = vst.msk [vmem:[#allocation3 + $0x131] sm:$0x1] %vm2092_vm13, %v4367_v14 }
 0x263   : > { %v1463_v3 = vpop.permute.xlu0 %1462  ;;  %2121 = vst.msk [vmem:[#allocation3 + $0x149] sm:$0x1] %vm2092_vm13, %v4367_v14  ;;  %2122 = vst.msk [vmem:[#allocation3 + $0x161] sm:$0x1] %vm2092_vm13, %v4367_v14 }
 0x264   : > { %1537 = vst.msk [vmem:[#allocation2 + $0xb0] sm:$0xff] %vm1514_vm9, %v1463_v3  ;;  %v1465_v31 = vpop.permute.xlu1 %1464 }
 0x265   : > { %1538 = vst.msk [vmem:[#allocation2 + $0xb8] sm:$0xff] %vm1514_vm9, %v1465_v31 }
 0x266   : > { %2123 = vst.msk [vmem:[#allocation3 + $0x179] sm:$0x1] %vm2092_vm13, %v4367_v14  ;;  %2124 = vst.msk [vmem:[#allocation3 + $0x191] sm:$0x1] %vm2092_vm13, %v4367_v14 }
 0x267   : > { %v1597_v33 = vpop.permute.xlu0 %1596  ;;  %v1701_v59 = vld [vmem:[#allocation2 + $0xa0] sm:$0xff]  ;;  %2212 = vst.msk [vmem:[#allocation2 + $0x8] sm:$0xff] %vm380_vm1, %v5862_v45  ;;  %2211 = vst.msk [vmem:[#allocation2] sm:$0xff] %vm380_vm1, %v5866_v50 }
 0x268   : > { %1671 = vst.msk [vmem:[#allocation2 + $0xb0] sm:$0xff] %vm1648_vm10, %v1597_v33  ;;  %v1599_v26 = vpop.permute.xlu1 %1598  ;;  %4217 = vmatprep.mubr.msk.f32.mxu0 %vm1729_vm11, %v1701_v59  ;;  %v1702_v15 = vld [vmem:[#allocation2 + $0xa8] sm:$0xff] }
 0x269   : > { %1672 = vst.msk [vmem:[#allocation2 + $0xb8] sm:$0xff] %vm1648_vm10, %v1599_v26  ;;  %4218 = vmatmul.mubr.msk.f32.gmra.mrb[20].mxu0 %vm1729_vm11, %v1702_v15 }
 0x26b   : > { %v1467_v28 = vpop.permute.xlu0 %1466 }
 0x26c   : > { %1539 = vst.msk [vmem:[#allocation2 + $0xc0] sm:$0xff] %vm1514_vm9, %v1467_v28  ;;  %v1469_v8 = vpop.permute.xlu1 %1468 }
 0x26d   : > { %1540 = vst.msk [vmem:[#allocation2 + $0xc8] sm:$0xff] %vm1514_vm9, %v1469_v8 }
 0x26f   : > { %v1601_v43 = vpop.permute.xlu0 %1600  ;;  %v1703_v25 = vld [vmem:[#allocation2 + $0xb0] sm:$0xff] }
 0x270   : > { %1673 = vst.msk [vmem:[#allocation2 + $0xc0] sm:$0xff] %vm1648_vm10, %v1601_v43  ;;  %v1603_v34 = vpop.permute.xlu1 %1602  ;;  %4220 = vmatprep.mubr.msk.f32.mxu0 %vm1729_vm11, %v1703_v25  ;;  %v1704_v57 = vld [vmem:[#allocation2 + $0xb8] sm:$0xff] }
 0x271   : > { %1674 = vst.msk [vmem:[#allocation2 + $0xc8] sm:$0xff] %vm1648_vm10, %v1603_v34  ;;  %4221 = vmatmul.mubr.msk.f32.gmra.mrb[22].mxu0 %vm1729_vm11, %v1704_v57 }
 0x273   : > { %v1471_v53 = vpop.permute.xlu0 %1470 }
 0x274   : > { %1541 = vst.msk [vmem:[#allocation2 + $0xd0] sm:$0xff] %vm1514_vm9, %v1471_v53  ;;  %v1473_v18 = vpop.permute.xlu1 %1472 }
 0x275   : > { %1542 = vst.msk [vmem:[#allocation2 + $0xd8] sm:$0xff] %vm1514_vm9, %v1473_v18 }
 0x277   : > { %v1605_v20 = vpop.permute.xlu0 %1604  ;;  %v1705_v21 = vld [vmem:[#allocation2 + $0xc0] sm:$0xff] }
 0x278   : > { %1675 = vst.msk [vmem:[#allocation2 + $0xd0] sm:$0xff] %vm1648_vm10, %v1605_v20  ;;  %v1607_v27 = vpop.permute.xlu1 %1606  ;;  %4223 = vmatprep.mubr.msk.f32.mxu0 %vm1729_vm11, %v1705_v21  ;;  %v1706_v39 = vld [vmem:[#allocation2 + $0xc8] sm:$0xff] }
 0x279   : > { %1676 = vst.msk [vmem:[#allocation2 + $0xd8] sm:$0xff] %vm1648_vm10, %v1607_v27  ;;  %4224 = vmatmul.mubr.msk.f32.gmra.mrb[24].mxu0 %vm1729_vm11, %v1706_v39 }
 0x27b   : > { %v1475_v29 = vpop.permute.xlu0 %1474 }
 0x27c   : > { %1543 = vst.msk [vmem:[#allocation2 + $0xe0] sm:$0xff] %vm1514_vm9, %v1475_v29  ;;  %v1477_v37 = vpop.permute.xlu1 %1476 }
 0x27d   : > { %1544 = vst.msk [vmem:[#allocation2 + $0xe8] sm:$0xff] %vm1514_vm9, %v1477_v37 }
 0x27f   : > { %v1609_v41 = vpop.permute.xlu0 %1608  ;;  %v1707_v42 = vld [vmem:[#allocation2 + $0xd0] sm:$0xff] }
 0x280   : > { %1677 = vst.msk [vmem:[#allocation2 + $0xe0] sm:$0xff] %vm1648_vm10, %v1609_v41  ;;  %v1611_v44 = vpop.permute.xlu1 %1610  ;;  %4226 = vmatprep.mubr.msk.f32.mxu0 %vm1729_vm11, %v1707_v42  ;;  %v1708_v46 = vld [vmem:[#allocation2 + $0xd8] sm:$0xff] }
 0x281   : > { %1678 = vst.msk [vmem:[#allocation2 + $0xe8] sm:$0xff] %vm1648_vm10, %v1611_v44  ;;  %4227 = vmatmul.mubr.msk.f32.gmra.mrb[26].mxu0 %vm1729_vm11, %v1708_v46 }
 0x283   : > { %v1479_v22 = vpop.permute.xlu0 %1478 }
 0x284   : > { %1545 = vst.msk [vmem:[#allocation2 + $0xf0] sm:$0xff] %vm1514_vm9, %v1479_v22  ;;  %v1481_v56 = vpop.permute.xlu1 %1480 }
 0x285   : > { %1546 = vst.msk [vmem:[#allocation2 + $0xf8] sm:$0xff] %vm1514_vm9, %v1481_v56 }
 0x287   : > { %v1709_v58 = vld [vmem:[#allocation2 + $0xe0] sm:$0xff]  ;;  %v1613_v61 = vpop.permute.xlu0 %1612 }
 0x288   : > { %4229 = vmatprep.mubr.msk.f32.mxu0 %vm1729_vm11, %v1709_v58  ;;  %v1710_v62 = vld [vmem:[#allocation2 + $0xe8] sm:$0xff]  ;;  %1679 = vst.msk [vmem:[#allocation2 + $0xf0] sm:$0xff] %vm1648_vm10, %v1613_v61  ;;  %v1615_v13 = vpop.permute.xlu1 %1614 }
 0x289   : > { %4230 = vmatmul.mubr.msk.f32.gmra.mrb[28].mxu0 %vm1729_vm11, %v1710_v62  ;;  %1680 = vst.msk [vmem:[#allocation2 + $0xf8] sm:$0xff] %vm1648_vm10, %v1615_v13 }
 0x28f   : > { %v1711_v24 = vld [vmem:[#allocation2 + $0xf0] sm:$0xff] }
 0x290   : > { %4232 = vmatprep.mubr.msk.f32.mxu0 %vm1729_vm11, %v1711_v24  ;;  %v1712_v32 = vld [vmem:[#allocation2 + $0xf8] sm:$0xff] }
 0x291   : > { %4233 = vmatmul.mubr.msk.f32.gmra.mrb[30].mxu0 %vm1729_vm11, %v1712_v32 }
 0x2c1   : > { %v2374_v40 = vpop.permute.xlu1 %2373  ;;  %v2372_v2 = vpop.permute.xlu0 %2371 }
 0x2c2   : > { %2468 = vst.msk [vmem:[#allocation2 + $0x8] sm:$0xff] %vm638_vm3, %v2374_v40  ;;  %2467 = vst.msk [vmem:[#allocation2] sm:$0xff] %vm638_vm3, %v2372_v2 }
 0x30c   : > { %v4189_v0 = vpop.f32.mrb[0].mxu0 }
 0x30d   : > { %v1898_v63 = vadd.f32 %v4189_v0, %v5882_v4  ;;  %v1892_v6 = vpop.f32.mrb[1].mxu0 }
 0x30e   : > { %v1893_v12 = vadd.f32 %v5882_v4, %v1892_v6 }
 0x30f   : > { %v2052_v36 = vmax.f32 %v1898_v63, 0.0 }
 0x310   : > { %v2051_v35 = vmax.f32 %v1893_v12, 0.0  ;;  %v4192_v51 = vpop.f32.mrb[2].mxu0 }
 0x311   : > { %2126 = vst.msk [vmem:[#allocation3 + $0x21] sm:$0xff] %vm380_vm1, %v2052_v36  ;;  %v1908_v48 = vadd.f32 %v4192_v51, %v5882_v4  ;;  %v1902_v54 = vpop.f32.mrb[3].mxu0 }
 0x312   : > { %2125 = vst.msk [vmem:[#allocation3 + $0x19] sm:$0xff] %vm380_vm1, %v2051_v35  ;;  %v1903_v11 = vadd.f32 %v5882_v4, %v1902_v54 }
 0x313   : > { %v2054_v9 = vmax.f32 %v1908_v48, 0.0 }
 0x314   : > { %v2053_v5 = vmax.f32 %v1903_v11, 0.0  ;;  %v4195_v55 = vpop.f32.mrb[4].mxu0 }
 0x315   : > { %2128 = vst.msk [vmem:[#allocation3 + $0x39] sm:$0xff] %vm380_vm1, %v2054_v9  ;;  %v1918_v30 = vadd.f32 %v4195_v55, %v5882_v4  ;;  %v1912_v16 = vpop.f32.mrb[5].mxu0 }
 0x316   : > { %2127 = vst.msk [vmem:[#allocation3 + $0x31] sm:$0xff] %vm380_vm1, %v2053_v5  ;;  %v1913_v60 = vadd.f32 %v5882_v4, %v1912_v16 }
 0x317   : > { %v2056_v1 = vmax.f32 %v1918_v30, 0.0 }
 0x318   : > { %v2055_v10 = vmax.f32 %v1913_v60, 0.0  ;;  %v4198_v7 = vpop.f32.mrb[6].mxu0  ;;  %v5896_v17 = vld [vmem:[#allocation3 + $0x28] sm:$0x3] }
 0x319   : > { %2130 = vst.msk [vmem:[#allocation3 + $0x51] sm:$0xff] %vm380_vm1, %v2056_v1  ;;  %v1928_v3 = vadd.f32 %v4198_v7, %v5882_v4  ;;  %v1922_v31 = vpop.f32.mrb[7].mxu0  ;;  %v5900_v33 = vld [vmem:[#allocation3 + $0x20] sm:$0xff]  ;;  %v2299_v59 = vrot.slane %v5896_v17, 1  ;;  %v5903_v26 = vld [vmem:[#allocation3 + $0x18] sm:$0xff] }
 0x31a   : > { %2129 = vst.msk [vmem:[#allocation3 + $0x49] sm:$0xff] %vm380_vm1, %v2055_v10  ;;  %v1923_v15 = vadd.f32 %v5882_v4, %v1922_v31  ;;  %v2297_v28 = vrot.slane %v5900_v33, 1  ;;  %2214 = vst.msk [vmem:[#allocation2 + $0x18] sm:$0xff] %vm380_vm1, %v5900_v33  ;;  %v2296_v8 = vrot.slane %v5903_v26, 1 }
 0x31b   : > { %2213 = vst.msk [vmem:[#allocation2 + $0x10] sm:$0xff] %vm380_vm1, %v5903_v26  ;;  %v2058_v43 = vmax.f32 %v1928_v3, 0.0 }
 0x31c   : > { %v2057_v25 = vmax.f32 %v1923_v15, 0.0  ;;  %v4201_v34 = vpop.f32.mrb[8].mxu0  ;;  %v5914_v57 = vsel %vm461_vm0, %v2297_v28, %v2299_v59  ;;  %v5917_v53 = vsel %vm461_vm0, %v2296_v8, %v2297_v28  ;;  %v5919_v18 = vld [vmem:[#allocation3 + $0x40] sm:$0x3] }
 0x31d   : > { %2132 = vst.msk [vmem:[#allocation3 + $0x69] sm:$0xff] %vm380_vm1, %v2058_v43  ;;  %v1938_v20 = vadd.f32 %v4201_v34, %v5882_v4  ;;  %v1932_v21 = vpop.f32.mrb[9].mxu0  ;;  %2377 = vrot.lane.b32.xlu1 %v5914_v57, %s4359_s27  ;;  %2375 = vrot.lane.b32.xlu0 %v5917_v53, %s4359_s27  ;;  %v5927_v27 = vld [vmem:[#allocation3 + $0x38] sm:$0xff]  ;;  %v2304_v39 = vrot.slane %v5919_v18, 1  ;;  %v5930_v29 = vld [vmem:[#allocation3 + $0x30] sm:$0xff] }
 0x31e   : > { %2131 = vst.msk [vmem:[#allocation3 + $0x61] sm:$0xff] %vm380_vm1, %v2057_v25  ;;  %v1933_v37 = vadd.f32 %v5882_v4, %v1932_v21  ;;  %v2302_v41 = vrot.slane %v5927_v27, 1  ;;  %2216 = vst.msk [vmem:[#allocation2 + $0x28] sm:$0xff] %vm380_vm1, %v5927_v27  ;;  %v2301_v42 = vrot.slane %v5930_v29, 1 }
 0x31f   : > { %2215 = vst.msk [vmem:[#allocation2 + $0x20] sm:$0xff] %vm380_vm1, %v5930_v29  ;;  %v2060_v44 = vmax.f32 %v1938_v20, 0.0 }
 0x320   : > { %v2059_v46 = vmax.f32 %v1933_v37, 0.0  ;;  %v4204_v22 = vpop.f32.mrb[10].mxu0  ;;  %v5941_v56 = vsel %vm461_vm0, %v2302_v41, %v2304_v39  ;;  %v5944_v58 = vsel %vm461_vm0, %v2301_v42, %v2302_v41  ;;  %v5946_v61 = vld [vmem:[#allocation3 + $0x58] sm:$0x3] }
 0x321   : > { %2134 = vst.msk [vmem:[#allocation3 + $0x81] sm:$0xff] %vm380_vm1, %v2060_v44  ;;  %v1948_v62 = vadd.f32 %v4204_v22, %v5882_v4  ;;  %v1942_v13 = vpop.f32.mrb[11].mxu0  ;;  %2381 = vrot.lane.b32.xlu1 %v5941_v56, %s4359_s27  ;;  %2379 = vrot.lane.b32.xlu0 %v5944_v58, %s4359_s27  ;;  %v5954_v14 = vld [vmem:[#allocation3 + $0x50] sm:$0xff]  ;;  %v2309_v24 = vrot.slane %v5946_v61, 1  ;;  %v5957_v32 = vld [vmem:[#allocation3 + $0x48] sm:$0xff] }
 0x322   : > { %2133 = vst.msk [vmem:[#allocation3 + $0x79] sm:$0xff] %vm380_vm1, %v2059_v46  ;;  %v1943_v52 = vadd.f32 %v5882_v4, %v1942_v13  ;;  %v2307_v19 = vrot.slane %v5954_v14, 1  ;;  %2218 = vst.msk [vmem:[#allocation2 + $0x38] sm:$0xff] %vm380_vm1, %v5954_v14  ;;  %v2306_v23 = vrot.slane %v5957_v32, 1 }
 0x323   : > { %2217 = vst.msk [vmem:[#allocation2 + $0x30] sm:$0xff] %vm380_vm1, %v5957_v32  ;;  %v2062_v38 = vmax.f32 %v1948_v62, 0.0 }
 0x324   : > { %v2061_v49 = vmax.f32 %v1943_v52, 0.0  ;;  %v4207_v40 = vpop.f32.mrb[12].mxu0  ;;  %v5968_v2 = vsel %vm461_vm0, %v2307_v19, %v2309_v24  ;;  %v5971_v0 = vsel %vm461_vm0, %v2306_v23, %v2307_v19  ;;  %v5973_v63 = vld [vmem:[#allocation3 + $0x70] sm:$0x3] }
 0x325   : > { %2136 = vst.msk [vmem:[#allocation3 + $0x99] sm:$0xff] %vm380_vm1, %v2062_v38  ;;  %v1958_v6 = vadd.f32 %v4207_v40, %v5882_v4  ;;  %v1952_v12 = vpop.f32.mrb[13].mxu0  ;;  %2385 = vrot.lane.b32.xlu1 %v5968_v2, %s4359_s27  ;;  %2383 = vrot.lane.b32.xlu0 %v5971_v0, %s4359_s27  ;;  %v5981_v36 = vld [vmem:[#allocation3 + $0x68] sm:$0xff]  ;;  %v2314_v35 = vrot.slane %v5973_v63, 1  ;;  %v5984_v51 = vld [vmem:[#allocation3 + $0x60] sm:$0xff] }
 0x326   : > { %2135 = vst.msk [vmem:[#allocation3 + $0x91] sm:$0xff] %vm380_vm1, %v2061_v49  ;;  %v1953_v48 = vadd.f32 %v5882_v4, %v1952_v12  ;;  %v2312_v54 = vrot.slane %v5981_v36, 1  ;;  %2220 = vst.msk [vmem:[#allocation2 + $0x48] sm:$0xff] %vm380_vm1, %v5981_v36  ;;  %v2311_v11 = vrot.slane %v5984_v51, 1 }
 0x327   : > { %2219 = vst.msk [vmem:[#allocation2 + $0x40] sm:$0xff] %vm380_vm1, %v5984_v51  ;;  %v2064_v9 = vmax.f32 %v1958_v6, 0.0 }
 0x328   : > { %v2063_v5 = vmax.f32 %v1953_v48, 0.0  ;;  %v4210_v55 = vpop.f32.mrb[14].mxu0  ;;  %v5995_v30 = vsel %vm461_vm0, %v2312_v54, %v2314_v35  ;;  %v5998_v16 = vsel %vm461_vm0, %v2311_v11, %v2312_v54  ;;  %v6000_v60 = vld [vmem:[#allocation3 + $0x88] sm:$0x3] }
 0x329   : > { %7546 = vst [vmem:[#allocation30_spill] sm:$0xff] %v5995_v30  ;;  %7547 = vst [vmem:[#allocation31_spill] sm:$0xff] %v5998_v16  ;;  %v1968_v1 = vadd.f32 %v4210_v55, %v5882_v4  ;;  %v1962_v10 = vpop.f32.mrb[15].mxu0  ;;  %2389 = vrot.lane.b32.xlu1 %v5995_v30, %s4359_s27  ;;  %2387 = vrot.lane.b32.xlu0 %v5998_v16, %s4359_s27  ;;  %v6008_v7 = vld [vmem:[#allocation3 + $0x80] sm:$0xff]  ;;  %v2319_v3 = vrot.slane %v6000_v60, 1  ;;  %v6011_v31 = vld [vmem:[#allocation3 + $0x78] sm:$0xff] }
 0x32a   : > { %2138 = vst.msk [vmem:[#allocation3 + $0xb1] sm:$0xff] %vm380_vm1, %v2064_v9  ;;  %2137 = vst.msk [vmem:[#allocation3 + $0xa9] sm:$0xff] %vm380_vm1, %v2063_v5  ;;  %v1963_v59 = vadd.f32 %v5882_v4, %v1962_v10  ;;  %v2317_v15 = vrot.slane %v6008_v7, 1  ;;  %v2316_v28 = vrot.slane %v6011_v31, 1 }
 0x32b   : > { %2222 = vst.msk [vmem:[#allocation2 + $0x58] sm:$0xff] %vm380_vm1, %v6008_v7  ;;  %2221 = vst.msk [vmem:[#allocation2 + $0x50] sm:$0xff] %vm380_vm1, %v6011_v31  ;;  %v2066_v8 = vmax.f32 %v1968_v1, 0.0 }
 0x32c   : > { %v2065_v43 = vmax.f32 %v1963_v59, 0.0  ;;  %v4213_v25 = vpop.f32.mrb[16].mxu0  ;;  %v6022_v34 = vsel %vm461_vm0, %v2317_v15, %v2319_v3  ;;  %v6025_v20 = vsel %vm461_vm0, %v2316_v28, %v2317_v15  ;;  %v6027_v21 = vld [vmem:[#allocation3 + $0xa0] sm:$0x3] }
 0x32d   : > { %7548 = vst [vmem:[#allocation32_spill] sm:$0xff] %v6022_v34  ;;  %7549 = vst [vmem:[#allocation33_spill] sm:$0xff] %v6025_v20  ;;  %v1978_v39 = vadd.f32 %v4213_v25, %v5882_v4  ;;  %v1972_v37 = vpop.f32.mrb[17].mxu0  ;;  %2393 = vrot.lane.b32.xlu1 %v6022_v34, %s4359_s27  ;;  %2391 = vrot.lane.b32.xlu0 %v6025_v20, %s4359_s27  ;;  %v6035_v41 = vld [vmem:[#allocation3 + $0x98] sm:$0xff]  ;;  %v2324_v42 = vrot.slane %v6027_v21, 1  ;;  %v6038_v44 = vld [vmem:[#allocation3 + $0x90] sm:$0xff] }
 0x32e   : > { %2140 = vst.msk [vmem:[#allocation3 + $0xc9] sm:$0xff] %vm380_vm1, %v2066_v8  ;;  %2139 = vst.msk [vmem:[#allocation3 + $0xc1] sm:$0xff] %vm380_vm1, %v2065_v43  ;;  %v1973_v46 = vadd.f32 %v5882_v4, %v1972_v37  ;;  %v2322_v22 = vrot.slane %v6035_v41, 1  ;;  %v2321_v62 = vrot.slane %v6038_v44, 1 }
 0x32f   : > { %2224 = vst.msk [vmem:[#allocation2 + $0x68] sm:$0xff] %vm380_vm1, %v6035_v41  ;;  %2223 = vst.msk [vmem:[#allocation2 + $0x60] sm:$0xff] %vm380_vm1, %v6038_v44  ;;  %v2068_v13 = vmax.f32 %v1978_v39, 0.0 }
 0x330   : > { %v2067_v24 = vmax.f32 %v1973_v46, 0.0  ;;  %v6049_v52 = vsel %vm461_vm0, %v2322_v22, %v2324_v42  ;;  %v6052_v19 = vsel %vm461_vm0, %v2321_v62, %v2322_v22 }
 0x331   : > { %7550 = vst [vmem:[#allocation34_spill] sm:$0xff] %v6049_v52  ;;  %7551 = vst [vmem:[#allocation35_spill] sm:$0xff] %v6052_v19  ;;  %v6054_v23 = vld [vmem:[#allocation3 + $0xb8] sm:$0x3]  ;;  %2397 = vrot.lane.b32.xlu1 %v6049_v52, %s4359_s27  ;;  %2395 = vrot.lane.b32.xlu0 %v6052_v19, %s4359_s27  ;;  %v6061_v38 = vld [vmem:[#allocation3 + $0xb0] sm:$0xff] }
 0x332   : > { %2142 = vst.msk [vmem:[#allocation3 + $0xe1] sm:$0xff] %vm380_vm1, %v2068_v13  ;;  %v2329_v49 = vrot.slane %v6054_v23, 1  ;;  %v6064_v40 = vld [vmem:[#allocation3 + $0xa8] sm:$0xff]  ;;  %2141 = vst.msk [vmem:[#allocation3 + $0xd9] sm:$0xff] %vm380_vm1, %v2067_v24  ;;  %v2327_v6 = vrot.slane %v6061_v38, 1 }
 0x333   : > { %2226 = vst.msk [vmem:[#allocation2 + $0x78] sm:$0xff] %vm380_vm1, %v6061_v38  ;;  %v2326_v12 = vrot.slane %v6064_v40, 1  ;;  %2225 = vst.msk [vmem:[#allocation2 + $0x70] sm:$0xff] %vm380_vm1, %v6064_v40 }
 0x334   : > { %v4216_v35 = vpop.f32.mrb[18].mxu0  ;;  %v6074_v48 = vsel %vm461_vm0, %v2327_v6, %v2329_v49 }
 0x335   : > { %7552 = vst [vmem:[#allocation36_spill] sm:$0xff] %v6074_v48  ;;  %v6077_v54 = vsel %vm461_vm0, %v2326_v12, %v2327_v6  ;;  %v6079_v11 = vld [vmem:[#allocation3 + $0xd0] sm:$0x3]  ;;  %v1988_v9 = vadd.f32 %v4216_v35, %v5882_v4  ;;  %v1982_v5 = vpop.f32.mrb[19].mxu0  ;;  %2401 = vrot.lane.b32.xlu1 %v6074_v48, %s4359_s27  ;;  %v6086_v55 = vld [vmem:[#allocation3 + $0xc8] sm:$0xff]  ;;  %v6089_v10 = vld [vmem:[#allocation3 + $0xc0] sm:$0xff] }
 0x336   : > { %7553 = vst [vmem:[#allocation38_spill] sm:$0xff] %v6077_v54  ;;  %2399 = vrot.lane.b32.xlu0 %v6077_v54, %s4359_s27  ;;  %v2334_v1 = vrot.slane %v6079_v11, 1  ;;  %v1983_v3 = vadd.f32 %v5882_v4, %v1982_v5  ;;  %v2332_v59 = vrot.slane %v6086_v55, 1  ;;  %2228 = vst.msk [vmem:[#allocation2 + $0x88] sm:$0xff] %vm380_vm1, %v6086_v55  ;;  %v2331_v15 = vrot.slane %v6089_v10, 1 }
 0x337   : > { %2227 = vst.msk [vmem:[#allocation2 + $0x80] sm:$0xff] %vm380_vm1, %v6089_v10  ;;  %v2070_v28 = vmax.f32 %v1988_v9, 0.0 }
 0x338   : > { %v2069_v8 = vmax.f32 %v1983_v3, 0.0  ;;  %v6099_v43 = vsel %vm461_vm0, %v2332_v59, %v2334_v1  ;;  %v6102_v25 = vsel %vm461_vm0, %v2331_v15, %v2332_v59 }
 0x339   : > { %7554 = vst [vmem:[#allocation6_spill] sm:$0xff] %v6099_v43  ;;  %7555 = vst [vmem:[#allocation7_spill] sm:$0xff] %v6102_v25  ;;  %v6104_v39 = vld [vmem:[#allocation3 + $0xe8] sm:$0x3]  ;;  %2405 = vrot.lane.b32.xlu1 %v6099_v43, %s4359_s27  ;;  %v6111_v37 = vld [vmem:[#allocation3 + $0xe0] sm:$0xff] }
 0x33a   : > { %2144 = vst.msk [vmem:[#allocation3 + $0xf9] sm:$0xff] %vm380_vm1, %v2070_v28  ;;  %2403 = vrot.lane.b32.xlu0 %v6102_v25, %s4359_s27  ;;  %v2339_v42 = vrot.slane %v6104_v39, 1  ;;  %v6114_v46 = vld [vmem:[#allocation3 + $0xd8] sm:$0xff]  ;;  %2143 = vst.msk [vmem:[#allocation3 + $0xf1] sm:$0xff] %vm380_vm1, %v2069_v8  ;;  %v2337_v22 = vrot.slane %v6111_v37, 1 }
 0x33b   : > { %2230 = vst.msk [vmem:[#allocation2 + $0x98] sm:$0xff] %vm380_vm1, %v6111_v37  ;;  %v2336_v62 = vrot.slane %v6114_v46, 1  ;;  %2229 = vst.msk [vmem:[#allocation2 + $0x90] sm:$0xff] %vm380_vm1, %v6114_v46 }
 0x33c   : > { %v4219_v13 = vpop.f32.mrb[20].mxu0  ;;  %v6124_v24 = vsel %vm461_vm0, %v2337_v22, %v2339_v42 }
 0x33d   : > { %7556 = vst [vmem:[#allocation8_spill] sm:$0xff] %v6124_v24  ;;  %v6127_v49 = vsel %vm461_vm0, %v2336_v62, %v2337_v22  ;;  %v1998_v6 = vadd.f32 %v4219_v13, %v5882_v4  ;;  %v1992_v12 = vpop.f32.mrb[21].mxu0  ;;  %2409 = vrot.lane.b32.xlu1 %v6124_v24, %s4359_s27 }
 0x33e   : > { %7557 = vst [vmem:[#allocation9_spill] sm:$0xff] %v6127_v49  ;;  %2407 = vrot.lane.b32.xlu0 %v6127_v49, %s4359_s27  ;;  %v1993_v35 = vadd.f32 %v5882_v4, %v1992_v12 }
 0x33f   : > { %v2072_v9 = vmax.f32 %v1998_v6, 0.0 }
 0x340   : > { %v2071_v5 = vmax.f32 %v1993_v35, 0.0 }
 0x341   : > { %v6135_v1 = vld [vmem:[#allocation3 + $0x100] sm:$0x3]  ;;  %2146 = vst.msk [vmem:[#allocation3 + $0x111] sm:$0xff] %vm380_vm1, %v2072_v9  ;;  %v6138_v3 = vld [vmem:[#allocation3 + $0xf8] sm:$0xff]  ;;  %v6141_v15 = vld [vmem:[#allocation3 + $0xf0] sm:$0xff] }
 0x342   : > { %v2344_v59 = vrot.slane %v6135_v1, 1  ;;  %2145 = vst.msk [vmem:[#allocation3 + $0x109] sm:$0xff] %vm380_vm1, %v2071_v5  ;;  %v2342_v28 = vrot.slane %v6138_v3, 1  ;;  %2232 = vst.msk [vmem:[#allocation2 + $0xa8] sm:$0xff] %vm380_vm1, %v6138_v3  ;;  %v2341_v8 = vrot.slane %v6141_v15, 1 }
 0x343   : > { %2231 = vst.msk [vmem:[#allocation2 + $0xa0] sm:$0xff] %vm380_vm1, %v6141_v15 }
 0x344   : > { %v4222_v42 = vpop.f32.mrb[22].mxu0  ;;  %v6151_v22 = vsel %vm461_vm0, %v2342_v28, %v2344_v59  ;;  %v6154_v62 = vsel %vm461_vm0, %v2341_v8, %v2342_v28 }
 0x345   : > { %7558 = vst [vmem:[#allocation10_spill] sm:$0xff] %v6151_v22  ;;  %7559 = vst [vmem:[#allocation11_spill] sm:$0xff] %v6154_v62  ;;  %v2008_v13 = vadd.f32 %v4222_v42, %v5882_v4  ;;  %v2002_v6 = vpop.f32.mrb[23].mxu0  ;;  %2413 = vrot.lane.b32.xlu1 %v6151_v22, %s4359_s27  ;;  %2411 = vrot.lane.b32.xlu0 %v6154_v62, %s4359_s27 }
 0x346   : > { %v2003_v12 = vadd.f32 %v5882_v4, %v2002_v6 }
 0x347   : > { %v2074_v35 = vmax.f32 %v2008_v13, 0.0 }
 0x348   : > { %v2073_v9 = vmax.f32 %v2003_v12, 0.0  ;;  %v6162_v5 = vld [vmem:[#allocation3 + $0x118] sm:$0x3] }
 0x349   : > { %2148 = vst.msk [vmem:[#allocation3 + $0x129] sm:$0xff] %vm380_vm1, %v2074_v35  ;;  %v6165_v59 = vld [vmem:[#allocation3 + $0x110] sm:$0xff]  ;;  %v2349_v28 = vrot.slane %v6162_v5, 1  ;;  %v6168_v8 = vld [vmem:[#allocation3 + $0x108] sm:$0xff] }
 0x34a   : > { %2147 = vst.msk [vmem:[#allocation3 + $0x121] sm:$0xff] %vm380_vm1, %v2073_v9  ;;  %v2347_v42 = vrot.slane %v6165_v59, 1  ;;  %2234 = vst.msk [vmem:[#allocation2 + $0xb8] sm:$0xff] %vm380_vm1, %v6165_v59  ;;  %v2346_v13 = vrot.slane %v6168_v8, 1 }
 0x34b   : > { %2233 = vst.msk [vmem:[#allocation2 + $0xb0] sm:$0xff] %vm380_vm1, %v6168_v8 }
 0x34c   : > { %v4225_v6 = vpop.f32.mrb[24].mxu0  ;;  %v6178_v12 = vsel %vm461_vm0, %v2347_v42, %v2349_v28  ;;  %v6181_v35 = vsel %vm461_vm0, %v2346_v13, %v2347_v42 }
 0x34d   : > { %7560 = vst [vmem:[#allocation12_spill] sm:$0xff] %v6178_v12  ;;  %7561 = vst [vmem:[#allocation13_spill] sm:$0xff] %v6181_v35  ;;  %v2018_v22 = vadd.f32 %v4225_v6, %v5882_v4  ;;  %v2012_v9 = vpop.f32.mrb[25].mxu0  ;;  %2417 = vrot.lane.b32.xlu1 %v6178_v12, %s4359_s27  ;;  %2415 = vrot.lane.b32.xlu0 %v6181_v35, %s4359_s27 }
 0x34e   : > { %v2013_v62 = vadd.f32 %v5882_v4, %v2012_v9 }
 0x34f   : > { %v2076_v24 = vmax.f32 %v2018_v22, 0.0 }
 0x350   : > { %v2075_v49 = vmax.f32 %v2013_v62, 0.0  ;;  %v6189_v43 = vld [vmem:[#allocation3 + $0x130] sm:$0x3] }
 0x351   : > { %2150 = vst.msk [vmem:[#allocation3 + $0x141] sm:$0xff] %vm380_vm1, %v2076_v24  ;;  %v6192_v28 = vld [vmem:[#allocation3 + $0x128] sm:$0xff]  ;;  %v2354_v42 = vrot.slane %v6189_v43, 1  ;;  %v6195_v13 = vld [vmem:[#allocation3 + $0x120] sm:$0xff] }
 0x352   : > { %2149 = vst.msk [vmem:[#allocation3 + $0x139] sm:$0xff] %vm380_vm1, %v2075_v49  ;;  %v2352_v6 = vrot.slane %v6192_v28, 1  ;;  %2236 = vst.msk [vmem:[#allocation2 + $0xc8] sm:$0xff] %vm380_vm1, %v6192_v28  ;;  %v2351_v22 = vrot.slane %v6195_v13, 1 }
 0x353   : > { %2235 = vst.msk [vmem:[#allocation2 + $0xc0] sm:$0xff] %vm380_vm1, %v6195_v13 }
 0x354   : > { %v4228_v62 = vpop.f32.mrb[26].mxu0  ;;  %v6205_v24 = vsel %vm461_vm0, %v2352_v6, %v2354_v42  ;;  %v6208_v9 = vsel %vm461_vm0, %v2351_v22, %v2352_v6 }
 0x355   : > { %7562 = vst [vmem:[#allocation14_spill] sm:$0xff] %v6205_v24  ;;  %7563 = vst [vmem:[#allocation15_spill] sm:$0xff] %v6208_v9  ;;  %v2028_v12 = vadd.f32 %v4228_v62, %v5882_v4  ;;  %v2022_v49 = vpop.f32.mrb[27].mxu0  ;;  %2421 = vrot.lane.b32.xlu1 %v6205_v24, %s4359_s27  ;;  %2419 = vrot.lane.b32.xlu0 %v6208_v9, %s4359_s27 }
 0x356   : > { %v2023_v35 = vadd.f32 %v5882_v4, %v2022_v49 }
 0x357   : > { %v2078_v25 = vmax.f32 %v2028_v12, 0.0 }
 0x358   : > { %v2077_v48 = vmax.f32 %v2023_v35, 0.0  ;;  %v6216_v54 = vld [vmem:[#allocation3 + $0x148] sm:$0x3] }
 0x359   : > { %2152 = vst.msk [vmem:[#allocation3 + $0x159] sm:$0xff] %vm380_vm1, %v2078_v25  ;;  %v6219_v42 = vld [vmem:[#allocation3 + $0x140] sm:$0xff]  ;;  %v2359_v6 = vrot.slane %v6216_v54, 1  ;;  %v6222_v22 = vld [vmem:[#allocation3 + $0x138] sm:$0xff] }
 0x35a   : > { %2151 = vst.msk [vmem:[#allocation3 + $0x151] sm:$0xff] %vm380_vm1, %v2077_v48  ;;  %v2357_v62 = vrot.slane %v6219_v42, 1  ;;  %2238 = vst.msk [vmem:[#allocation2 + $0xd8] sm:$0xff] %vm380_vm1, %v6219_v42  ;;  %v2356_v12 = vrot.slane %v6222_v22, 1 }
 0x35b   : > { %2237 = vst.msk [vmem:[#allocation2 + $0xd0] sm:$0xff] %vm380_vm1, %v6222_v22 }
 0x35c   : > { %v4231_v35 = vpop.f32.mrb[28].mxu0  ;;  %v6232_v25 = vsel %vm461_vm0, %v2357_v62, %v2359_v6  ;;  %v6235_v49 = vsel %vm461_vm0, %v2356_v12, %v2357_v62 }
 0x35d   : > { %7564 = vst [vmem:[#allocation16_spill] sm:$0xff] %v6232_v25  ;;  %7565 = vst [vmem:[#allocation17_spill] sm:$0xff] %v6235_v49  ;;  %v2038_v24 = vadd.f32 %v4231_v35, %v5882_v4  ;;  %v2032_v48 = vpop.f32.mrb[29].mxu0  ;;  %2425 = vrot.lane.b32.xlu1 %v6232_v25, %s4359_s27  ;;  %2423 = vrot.lane.b32.xlu0 %v6235_v49, %s4359_s27 }
 0x35e   : > { %v2033_v9 = vadd.f32 %v5882_v4, %v2032_v48 }
 0x35f   : > { %v2080_v52 = vmax.f32 %v2038_v24, 0.0 }
 0x360   : > { %v2079_v19 = vmax.f32 %v2033_v9, 0.0  ;;  %v6243_v34 = vld [vmem:[#allocation3 + $0x160] sm:$0x3] }
 0x361   : > { %2154 = vst.msk [vmem:[#allocation3 + $0x171] sm:$0xff] %vm380_vm1, %v2080_v52  ;;  %v6246_v6 = vld [vmem:[#allocation3 + $0x158] sm:$0xff]  ;;  %v2364_v62 = vrot.slane %v6243_v34, 1  ;;  %v6249_v12 = vld [vmem:[#allocation3 + $0x150] sm:$0xff] }
 0x362   : > { %2153 = vst.msk [vmem:[#allocation3 + $0x169] sm:$0xff] %vm380_vm1, %v2079_v19  ;;  %v2362_v35 = vrot.slane %v6246_v6, 1  ;;  %2240 = vst.msk [vmem:[#allocation2 + $0xe8] sm:$0xff] %vm380_vm1, %v6246_v6  ;;  %v2361_v24 = vrot.slane %v6249_v12, 1 }
 0x363   : > { %2239 = vst.msk [vmem:[#allocation2 + $0xe0] sm:$0xff] %vm380_vm1, %v6249_v12 }
 0x364   : > { %v6259_v52 = vsel %vm461_vm0, %v2362_v35, %v2364_v62  ;;  %v6262_v9 = vsel %vm461_vm0, %v2361_v24, %v2362_v35  ;;  %v4234_v48 = vpop.f32.mrb[30].mxu0 }
 0x365   : > { %7566 = vst [vmem:[#allocation18_spill] sm:$0xff] %v6259_v52  ;;  %7567 = vst [vmem:[#allocation19_spill] sm:$0xff] %v6262_v9  ;;  %2429 = vrot.lane.b32.xlu1 %v6259_v52, %s4359_s27  ;;  %2427 = vrot.lane.b32.xlu0 %v6262_v9, %s4359_s27  ;;  %v2048_v19 = vadd.f32 %v4234_v48, %v5882_v4  ;;  %v2042_v25 = vpop.f32.mrb[31].mxu0  ;;  %v2500_v52 = vrot.slane %v5862_v45, 2 }
 0x366   : > { %v2043_v49 = vadd.f32 %v5882_v4, %v2042_v25  ;;  %v2502_v25 = vrot.slane %v5864_v47, 2 }
 0x367   : > { %v2082_v20 = vmax.f32 %v2048_v19, 0.0  ;;  %v2507_v19 = vrot.slane %v5896_v17, 2 }
 0x368   : > { %v6270_v30 = vld [vmem:[#allocation3 + $0x178] sm:$0x3]  ;;  %v2081_v62 = vmax.f32 %v2043_v49, 0.0  ;;  %v2499_v49 = vrot.slane %v5866_v50, 2  ;;  %v2503_v48 = vsel %vm671_vm2, %v2500_v52, %v2502_v25  ;;  %v2505_v50 = vrot.slane %v5900_v33, 2 }
 0x369   : > { %v6272_v16 = vld [vmem:[#allocation3 + $0x170] sm:$0xff]  ;;  %v2369_v35 = vrot.slane %v6270_v30, 1  ;;  %v6275_v24 = vld [vmem:[#allocation3 + $0x168] sm:$0xff]  ;;  %2156 = vst.msk [vmem:[#allocation3 + $0x189] sm:$0xff] %vm380_vm1, %v2082_v20 }
 0x36a   : > { %v2367_v9 = vrot.slane %v6272_v16, 1  ;;  %2242 = vst.msk [vmem:[#allocation2 + $0xf8] sm:$0xff] %vm380_vm1, %v6272_v16  ;;  %v2366_v4 = vrot.slane %v6275_v24, 1  ;;  %2241 = vst.msk [vmem:[#allocation2 + $0xf0] sm:$0xff] %vm380_vm1, %v6275_v24  ;;  %v2501_v47 = vsel %vm671_vm2, %v2499_v49, %v2500_v52  ;;  %v2509_v52 = vrot.slane %v5930_v29, 2 }
 0x36b   : > { %2155 = vst.msk [vmem:[#allocation3 + $0x181] sm:$0xff] %vm380_vm1, %v2081_v62  ;;  %v2504_v62 = vrot.slane %v5903_v26, 2 }
 0x36c   : > { %v6289_v45 = vsel %vm461_vm0, %v2367_v9, %v2369_v35  ;;  %v6292_v20 = vsel %vm461_vm0, %v2366_v4, %v2367_v9  ;;  %v2510_v9 = vrot.slane %v5927_v27, 2  ;;  %v2512_v35 = vrot.slane %v5919_v18, 2 }
 0x36d   : > { %7568 = vst [vmem:[#allocation37_spill] sm:$0xff] %v6289_v45  ;;  %7569 = vst [vmem:[#allocation20_spill] sm:$0xff] %v6292_v20  ;;  %2433 = vrot.lane.b32.xlu1 %v6289_v45, %s4359_s27  ;;  %2431 = vrot.lane.b32.xlu0 %v6292_v20, %s4359_s27  ;;  %v6308_v4 = vsel %vm671_vm2, %v2505_v50, %v2507_v19  ;;  %v6311_v25 = vsel %vm671_vm2, %v2504_v62, %v2505_v50  ;;  %v2515_v18 = vrot.slane %v5954_v14, 2 }
 0x36e   : > { %v6319_v17 = vsel %vm671_vm2, %v2510_v9, %v2512_v35  ;;  %v6322_v49 = vsel %vm671_vm2, %v2509_v52, %v2510_v9  ;;  %v2520_v50 = vrot.slane %v5981_v36, 2  ;;  %v2522_v19 = vrot.slane %v5973_v63, 2 }
 0x36f   : > { %v2525_v63 = vrot.slane %v6008_v7, 2 }
 0x370   : > { %v6345_v35 = vsel %vm671_vm2, %v2520_v50, %v2522_v19  ;;  %v2532_v19 = vrot.slane %v6027_v21, 2  ;;  %v2535_v21 = vrot.slane %v6061_v38, 2 }
 0x371   : > { %2581 = vrot.lane.b32.xlu1 %v2503_v48, %s4360_s28  ;;  %2579 = vrot.lane.b32.xlu0 %v2501_v47, %s4360_s28  ;;  %v2517_v48 = vrot.slane %v5946_v61, 2  ;;  %v2514_v47 = vrot.slane %v5957_v32, 2  ;;  %v2519_v61 = vrot.slane %v5984_v51, 2 }
 0x373   : > { %v6334_v62 = vsel %vm671_vm2, %v2515_v18, %v2517_v48  ;;  %v6337_v9 = vsel %vm671_vm2, %v2514_v47, %v2515_v18  ;;  %v6348_v52 = vsel %vm671_vm2, %v2519_v61, %v2520_v50  ;;  %v2527_v48 = vrot.slane %v6000_v60, 2 }
 0x374   : > { %v2524_v18 = vrot.slane %v6011_v31, 2  ;;  %v2530_v47 = vrot.slane %v6035_v41, 2  ;;  %v2529_v60 = vrot.slane %v6038_v44, 2 }
 0x375   : > { %2585 = vrot.lane.b32.xlu1 %v6308_v4, %s4360_s28  ;;  %2583 = vrot.lane.b32.xlu0 %v6311_v25, %s4360_s28  ;;  %v6360_v45 = vsel %vm671_vm2, %v2525_v63, %v2527_v48  ;;  %v2537_v48 = vrot.slane %v6054_v23, 2  ;;  %v2539_v23 = vrot.slane %v6089_v10, 2 }
 0x376   : > { %7570 = vst [vmem:[#allocation21_spill] sm:$0xff] %v6360_v45  ;;  %v6363_v50 = vsel %vm671_vm2, %v2524_v18, %v2525_v63  ;;  %v6371_v61 = vsel %vm671_vm2, %v2530_v47, %v2532_v19  ;;  %v6374_v20 = vsel %vm671_vm2, %v2529_v60, %v2530_v47  ;;  %v2534_v63 = vrot.slane %v6064_v40, 2 }
 0x377   : > { %7571 = vst [vmem:[#allocation39_spill] sm:$0xff] %v6371_v61  ;;  %7572 = vst [vmem:[#allocation22_spill] sm:$0xff] %v6374_v20  ;;  %v2540_v18 = vrot.slane %v6086_v55, 2  ;;  %v2542_v19 = vrot.slane %v6079_v11, 2 }
 0x378   : > { %v6389_v47 = vsel %vm671_vm2, %v2534_v63, %v2535_v21  ;;  %v2544_v63 = vrot.slane %v6114_v46, 2 }
 0x379   : > { %2589 = vrot.lane.b32.xlu1 %v6319_v17, %s4360_s28  ;;  %2587 = vrot.lane.b32.xlu0 %v6322_v49, %s4360_s28  ;;  %v6402_v11 = vsel %vm671_vm2, %v2539_v23, %v2540_v18  ;;  %v2549_v23 = vrot.slane %v6141_v15, 2 }
 0x37d   : > { %2593 = vrot.lane.b32.xlu1 %v6334_v62, %s4360_s28  ;;  %2591 = vrot.lane.b32.xlu0 %v6337_v9, %s4360_s28 }
 0x381   : > { %2597 = vrot.lane.b32.xlu1 %v6345_v35, %s4360_s28  ;;  %2595 = vrot.lane.b32.xlu0 %v6348_v52, %s4360_s28 }
 0x385   : > { %2601 = vrot.lane.b32.xlu1 %v6360_v45, %s4360_s28  ;;  %2599 = vrot.lane.b32.xlu0 %v6363_v50, %s4360_s28  ;;  %v6386_v45 = vsel %vm671_vm2, %v2535_v21, %v2537_v48  ;;  %v2545_v21 = vrot.slane %v6111_v37, 2  ;;  %v2547_v48 = vrot.slane %v6104_v39, 2 }
 0x386   : > { %7573 = vst [vmem:[#allocation23_spill] sm:$0xff] %v6386_v45 }
 0x387   : > { %v6416_v39 = vsel %vm671_vm2, %v2545_v21, %v2547_v48  ;;  %v2557_v48 = vrot.slane %v6162_v5, 2 }
 0x388   : > { %7575 = vst [vmem:[#allocation41_spill] sm:$0xff] %v6416_v39 }
 0x389   : > { %2605 = vrot.lane.b32.xlu1 %v6371_v61, %s4360_s28  ;;  %2603 = vrot.lane.b32.xlu0 %v6374_v20, %s4360_s28  ;;  %v6397_v20 = vsel %vm671_vm2, %v2540_v18, %v2542_v19  ;;  %v6419_v18 = vsel %vm671_vm2, %v2544_v63, %v2545_v21  ;;  %v2555_v21 = vrot.slane %v6165_v59, 2  ;;  %v2554_v63 = vrot.slane %v6168_v8, 2 }
 0x38a   : > { %7574 = vst [vmem:[#allocation40_spill] sm:$0xff] %v6397_v20 }
 0x38b   : > { %v6446_v5 = vsel %vm671_vm2, %v2555_v21, %v2557_v48  ;;  %v2567_v48 = vrot.slane %v6216_v54, 2 }
 0x38c   : > { %7577 = vst [vmem:[#allocation25_spill] sm:$0xff] %v6446_v5 }
 0x38d   : > { %2609 = vrot.lane.b32.xlu1 %v6386_v45, %s4360_s28  ;;  %2607 = vrot.lane.b32.xlu0 %v6389_v47, %s4360_s28 }
 0x38f   : > { %v2378_v60 = vpop.permute.xlu1 %2377  ;;  %v2376_v61 = vpop.permute.xlu0 %2375 }
 0x390   : > { %2470 = vst.msk [vmem:[#allocation2 + $0x18] sm:$0xff] %vm638_vm3, %v2378_v60  ;;  %2469 = vst.msk [vmem:[#allocation2 + $0x10] sm:$0xff] %vm638_vm3, %v2376_v61  ;;  %v2550_v60 = vrot.slane %v6138_v3, 2  ;;  %v2552_v61 = vrot.slane %v6135_v1, 2 }
 0x391   : > { %2613 = vrot.lane.b32.xlu1 %v6397_v20, %s4360_s28  ;;  %2611 = vrot.lane.b32.xlu0 %v6402_v11, %s4360_s28 }
 0x393   : > { %v2382_v19 = vpop.permute.xlu1 %2381  ;;  %v2380_v45 = vpop.permute.xlu0 %2379 }
 0x394   : > { %2472 = vst.msk [vmem:[#allocation2 + $0x28] sm:$0xff] %vm638_vm3, %v2382_v19  ;;  %2471 = vst.msk [vmem:[#allocation2 + $0x20] sm:$0xff] %vm638_vm3, %v2380_v45  ;;  %v6427_v19 = vsel %vm671_vm2, %v2550_v60, %v2552_v61  ;;  %v6432_v45 = vsel %vm671_vm2, %v2549_v23, %v2550_v60  ;;  %v6449_v60 = vsel %vm671_vm2, %v2554_v63, %v2555_v21  ;;  %v2559_v23 = vrot.slane %v6195_v13, 2 }
 0x395   : > { %2617 = vrot.lane.b32.xlu1 %v6416_v39, %s4360_s28  ;;  %2615 = vrot.lane.b32.xlu0 %v6419_v18, %s4360_s28  ;;  %7576 = vst [vmem:[#allocation24_spill] sm:$0xff] %v6427_v19  ;;  %v2565_v21 = vrot.slane %v6219_v42, 2  ;;  %v2564_v63 = vrot.slane %v6222_v22, 2 }
 0x397   : > { %v2386_v20 = vpop.permute.xlu1 %2385  ;;  %v2384_v1 = vpop.permute.xlu0 %2383  ;;  %v6476_v54 = vsel %vm671_vm2, %v2565_v21, %v2567_v48  ;;  %v2577_v48 = vrot.slane %v6270_v30, 2 }
 0x398   : > { %2474 = vst.msk [vmem:[#allocation2 + $0x38] sm:$0xff] %vm638_vm3, %v2386_v20  ;;  %2473 = vst.msk [vmem:[#allocation2 + $0x30] sm:$0xff] %vm638_vm3, %v2384_v1  ;;  %v2560_v20 = vrot.slane %v6192_v28, 2  ;;  %v2562_v1 = vrot.slane %v6189_v43, 2 }
 0x399   : > { %2621 = vrot.lane.b32.xlu1 %v6427_v19, %s4360_s28  ;;  %2619 = vrot.lane.b32.xlu0 %v6432_v45, %s4360_s28  ;;  %7579 = vst [vmem:[#allocation43_spill] sm:$0xff] %v6476_v54 }
 0x39b   : > { %v2390_v61 = vpop.permute.xlu1 %2389  ;;  %v2388_v39 = vpop.permute.xlu0 %2387 }
 0x39c   : > { %2476 = vst.msk [vmem:[#allocation2 + $0x48] sm:$0xff] %vm638_vm3, %v2390_v61  ;;  %2475 = vst.msk [vmem:[#allocation2 + $0x40] sm:$0xff] %vm638_vm3, %v2388_v39  ;;  %v6457_v61 = vsel %vm671_vm2, %v2560_v20, %v2562_v1  ;;  %v6462_v39 = vsel %vm671_vm2, %v2559_v23, %v2560_v20  ;;  %v6479_v20 = vsel %vm671_vm2, %v2564_v63, %v2565_v21  ;;  %v2569_v23 = vrot.slane %v6249_v12, 2 }
 0x39d   : > { %2625 = vrot.lane.b32.xlu1 %v6446_v5, %s4360_s28  ;;  %2623 = vrot.lane.b32.xlu0 %v6449_v60, %s4360_s28  ;;  %7578 = vst [vmem:[#allocation42_spill] sm:$0xff] %v6457_v61  ;;  %v2575_v21 = vrot.slane %v6272_v16, 2  ;;  %v2574_v63 = vrot.slane %v6275_v24, 2 }
 0x39f   : > { %v2394_v19 = vpop.permute.xlu1 %2393  ;;  %v2392_v43 = vpop.permute.xlu0 %2391 }
 0x3a0   : > { %2478 = vst.msk [vmem:[#allocation2 + $0x58] sm:$0xff] %vm638_vm3, %v2394_v19  ;;  %2477 = vst.msk [vmem:[#allocation2 + $0x50] sm:$0xff] %vm638_vm3, %v2392_v43  ;;  %v2570_v19 = vrot.slane %v6246_v6, 2  ;;  %v2572_v43 = vrot.slane %v6243_v34, 2 }
 0x3a1   : > { %2629 = vrot.lane.b32.xlu1 %v6457_v61, %s4360_s28  ;;  %2627 = vrot.lane.b32.xlu0 %v6462_v39, %s4360_s28 }
 0x3a3   : > { %v2398_v1 = vpop.permute.xlu1 %2397  ;;  %v2396_v5 = vpop.permute.xlu0 %2395 }
 0x3a4   : > { %2480 = vst.msk [vmem:[#allocation2 + $0x68] sm:$0xff] %vm638_vm3, %v2398_v1  ;;  %2479 = vst.msk [vmem:[#allocation2 + $0x60] sm:$0xff] %vm638_vm3, %v2396_v5  ;;  %v6487_v1 = vsel %vm671_vm2, %v2570_v19, %v2572_v43  ;;  %v6492_v5 = vsel %vm671_vm2, %v2569_v23, %v2570_v19  ;;  %v6507_v19 = vsel %vm671_vm2, %v2574_v63, %v2575_v21 }
 0x3a5   : > { %2633 = vrot.lane.b32.xlu1 %v6476_v54, %s4360_s28  ;;  %2631 = vrot.lane.b32.xlu0 %v6479_v20, %s4360_s28 }
 0x3a7   : > { %v2402_v61 = vpop.permute.xlu1 %2401 }
 0x3a8   : > { %v2400_v34 = vpop.permute.xlu0 %2399  ;;  %2482 = vst.msk [vmem:[#allocation2 + $0x78] sm:$0xff] %vm638_vm3, %v2402_v61  ;;  %v6504_v61 = vsel %vm671_vm2, %v2575_v21, %v2577_v48 }
 0x3a9   : > { %2481 = vst.msk [vmem:[#allocation2 + $0x70] sm:$0xff] %vm638_vm3, %v2400_v34  ;;  %2637 = vrot.lane.b32.xlu1 %v6487_v1, %s4360_s28  ;;  %2635 = vrot.lane.b32.xlu0 %v6492_v5, %s4360_s28 }
 0x3ab   : > { %v2406_v43 = vpop.permute.xlu1 %2405 }
 0x3ac   : > { %v2404_v54 = vpop.permute.xlu0 %2403  ;;  %2484 = vst.msk [vmem:[#allocation2 + $0x88] sm:$0xff] %vm638_vm3, %v2406_v43 }
 0x3ad   : > { %2483 = vst.msk [vmem:[#allocation2 + $0x80] sm:$0xff] %vm638_vm3, %v2404_v54  ;;  %2641 = vrot.lane.b32.xlu1 %v6504_v61, %s4360_s28  ;;  %2639 = vrot.lane.b32.xlu0 %v6507_v19, %s4360_s28 }
 0x3af   : > { %v2410_v30 = vpop.permute.xlu1 %2409 }
 0x3b0   : > { %v2408_v23 = vpop.permute.xlu0 %2407  ;;  %2486 = vst.msk [vmem:[#allocation2 + $0x98] sm:$0xff] %vm638_vm3, %v2410_v30 }
 0x3b1   : > { %2485 = vst.msk [vmem:[#allocation2 + $0x90] sm:$0xff] %vm638_vm3, %v2408_v23  ;;  %2711 = vrot.lane.b32.xlu1 %v5900_v33, %s4361_s29  ;;  %2709 = vrot.lane.b32.xlu0 %v5903_v26, %s4361_s29 }
 0x3b5   : > { %2715 = vrot.lane.b32.xlu1 %v5927_v27, %s4361_s29  ;;  %2713 = vrot.lane.b32.xlu0 %v5930_v29, %s4361_s29 }
 0x3b7   : > { %v2414_v54 = vpop.permute.xlu1 %2413  ;;  %v2412_v34 = vpop.permute.xlu0 %2411 }
 0x3b8   : > { %2488 = vst.msk [vmem:[#allocation2 + $0xa8] sm:$0xff] %vm638_vm3, %v2414_v54  ;;  %2487 = vst.msk [vmem:[#allocation2 + $0xa0] sm:$0xff] %vm638_vm3, %v2412_v34 }
 0x3b9   : > { %2719 = vrot.lane.b32.xlu1 %v5954_v14, %s4361_s29  ;;  %2717 = vrot.lane.b32.xlu0 %v5957_v32, %s4361_s29 }
 0x3bd   : > { %2723 = vrot.lane.b32.xlu1 %v5981_v36, %s4361_s29  ;;  %2721 = vrot.lane.b32.xlu0 %v5984_v51, %s4361_s29 }
 0x3bf   : > { %v2418_v33 = vpop.permute.xlu1 %2417  ;;  %v2416_v26 = vpop.permute.xlu0 %2415 }
 0x3c0   : > { %2490 = vst.msk [vmem:[#allocation2 + $0xb8] sm:$0xff] %vm638_vm3, %v2418_v33  ;;  %2489 = vst.msk [vmem:[#allocation2 + $0xb0] sm:$0xff] %vm638_vm3, %v2416_v26 }
 0x3c1   : > { %2727 = vrot.lane.b32.xlu1 %v6008_v7, %s4361_s29  ;;  %2725 = vrot.lane.b32.xlu0 %v6011_v31, %s4361_s29 }
 0x3c5   : > { %2731 = vrot.lane.b32.xlu1 %v6035_v41, %s4361_s29  ;;  %2729 = vrot.lane.b32.xlu0 %v6038_v44, %s4361_s29 }
 0x3c7   : > { %v2422_v21 = vpop.permute.xlu1 %2421  ;;  %v2420_v48 = vpop.permute.xlu0 %2419 }
 0x3c8   : > { %2492 = vst.msk [vmem:[#allocation2 + $0xc8] sm:$0xff] %vm638_vm3, %v2422_v21  ;;  %2491 = vst.msk [vmem:[#allocation2 + $0xc0] sm:$0xff] %vm638_vm3, %v2420_v48 }
 0x3c9   : > { %2735 = vrot.lane.b32.xlu1 %v6061_v38, %s4361_s29  ;;  %2733 = vrot.lane.b32.xlu0 %v6064_v40, %s4361_s29 }
 0x3cd   : > { %2739 = vrot.lane.b32.xlu1 %v6086_v55, %s4361_s29  ;;  %2737 = vrot.lane.b32.xlu0 %v6089_v10, %s4361_s29 }
 0x3cf   : > { %v2426_v63 = vpop.permute.xlu1 %2425  ;;  %v2424_v43 = vpop.permute.xlu0 %2423 }
 0x3d0   : > { %2494 = vst.msk [vmem:[#allocation2 + $0xd8] sm:$0xff] %vm638_vm3, %v2426_v63  ;;  %2493 = vst.msk [vmem:[#allocation2 + $0xd0] sm:$0xff] %vm638_vm3, %v2424_v43  ;;  %v6591_v63 = vld [vmem:[#allocation3 + $0x188] sm:$0xff]  ;;  %v6593_v43 = vld [vmem:[#allocation3 + $0x180] sm:$0xff] }
 0x3d1   : > { %2743 = vrot.lane.b32.xlu1 %v6111_v37, %s4361_s29  ;;  %2741 = vrot.lane.b32.xlu0 %v6114_v46, %s4361_s29 }
 0x3d5   : > { %2747 = vrot.lane.b32.xlu1 %v6138_v3, %s4361_s29  ;;  %2745 = vrot.lane.b32.xlu0 %v6141_v15, %s4361_s29 }
 0x3d7   : > { %v2430_v30 = vpop.permute.xlu1 %2429  ;;  %v2428_v23 = vpop.permute.xlu0 %2427 }
 0x3d8   : > { %2496 = vst.msk [vmem:[#allocation2 + $0xe8] sm:$0xff] %vm638_vm3, %v2430_v30  ;;  %2495 = vst.msk [vmem:[#allocation2 + $0xe0] sm:$0xff] %vm638_vm3, %v2428_v23 }
 0x3d9   : > { %2751 = vrot.lane.b32.xlu1 %v6165_v59, %s4361_s29  ;;  %2749 = vrot.lane.b32.xlu0 %v6168_v8, %s4361_s29 }
 0x3dd   : > { %2755 = vrot.lane.b32.xlu1 %v6192_v28, %s4361_s29  ;;  %2753 = vrot.lane.b32.xlu0 %v6195_v13, %s4361_s29 }
 0x3df   : > { %v2434_v54 = vpop.permute.xlu1 %2433  ;;  %v2432_v34 = vpop.permute.xlu0 %2431 }
 0x3e0   : > { %2498 = vst.msk [vmem:[#allocation2 + $0xf8] sm:$0xff] %vm638_vm3, %v2434_v54  ;;  %2497 = vst.msk [vmem:[#allocation2 + $0xf0] sm:$0xff] %vm638_vm3, %v2432_v34 }
 0x3e1   : > { %2759 = vrot.lane.b32.xlu1 %v6219_v42, %s4361_s29  ;;  %2757 = vrot.lane.b32.xlu0 %v6222_v22, %s4361_s29 }
 0x3e3   : > { %v2582_v33 = vpop.permute.xlu1 %2581  ;;  %v2580_v26 = vpop.permute.xlu0 %2579 }
 0x3e4   : > { %2676 = vst.msk [vmem:[#allocation2 + $0x8] sm:$0xff] %vm848_vm4, %v2582_v33  ;;  %2675 = vst.msk [vmem:[#allocation2] sm:$0xff] %vm848_vm4, %v2580_v26 }
 0x3e5   : > { %2763 = vrot.lane.b32.xlu1 %v6246_v6, %s4361_s29  ;;  %2761 = vrot.lane.b32.xlu0 %v6249_v12, %s4361_s29 }
 0x3e7   : > { %v2586_v21 = vpop.permute.xlu1 %2585  ;;  %v2584_v48 = vpop.permute.xlu0 %2583 }
 0x3e8   : > { %2678 = vst.msk [vmem:[#allocation2 + $0x18] sm:$0xff] %vm848_vm4, %v2586_v21  ;;  %2677 = vst.msk [vmem:[#allocation2 + $0x10] sm:$0xff] %vm848_vm4, %v2584_v48  ;;  %v3533_v21 = vld [vmem:[%s7247_s4] sm:$0xff]  ;;  %v3534_v48 = vld [vmem:[%s7247_s4 + $0x8] sm:$0xff] }
 0x3e9   : > { %2767 = vrot.lane.b32.xlu1 %v6272_v16, %s4361_s29  ;;  %2765 = vrot.lane.b32.xlu0 %v6275_v24, %s4361_s29 }
 0x3eb   : > { %v2590_v30 = vpop.permute.xlu1 %2589  ;;  %v2588_v23 = vpop.permute.xlu0 %2587 }
 0x3ec   : > { %2680 = vst.msk [vmem:[#allocation2 + $0x28] sm:$0xff] %vm848_vm4, %v2590_v30  ;;  %2679 = vst.msk [vmem:[#allocation2 + $0x20] sm:$0xff] %vm848_vm4, %v2588_v23  ;;  %v3535_v23 = vld [vmem:[%s7247_s4 + $0x10] sm:$0xff] }
 0x3ed   : > { %2771 = vrot.lane.b32.xlu1 %v6591_v63, %s4361_s29  ;;  %2769 = vrot.lane.b32.xlu0 %v6593_v43, %s4361_s29 }
 0x3ef   : > { %v2594_v54 = vpop.permute.xlu1 %2593  ;;  %v2592_v34 = vpop.permute.xlu0 %2591 }
 0x3f0   : > { %2682 = vst.msk [vmem:[#allocation2 + $0x38] sm:$0xff] %vm848_vm4, %v2594_v54  ;;  %2681 = vst.msk [vmem:[#allocation2 + $0x30] sm:$0xff] %vm848_vm4, %v2592_v34  ;;  %v3536_v54 = vld [vmem:[%s7247_s4 + $0x18] sm:$0xff] }
 0x3f1   : > { %2845 = vrot.lane.b32.xlu1 %v5914_v57, %s4362_s30  ;;  %2843 = vrot.lane.b32.xlu0 %v5917_v53, %s4362_s30  ;;  %v4317_v57 = vpack.c.bf16 %v3534_v48, %v3533_v21  ;;  %v4321_v34 = vpack.c.bf16 %v3536_v54, %v3535_v23  ;;  %v3537_v21 = vld [vmem:[%s7247_s4 + $0x20] sm:$0xff]  ;;  %v3538_v48 = vld [vmem:[%s7247_s4 + $0x28] sm:$0xff] }
 0x3f2   : > { %v3539_v54 = vld [vmem:[%s7247_s4 + $0x30] sm:$0xff] }
 0x3f3   : > { %v2598_v33 = vpop.permute.xlu1 %2597  ;;  %v2596_v26 = vpop.permute.xlu0 %2595  ;;  %4318 = vmatprep.subr.bf16.mxu1 %v4317_v57 }
 0x3f4   : > { %2684 = vst.msk [vmem:[#allocation2 + $0x48] sm:$0xff] %vm848_vm4, %v2598_v33  ;;  %2683 = vst.msk [vmem:[#allocation2 + $0x40] sm:$0xff] %vm848_vm4, %v2596_v26  ;;  %4320 = vmatpush3.bf16.msra.mxu1 %v4317_v57  ;;  %v7580_v57 = vld [vmem:[#allocation31_spill] sm:$0xff] }
 0x3f5   : > { %2849 = vrot.lane.b32.xlu1 %v5941_v56, %s4362_s30  ;;  %2847 = vrot.lane.b32.xlu0 %v5944_v58, %s4362_s30 }
 0x3f6   : > { %4322 = vmatprep.subr.bf16.mxu1 %v4321_v34 }
 0x3f7   : > { %v2602_v53 = vpop.permute.xlu1 %2601  ;;  %v2600_v30 = vpop.permute.xlu0 %2599 }
 0x3f8   : > { %2686 = vst.msk [vmem:[#allocation2 + $0x58] sm:$0xff] %vm848_vm4, %v2602_v53  ;;  %2685 = vst.msk [vmem:[#allocation2 + $0x50] sm:$0xff] %vm848_vm4, %v2600_v30  ;;  %4324 = vmatpush3.bf16.msra.mxu1 %v4321_v34  ;;  %v4325_v53 = vpack.c.bf16 %v3538_v48, %v3537_v21 }
 0x3f9   : > { %2853 = vrot.lane.b32.xlu1 %v5968_v2, %s4362_s30  ;;  %2851 = vrot.lane.b32.xlu0 %v5971_v0, %s4362_s30 }
 0x3fa   : > { %4326 = vmatprep.subr.bf16.mxu1 %v4325_v53 }
 0x3fb   : > { %v2606_v33 = vpop.permute.xlu1 %2605  ;;  %v2604_v26 = vpop.permute.xlu0 %2603 }
 0x3fc   : > { %2688 = vst.msk [vmem:[#allocation2 + $0x68] sm:$0xff] %vm848_vm4, %v2606_v33  ;;  %2687 = vst.msk [vmem:[#allocation2 + $0x60] sm:$0xff] %vm848_vm4, %v2604_v26  ;;  %4328 = vmatpush3.bf16.msra.mxu1 %v4325_v53 }
 0x3fd   : > { %2976 = vrot.lane.b32.xlu1 %v6311_v25, %s4363_s7  ;;  %2855 = vrot.lane.b32.xlu0 %v7580_v57, %s4362_s30  ;;  %v3540_v25 = vld [vmem:[%s7247_s4 + $0x38] sm:$0xff] }
 0x3fe   : > { %v4329_v34 = vpack.c.bf16 %v3540_v25, %v3539_v54 }
 0x3ff   : > { %v2610_v30 = vpop.permute.xlu1 %2609  ;;  %v2608_v23 = vpop.permute.xlu0 %2607 }
 0x400   : > { %2690 = vst.msk [vmem:[#allocation2 + $0x78] sm:$0xff] %vm848_vm4, %v2610_v30  ;;  %2689 = vst.msk [vmem:[#allocation2 + $0x70] sm:$0xff] %vm848_vm4, %v2608_v23  ;;  %4330 = vmatprep.subr.bf16.mxu1 %v4329_v34 }
 0x401   : > { %3106 = vrot.lane.b32.xlu1 %v5930_v29, %s4364_s8  ;;  %2978 = vrot.lane.b32.xlu0 %v6308_v4, %s4363_s7  ;;  %v3541_v29 = vld [vmem:[%s7247_s4 + $0x40] sm:$0xff] }
 0x402   : > { %4332 = vmatpush3.bf16.msra.mxu1 %v4329_v34 }
 0x403   : > { %v2614_v33 = vpop.permute.xlu1 %2613  ;;  %v2612_v26 = vpop.permute.xlu0 %2611  ;;  %4251 = vmatprep.subr.mxu1 %v3541_v29 }
 0x404   : > { %2692 = vst.msk [vmem:[#allocation2 + $0x88] sm:$0xff] %vm848_vm4, %v2614_v33  ;;  %2691 = vst.msk [vmem:[#allocation2 + $0x80] sm:$0xff] %vm848_vm4, %v2612_v26 }
 0x405   : > { %3240 = vrot.lane.b32.xlu1 %v5944_v58, %s4365_s9  ;;  %3108 = vrot.lane.b32.xlu0 %v5927_v27, %s4364_s8 }
 0x406   : > { %4252 = vmatpush3.msra.mxu1 %v3541_v29 }
 0x407   : > { %v2618_v4 = vpop.permute.xlu1 %2617  ;;  %v2616_v21 = vpop.permute.xlu0 %2615 }
 0x408   : > { %2694 = vst.msk [vmem:[#allocation2 + $0x98] sm:$0xff] %vm848_vm4, %v2618_v4  ;;  %2693 = vst.msk [vmem:[#allocation2 + $0x90] sm:$0xff] %vm848_vm4, %v2616_v21 }
 0x409   : > { %3373 = vrot.lane.b32.xlu1 %v6322_v49, %s4366_s14  ;;  %3242 = vrot.lane.b32.xlu0 %v5941_v56, %s4365_s9 }
 0x40b   : > { %v2622_v58 = vpop.permute.xlu1 %2621  ;;  %v2620_v27 = vpop.permute.xlu0 %2619 }
 0x40c   : > { %2696 = vst.msk [vmem:[#allocation2 + $0xa8] sm:$0xff] %vm848_vm4, %v2622_v58  ;;  %2695 = vst.msk [vmem:[#allocation2 + $0xa0] sm:$0xff] %vm848_vm4, %v2620_v27 }
 0x40d   : > { %3375 = vrot.lane.b32.xlu1 %v6319_v17, %s4366_s14  ;;  %2980 = vrot.lane.b32.xlu0 %v6322_v49, %s4363_s7 }
 0x40f   : > { %v2626_v48 = vpop.permute.xlu1 %2625  ;;  %v2624_v53 = vpop.permute.xlu0 %2623 }
 0x410   : > { %2698 = vst.msk [vmem:[#allocation2 + $0xb8] sm:$0xff] %vm848_vm4, %v2626_v48  ;;  %2697 = vst.msk [vmem:[#allocation2 + $0xb0] sm:$0xff] %vm848_vm4, %v2624_v53  ;;  %v7584_v53 = vld [vmem:[#allocation21_spill] sm:$0xff] }
 0x411   : > { %3110 = vrot.lane.b32.xlu1 %v5957_v32, %s4364_s8  ;;  %2982 = vrot.lane.b32.xlu0 %v6319_v17, %s4363_s7 }
 0x413   : > { %v2630_v56 = vpop.permute.xlu1 %2629  ;;  %v2628_v30 = vpop.permute.xlu0 %2627 }
 0x414   : > { %2700 = vst.msk [vmem:[#allocation2 + $0xc8] sm:$0xff] %vm848_vm4, %v2630_v56  ;;  %2699 = vst.msk [vmem:[#allocation2 + $0xc0] sm:$0xff] %vm848_vm4, %v2628_v30 }
 0x415   : > { %3244 = vrot.lane.b32.xlu1 %v5971_v0, %s4365_s9  ;;  %3112 = vrot.lane.b32.xlu0 %v5954_v14, %s4364_s8 }
 0x417   : > { %v2634_v49 = vpop.permute.xlu1 %2633  ;;  %v2632_v23 = vpop.permute.xlu0 %2631 }
 0x418   : > { %2702 = vst.msk [vmem:[#allocation2 + $0xd8] sm:$0xff] %vm848_vm4, %v2634_v49  ;;  %2701 = vst.msk [vmem:[#allocation2 + $0xd0] sm:$0xff] %vm848_vm4, %v2632_v23  ;;  %v7585_v23 = vld [vmem:[#allocation35_spill] sm:$0xff] }
 0x419   : > { %3377 = vrot.lane.b32.xlu1 %v6337_v9, %s4366_s14  ;;  %3246 = vrot.lane.b32.xlu0 %v5968_v2, %s4365_s9 }
 0x41b   : > { %v2638_v32 = vpop.permute.xlu1 %2637  ;;  %v2636_v17 = vpop.permute.xlu0 %2635 }
 0x41c   : > { %2704 = vst.msk [vmem:[#allocation2 + $0xe8] sm:$0xff] %vm848_vm4, %v2638_v32  ;;  %2703 = vst.msk [vmem:[#allocation2 + $0xe0] sm:$0xff] %vm848_vm4, %v2636_v17 }
 0x41d   : > { %3379 = vrot.lane.b32.xlu1 %v6334_v62, %s4366_s14  ;;  %2984 = vrot.lane.b32.xlu0 %v6337_v9, %s4363_s7 }
 0x41f   : > { %v2642_v14 = vpop.permute.xlu1 %2641  ;;  %v2640_v0 = vpop.permute.xlu0 %2639 }
 0x420   : > { %2706 = vst.msk [vmem:[#allocation2 + $0xf8] sm:$0xff] %vm848_vm4, %v2642_v14  ;;  %2705 = vst.msk [vmem:[#allocation2 + $0xf0] sm:$0xff] %vm848_vm4, %v2640_v0 }
 0x421   : > { %3114 = vrot.lane.b32.xlu1 %v5984_v51, %s4364_s8  ;;  %2986 = vrot.lane.b32.xlu0 %v6334_v62, %s4363_s7  ;;  %v7581_v51 = vld [vmem:[#allocation30_spill] sm:$0xff] }
 0x423   : > { %v2712_v2 = vpop.permute.xlu1 %2711  ;;  %v2710_v54 = vpop.permute.xlu0 %2709 }
 0x424   : > { %2806 = vst.msk [vmem:[#allocation2 + $0x8] sm:$0xff] %vm979_vm5, %v2712_v2  ;;  %2805 = vst.msk [vmem:[#allocation2] sm:$0xff] %vm979_vm5, %v2710_v54 }
 0x425   : > { %3248 = vrot.lane.b32.xlu1 %v7580_v57, %s4365_s9  ;;  %3116 = vrot.lane.b32.xlu0 %v5981_v36, %s4364_s8 }
 0x427   : > { %v2716_v9 = vpop.permute.xlu1 %2715  ;;  %v2714_v25 = vpop.permute.xlu0 %2713 }
 0x428   : > { %2808 = vst.msk [vmem:[#allocation2 + $0x18] sm:$0xff] %vm979_vm5, %v2716_v9  ;;  %2807 = vst.msk [vmem:[#allocation2 + $0x10] sm:$0xff] %vm979_vm5, %v2714_v25  ;;  %v7588_v9 = vld [vmem:[#allocation39_spill] sm:$0xff] }
 0x429   : > { %3381 = vrot.lane.b32.xlu1 %v6348_v52, %s4366_s14  ;;  %3250 = vrot.lane.b32.xlu0 %v7581_v51, %s4365_s9 }
 0x42b   : > { %v2720_v62 = vpop.permute.xlu1 %2719  ;;  %v2718_v34 = vpop.permute.xlu0 %2717 }
 0x42c   : > { %2810 = vst.msk [vmem:[#allocation2 + $0x28] sm:$0xff] %vm979_vm5, %v2720_v62  ;;  %2809 = vst.msk [vmem:[#allocation2 + $0x20] sm:$0xff] %vm979_vm5, %v2718_v34 }
 0x42d   : > { %2988 = vrot.lane.b32.xlu1 %v6348_v52, %s4363_s7  ;;  %2857 = vrot.lane.b32.xlu0 %v7581_v51, %s4362_s30 }
 0x42f   : > { %v2724_v36 = vpop.permute.xlu1 %2723  ;;  %v2722_v57 = vpop.permute.xlu0 %2721 }
 0x430   : > { %2812 = vst.msk [vmem:[#allocation2 + $0x38] sm:$0xff] %vm979_vm5, %v2724_v36  ;;  %2811 = vst.msk [vmem:[#allocation2 + $0x30] sm:$0xff] %vm979_vm5, %v2722_v57  ;;  %v7589_v36 = vld [vmem:[#allocation38_spill] sm:$0xff] }
 0x431   : > { %2990 = vrot.lane.b32.xlu1 %v6345_v35, %s4363_s7  ;;  %3383 = vrot.lane.b32.xlu0 %v6345_v35, %s4366_s14  ;;  %v7582_v35 = vld [vmem:[#allocation33_spill] sm:$0xff] }
 0x433   : > { %v2728_v33 = vpop.permute.xlu1 %2727  ;;  %v2726_v26 = vpop.permute.xlu0 %2725 }
 0x434   : > { %2814 = vst.msk [vmem:[#allocation2 + $0x48] sm:$0xff] %vm979_vm5, %v2728_v33  ;;  %2813 = vst.msk [vmem:[#allocation2 + $0x40] sm:$0xff] %vm979_vm5, %v2726_v26 }
 0x435   : > { %3120 = vrot.lane.b32.xlu1 %v6008_v7, %s4364_s8  ;;  %3118 = vrot.lane.b32.xlu0 %v6011_v31, %s4364_s8  ;;  %v7583_v7 = vld [vmem:[#allocation32_spill] sm:$0xff] }
 0x437   : > { %v2732_v52 = vpop.permute.xlu1 %2731  ;;  %v2730_v29 = vpop.permute.xlu0 %2729 }
 0x438   : > { %2816 = vst.msk [vmem:[#allocation2 + $0x58] sm:$0xff] %vm979_vm5, %v2732_v52  ;;  %2815 = vst.msk [vmem:[#allocation2 + $0x50] sm:$0xff] %vm979_vm5, %v2730_v29 }
 0x439   : > { %2859 = vrot.lane.b32.xlu1 %v7582_v35, %s4362_s30  ;;  %3252 = vrot.lane.b32.xlu0 %v7582_v35, %s4365_s9  ;;  %v7591_v35 = vld [vmem:[#allocation23_spill] sm:$0xff] }
 0x43b   : > { %v2736_v4 = vpop.permute.xlu1 %2735  ;;  %v2734_v21 = vpop.permute.xlu0 %2733 }
 0x43c   : > { %2818 = vst.msk [vmem:[#allocation2 + $0x68] sm:$0xff] %vm979_vm5, %v2736_v4  ;;  %2817 = vst.msk [vmem:[#allocation2 + $0x60] sm:$0xff] %vm979_vm5, %v2734_v21 }
 0x43d   : > { %3385 = vrot.lane.b32.xlu1 %v6363_v50, %s4366_s14  ;;  %3254 = vrot.lane.b32.xlu0 %v7583_v7, %s4365_s9 }
 0x43f   : > { %v2740_v31 = vpop.permute.xlu1 %2739  ;;  %v2738_v58 = vpop.permute.xlu0 %2737 }
 0x440   : > { %2820 = vst.msk [vmem:[#allocation2 + $0x78] sm:$0xff] %vm979_vm5, %v2740_v31  ;;  %2819 = vst.msk [vmem:[#allocation2 + $0x70] sm:$0xff] %vm979_vm5, %v2738_v58  ;;  %v7592_v31 = vld [vmem:[#allocation7_spill] sm:$0xff] }
 0x441   : > { %2992 = vrot.lane.b32.xlu1 %v6363_v50, %s4363_s7  ;;  %2861 = vrot.lane.b32.xlu0 %v7583_v7, %s4362_s30 }
 0x443   : > { %v2744_v27 = vpop.permute.xlu1 %2743  ;;  %v2742_v48 = vpop.permute.xlu0 %2741 }
 0x444   : > { %2822 = vst.msk [vmem:[#allocation2 + $0x88] sm:$0xff] %vm979_vm5, %v2744_v27  ;;  %2821 = vst.msk [vmem:[#allocation2 + $0x80] sm:$0xff] %vm979_vm5, %v2742_v48 }
 0x445   : > { %2994 = vrot.lane.b32.xlu1 %v7584_v53, %s4363_s7  ;;  %3387 = vrot.lane.b32.xlu0 %v7584_v53, %s4366_s14 }
 0x447   : > { %v2748_v56 = vpop.permute.xlu1 %2747  ;;  %v2746_v30 = vpop.permute.xlu0 %2745 }
 0x448   : > { %2824 = vst.msk [vmem:[#allocation2 + $0x98] sm:$0xff] %vm979_vm5, %v2748_v56  ;;  %2823 = vst.msk [vmem:[#allocation2 + $0x90] sm:$0xff] %vm979_vm5, %v2746_v30  ;;  %v7594_v30 = vld [vmem:[#allocation40_spill] sm:$0xff] }
 0x449   : > { %3124 = vrot.lane.b32.xlu1 %v6035_v41, %s4364_s8  ;;  %3122 = vrot.lane.b32.xlu0 %v6038_v44, %s4364_s8  ;;  %v7586_v41 = vld [vmem:[#allocation22_spill] sm:$0xff] }
 0x44a   : > { %v7587_v44 = vld [vmem:[#allocation34_spill] sm:$0xff] }
 0x44b   : > { %v2752_v50 = vpop.permute.xlu1 %2751  ;;  %v2750_v49 = vpop.permute.xlu0 %2749 }
 0x44c   : > { %2826 = vst.msk [vmem:[#allocation2 + $0xa8] sm:$0xff] %vm979_vm5, %v2752_v50  ;;  %2825 = vst.msk [vmem:[#allocation2 + $0xa0] sm:$0xff] %vm979_vm5, %v2750_v49 }
 0x44d   : > { %2863 = vrot.lane.b32.xlu1 %v7585_v23, %s4362_s30  ;;  %3256 = vrot.lane.b32.xlu0 %v7585_v23, %s4365_s9 }
 0x44f   : > { %v2756_v32 = vpop.permute.xlu1 %2755  ;;  %v2754_v17 = vpop.permute.xlu0 %2753 }
 0x450   : > { %2828 = vst.msk [vmem:[#allocation2 + $0xb8] sm:$0xff] %vm979_vm5, %v2756_v32  ;;  %2827 = vst.msk [vmem:[#allocation2 + $0xb0] sm:$0xff] %vm979_vm5, %v2754_v17 }
 0x451   : > { %3389 = vrot.lane.b32.xlu1 %v7586_v41, %s4366_s14  ;;  %3258 = vrot.lane.b32.xlu0 %v7587_v44, %s4365_s9 }
 0x453   : > { %v2760_v14 = vpop.permute.xlu1 %2759  ;;  %v2758_v0 = vpop.permute.xlu0 %2757 }
 0x454   : > { %2830 = vst.msk [vmem:[#allocation2 + $0xc8] sm:$0xff] %vm979_vm5, %v2760_v14  ;;  %2829 = vst.msk [vmem:[#allocation2 + $0xc0] sm:$0xff] %vm979_vm5, %v2758_v0 }
 0x455   : > { %2996 = vrot.lane.b32.xlu1 %v7586_v41, %s4363_s7  ;;  %2865 = vrot.lane.b32.xlu0 %v7587_v44, %s4362_s30  ;;  %v7595_v41 = vld [vmem:[#allocation9_spill] sm:$0xff] }
 0x457   : > { %v2764_v2 = vpop.permute.xlu1 %2763  ;;  %v2762_v54 = vpop.permute.xlu0 %2761 }
 0x458   : > { %2832 = vst.msk [vmem:[#allocation2 + $0xd8] sm:$0xff] %vm979_vm5, %v2764_v2  ;;  %2831 = vst.msk [vmem:[#allocation2 + $0xd0] sm:$0xff] %vm979_vm5, %v2762_v54 }
 0x459   : > { %2998 = vrot.lane.b32.xlu1 %v7588_v9, %s4363_s7  ;;  %3391 = vrot.lane.b32.xlu0 %v7588_v9, %s4366_s14 }
 0x45b   : > { %v2768_v25 = vpop.permute.xlu1 %2767  ;;  %v2766_v51 = vpop.permute.xlu0 %2765 }
 0x45c   : > { %2834 = vst.msk [vmem:[#allocation2 + $0xe8] sm:$0xff] %vm979_vm5, %v2768_v25  ;;  %2833 = vst.msk [vmem:[#allocation2 + $0xe0] sm:$0xff] %vm979_vm5, %v2766_v51  ;;  %v7597_v25 = vld [vmem:[#allocation41_spill] sm:$0xff] }
 0x45d   : > { %3128 = vrot.lane.b32.xlu1 %v6061_v38, %s4364_s8  ;;  %3126 = vrot.lane.b32.xlu0 %v6064_v40, %s4364_s8  ;;  %v7590_v38 = vld [vmem:[#allocation36_spill] sm:$0xff] }
 0x45f   : > { %v2772_v62 = vpop.permute.xlu1 %2771  ;;  %v2770_v34 = vpop.permute.xlu0 %2769 }
 0x460   : > { %2836 = vst.msk [vmem:[#allocation2 + $0xf8] sm:$0xff] %vm979_vm5, %v2772_v62  ;;  %2835 = vst.msk [vmem:[#allocation2 + $0xf0] sm:$0xff] %vm979_vm5, %v2770_v34 }
 0x461   : > { %2867 = vrot.lane.b32.xlu1 %v7589_v36, %s4362_s30  ;;  %3260 = vrot.lane.b32.xlu0 %v7589_v36, %s4365_s9 }
 0x463   : > { %v2846_v57 = vpop.permute.xlu1 %2845  ;;  %v2844_v33 = vpop.permute.xlu0 %2843 }
 0x464   : > { %2940 = vst.msk [vmem:[#allocation2 + $0x8] sm:$0xff] %vm1114_vm6, %v2846_v57  ;;  %2939 = vst.msk [vmem:[#allocation2] sm:$0xff] %vm1114_vm6, %v2844_v33  ;;  %v7598_v57 = vld [vmem:[#allocation11_spill] sm:$0xff] }
 0x465   : > { %3393 = vrot.lane.b32.xlu1 %v6389_v47, %s4366_s14  ;;  %3262 = vrot.lane.b32.xlu0 %v7590_v38, %s4365_s9 }
 0x467   : > { %v2850_v40 = vpop.permute.xlu1 %2849  ;;  %v2848_v26 = vpop.permute.xlu0 %2847 }
 0x468   : > { %2942 = vst.msk [vmem:[#allocation2 + $0x18] sm:$0xff] %vm1114_vm6, %v2850_v40  ;;  %2941 = vst.msk [vmem:[#allocation2 + $0x10] sm:$0xff] %vm1114_vm6, %v2848_v26 }
 0x469   : > { %3000 = vrot.lane.b32.xlu1 %v6389_v47, %s4363_s7  ;;  %2869 = vrot.lane.b32.xlu0 %v7590_v38, %s4362_s30 }
 0x46b   : > { %v2854_v52 = vpop.permute.xlu1 %2853  ;;  %v2852_v29 = vpop.permute.xlu0 %2851 }
 0x46c   : > { %2944 = vst.msk [vmem:[#allocation2 + $0x28] sm:$0xff] %vm1114_vm6, %v2854_v52  ;;  %2943 = vst.msk [vmem:[#allocation2 + $0x20] sm:$0xff] %vm1114_vm6, %v2852_v29 }
 0x46d   : > { %3002 = vrot.lane.b32.xlu1 %v7591_v35, %s4363_s7  ;;  %3395 = vrot.lane.b32.xlu0 %v7591_v35, %s4366_s14  ;;  %v7600_v35 = vld [vmem:[#allocation24_spill] sm:$0xff] }
 0x46f   : > { %v2977_v4 = vpop.permute.xlu1 %2976  ;;  %v2856_v21 = vpop.permute.xlu0 %2855 }
 0x470   : > { %3072 = vst.msk [vmem:[#allocation2] sm:$0xff] %vm1248_vm7, %v2977_v4 }
 0x471   : > { %2945 = vst.msk [vmem:[#allocation2 + $0x30] sm:$0xff] %vm1114_vm6, %v2856_v21  ;;  %3132 = vrot.lane.b32.xlu1 %v6086_v55, %s4364_s8  ;;  %3130 = vrot.lane.b32.xlu0 %v6089_v10, %s4364_s8  ;;  %v7593_v55 = vld [vmem:[#allocation6_spill] sm:$0xff] }
 0x473   : > { %v3107_v47 = vpop.permute.xlu1 %3106  ;;  %v2979_v7 = vpop.permute.xlu0 %2978 }
 0x474   : > { %3202 = vst.msk [vmem:[#allocation2] sm:$0xff] %vm1379_vm8, %v3107_v47 }
 0x475   : > { %3073 = vst.msk [vmem:[#allocation2 + $0x8] sm:$0xff] %vm1248_vm7, %v2979_v7  ;;  %2871 = vrot.lane.b32.xlu1 %v7592_v31, %s4362_s30  ;;  %3264 = vrot.lane.b32.xlu0 %v7592_v31, %s4365_s9  ;;  %v7601_v31 = vld [vmem:[#allocation13_spill] sm:$0xff] }
 0x477   : > { %v3241_v58 = vpop.permute.xlu1 %3240  ;;  %v3109_v27 = vpop.permute.xlu0 %3108 }
 0x478   : > { %3336 = vst.msk [vmem:[#allocation2] sm:$0xff] %vm1514_vm9, %v3241_v58 }
 0x479   : > { %3203 = vst.msk [vmem:[#allocation2 + $0x8] sm:$0xff] %vm1379_vm8, %v3109_v27  ;;  %3397 = vrot.lane.b32.xlu1 %v6402_v11, %s4366_s14  ;;  %3266 = vrot.lane.b32.xlu0 %v7593_v55, %s4365_s9 }
 0x47b   : > { %v3374_v10 = vpop.permute.xlu1 %3373  ;;  %v3243_v48 = vpop.permute.xlu0 %3242 }
 0x47c   : > { %3469 = vst.msk [vmem:[#allocation2] sm:$0xff] %vm1648_vm10, %v3374_v10 }
 0x47d   : > { %3337 = vst.msk [vmem:[#allocation2 + $0x8] sm:$0xff] %vm1514_vm9, %v3243_v48  ;;  %3004 = vrot.lane.b32.xlu1 %v6402_v11, %s4363_s7  ;;  %2873 = vrot.lane.b32.xlu0 %v7593_v55, %s4362_s30 }
 0x47f   : > { %v3376_v53 = vpop.permute.xlu1 %3375  ;;  %v2981_v56 = vpop.permute.xlu0 %2980 }
 0x480   : > { %3470 = vst.msk [vmem:[#allocation2 + $0x8] sm:$0xff] %vm1648_vm10, %v3376_v53 }
 0x481   : > { %3074 = vst.msk [vmem:[#allocation2 + $0x10] sm:$0xff] %vm1248_vm7, %v2981_v56  ;;  %3006 = vrot.lane.b32.xlu1 %v7594_v30, %s4363_s7  ;;  %3399 = vrot.lane.b32.xlu0 %v7594_v30, %s4366_s14  ;;  %v7603_v56 = vld [vmem:[#allocation25_spill] sm:$0xff] }
 0x483   : > { %v3111_v50 = vpop.permute.xlu1 %3110  ;;  %v2983_v49 = vpop.permute.xlu0 %2982  ;;  %v3501_v23 = vld [vmem:[#allocation2] sm:$0xff] }
 0x484   : > { %3204 = vst.msk [vmem:[#allocation2 + $0x10] sm:$0xff] %vm1379_vm8, %v3111_v50  ;;  %4253 = vmatprep.mubr.msk.f32.mxu1 %vm1729_vm11, %v3501_v23 }
 0x485   : > { %3075 = vst.msk [vmem:[#allocation2 + $0x18] sm:$0xff] %vm1248_vm7, %v2983_v49  ;;  %3136 = vrot.lane.b32.xlu1 %v6111_v37, %s4364_s8  ;;  %3134 = vrot.lane.b32.xlu0 %v6114_v46, %s4364_s8  ;;  %v7596_v46 = vld [vmem:[#allocation8_spill] sm:$0xff] }
 0x487   : > { %v3245_v11 = vpop.permute.xlu1 %3244  ;;  %v3113_v32 = vpop.permute.xlu0 %3112  ;;  %v3502_v17 = vld [vmem:[#allocation2 + $0x8] sm:$0xff] }
 0x488   : > { %3338 = vst.msk [vmem:[#allocation2 + $0x10] sm:$0xff] %vm1514_vm9, %v3245_v11  ;;  %4254 = vmatmul.mubr.msk.f32.vlgmr.msra.gmra.mrb[0].mxu1 %vm1729_vm11, %v3502_v17  ;;  %v7604_v11 = vld [vmem:[#allocation15_spill] sm:$0xff] }
 0x489   : > { %3205 = vst.msk [vmem:[#allocation2 + $0x18] sm:$0xff] %vm1379_vm8, %v3113_v32  ;;  %2875 = vrot.lane.b32.xlu1 %v7595_v41, %s4362_s30  ;;  %3268 = vrot.lane.b32.xlu0 %v7595_v41, %s4365_s9 }
 0x48b   : > { %v3378_v44 = vpop.permute.xlu1 %3377  ;;  %v3247_v37 = vpop.permute.xlu0 %3246 }
 0x48c   : > { %3471 = vst.msk [vmem:[#allocation2 + $0x10] sm:$0xff] %vm1648_vm10, %v3378_v44 }
 0x48d   : > { %3339 = vst.msk [vmem:[#allocation2 + $0x18] sm:$0xff] %vm1514_vm9, %v3247_v37  ;;  %3401 = vrot.lane.b32.xlu1 %v6419_v18, %s4366_s14  ;;  %3270 = vrot.lane.b32.xlu0 %v7596_v46, %s4365_s9 }
 0x48f   : > { %v3380_v14 = vpop.permute.xlu1 %3379  ;;  %v2985_v0 = vpop.permute.xlu0 %2984 }
 0x490   : > { %3472 = vst.msk [vmem:[#allocation2 + $0x18] sm:$0xff] %vm1648_vm10, %v3380_v14  ;;  %v7606_v14 = vld [vmem:[#allocation42_spill] sm:$0xff] }
 0x491   : > { %3076 = vst.msk [vmem:[#allocation2 + $0x20] sm:$0xff] %vm1248_vm7, %v2985_v0  ;;  %3008 = vrot.lane.b32.xlu1 %v6419_v18, %s4363_s7  ;;  %2877 = vrot.lane.b32.xlu0 %v7596_v46, %s4362_s30 }
 0x493   : > { %v3115_v2 = vpop.permute.xlu1 %3114  ;;  %v2987_v54 = vpop.permute.xlu0 %2986  ;;  %v3503_v9 = vld [vmem:[#allocation2 + $0x10] sm:$0xff] }
 0x494   : > { %3206 = vst.msk [vmem:[#allocation2 + $0x20] sm:$0xff] %vm1379_vm8, %v3115_v2  ;;  %4256 = vmatprep.mubr.msk.f32.mxu1 %vm1729_vm11, %v3503_v9 }
 0x495   : > { %3077 = vst.msk [vmem:[#allocation2 + $0x28] sm:$0xff] %vm1248_vm7, %v2987_v54  ;;  %3010 = vrot.lane.b32.xlu1 %v7597_v25, %s4363_s7  ;;  %3403 = vrot.lane.b32.xlu0 %v7597_v25, %s4366_s14  ;;  %v7607_v25 = vld [vmem:[#allocation17_spill] sm:$0xff] }
 0x497   : > { %v3249_v51 = vpop.permute.xlu1 %3248  ;;  %v3117_v18 = vpop.permute.xlu0 %3116  ;;  %v3504_v62 = vld [vmem:[#allocation2 + $0x18] sm:$0xff] }
 0x498   : > { %3340 = vst.msk [vmem:[#allocation2 + $0x20] sm:$0xff] %vm1514_vm9, %v3249_v51  ;;  %4257 = vmatmul.mubr.msk.f32.gmra.mrb[2].mxu1 %vm1729_vm11, %v3504_v62 }
 0x499   : > { %3207 = vst.msk [vmem:[#allocation2 + $0x28] sm:$0xff] %vm1379_vm8, %v3117_v18  ;;  %3140 = vrot.lane.b32.xlu1 %v6138_v3, %s4364_s8  ;;  %3138 = vrot.lane.b32.xlu0 %v6141_v15, %s4364_s8  ;;  %v7599_v3 = vld [vmem:[#allocation10_spill] sm:$0xff] }
 0x49b   : > { %v3382_v34 = vpop.permute.xlu1 %3381  ;;  %v3251_v36 = vpop.permute.xlu0 %3250 }
 0x49c   : > { %3473 = vst.msk [vmem:[#allocation2 + $0x20] sm:$0xff] %vm1648_vm10, %v3382_v34 }
 0x49d   : > { %3341 = vst.msk [vmem:[#allocation2 + $0x28] sm:$0xff] %vm1514_vm9, %v3251_v36  ;;  %2879 = vrot.lane.b32.xlu1 %v7598_v57, %s4362_s30  ;;  %3272 = vrot.lane.b32.xlu0 %v7598_v57, %s4365_s9 }
 0x49f   : > { %v2989_v33 = vpop.permute.xlu1 %2988  ;;  %v2858_v38 = vpop.permute.xlu0 %2857 }
 0x4a0   : > { %3078 = vst.msk [vmem:[#allocation2 + $0x30] sm:$0xff] %vm1248_vm7, %v2989_v33  ;;  %v7609_v33 = vld [vmem:[#allocation43_spill] sm:$0xff] }
 0x4a1   : > { %2946 = vst.msk [vmem:[#allocation2 + $0x38] sm:$0xff] %vm1114_vm6, %v2858_v38  ;;  %3405 = vrot.lane.b32.xlu1 %v6432_v45, %s4366_s14  ;;  %3274 = vrot.lane.b32.xlu0 %v7599_v3, %s4365_s9 }
 0x4a3   : > { %v2991_v15 = vpop.permute.xlu1 %2990  ;;  %v3384_v40 = vpop.permute.xlu0 %3383  ;;  %v3505_v26 = vld [vmem:[#allocation2 + $0x20] sm:$0xff] }
 0x4a4   : > { %3079 = vst.msk [vmem:[#allocation2 + $0x38] sm:$0xff] %vm1248_vm7, %v2991_v15  ;;  %4259 = vmatprep.mubr.msk.f32.mxu1 %vm1729_vm11, %v3505_v26  ;;  %v7610_v26 = vld [vmem:[#allocation19_spill] sm:$0xff] }
 0x4a5   : > { %3474 = vst.msk [vmem:[#allocation2 + $0x28] sm:$0xff] %vm1648_vm10, %v3384_v40  ;;  %3012 = vrot.lane.b32.xlu1 %v6432_v45, %s4363_s7  ;;  %2881 = vrot.lane.b32.xlu0 %v7599_v3, %s4362_s30 }
 0x4a7   : > { %v3121_v52 = vpop.permute.xlu1 %3120  ;;  %v3119_v29 = vpop.permute.xlu0 %3118 }
 0x4a8   : > { %3209 = vst.msk [vmem:[#allocation2 + $0x38] sm:$0xff] %vm1379_vm8, %v3121_v52  ;;  %3208 = vst.msk [vmem:[#allocation2 + $0x30] sm:$0xff] %vm1379_vm8, %v3119_v29 }
 0x4a9   : > { %3014 = vrot.lane.b32.xlu1 %v7600_v35, %s4363_s7  ;;  %3407 = vrot.lane.b32.xlu0 %v7600_v35, %s4366_s14 }
 0x4ab   : > { %v2860_v4 = vpop.permute.xlu1 %2859  ;;  %v3253_v21 = vpop.permute.xlu0 %3252 }
 0x4ac   : > { %v3506_v47 = vld [vmem:[#allocation2 + $0x28] sm:$0xff]  ;;  %2947 = vst.msk [vmem:[#allocation2 + $0x40] sm:$0xff] %vm1114_vm6, %v2860_v4 }
 0x4ad   : > { %3342 = vst.msk [vmem:[#allocation2 + $0x30] sm:$0xff] %vm1514_vm9, %v3253_v21  ;;  %4260 = vmatmul.mubr.msk.f32.gmra.mrb[4].mxu1 %vm1729_vm11, %v3506_v47  ;;  %3144 = vrot.lane.b32.xlu1 %v6165_v59, %s4364_s8  ;;  %v7602_v59 = vld [vmem:[#allocation12_spill] sm:$0xff] }
 0x4ae   : > { %3142 = vrot.lane.b32.xlu0 %v6168_v8, %s4364_s8 }
 0x4af   : > { %v3386_v45 = vpop.permute.xlu1 %3385  ;;  %v3255_v7 = vpop.permute.xlu0 %3254 }
 0x4b0   : > { %3475 = vst.msk [vmem:[#allocation2 + $0x30] sm:$0xff] %vm1648_vm10, %v3386_v45 }
 0x4b1   : > { %3343 = vst.msk [vmem:[#allocation2 + $0x38] sm:$0xff] %vm1514_vm9, %v3255_v7  ;;  %2883 = vrot.lane.b32.xlu1 %v7601_v31, %s4362_s30 }
 0x4b2   : > { %3276 = vrot.lane.b32.xlu0 %v7601_v31, %s4365_s9 }
 0x4b3   : > { %v2993_v58 = vpop.permute.xlu1 %2992  ;;  %v2862_v27 = vpop.permute.xlu0 %2861 }
 0x4b4   : > { %3080 = vst.msk [vmem:[#allocation2 + $0x40] sm:$0xff] %vm1248_vm7, %v2993_v58 }
 0x4b5   : > { %2948 = vst.msk [vmem:[#allocation2 + $0x48] sm:$0xff] %vm1114_vm6, %v2862_v27  ;;  %3409 = vrot.lane.b32.xlu1 %v6449_v60, %s4366_s14 }
 0x4b6   : > { %3278 = vrot.lane.b32.xlu0 %v7602_v59, %s4365_s9 }
 0x4b7   : > { %v2995_v8 = vpop.permute.xlu1 %2994  ;;  %v3388_v55 = vpop.permute.xlu0 %3387  ;;  %v3507_v10 = vld [vmem:[#allocation2 + $0x30] sm:$0xff] }
 0x4b8   : > { %3081 = vst.msk [vmem:[#allocation2 + $0x48] sm:$0xff] %vm1248_vm7, %v2995_v8  ;;  %4262 = vmatprep.mubr.msk.f32.mxu1 %vm1729_vm11, %v3507_v10 }
 0x4b9   : > { %3476 = vst.msk [vmem:[#allocation2 + $0x38] sm:$0xff] %vm1648_vm10, %v3388_v55  ;;  %3016 = vrot.lane.b32.xlu1 %v6449_v60, %s4363_s7 }
 0x4ba   : > { %2885 = vrot.lane.b32.xlu0 %v7602_v59, %s4362_s30 }
 0x4bb   : > { %v3125_v48 = vpop.permute.xlu1 %3124  ;;  %v3123_v53 = vpop.permute.xlu0 %3122 }
 0x4bc   : > { %3211 = vst.msk [vmem:[#allocation2 + $0x48] sm:$0xff] %vm1379_vm8, %v3125_v48  ;;  %3210 = vst.msk [vmem:[#allocation2 + $0x40] sm:$0xff] %vm1379_vm8, %v3123_v53 }
 0x4bd   : > { %3018 = vrot.lane.b32.xlu1 %v7603_v56, %s4363_s7 }
 0x4be   : > { %3411 = vrot.lane.b32.xlu0 %v7603_v56, %s4366_s14 }
 0x4bf   : > { %v2864_v30 = vpop.permute.xlu1 %2863  ;;  %v3257_v50 = vpop.permute.xlu0 %3256 }
 0x4c0   : > { %v3508_v49 = vld [vmem:[#allocation2 + $0x38] sm:$0xff]  ;;  %2949 = vst.msk [vmem:[#allocation2 + $0x50] sm:$0xff] %vm1114_vm6, %v2864_v30 }
 0x4c1   : > { %3344 = vst.msk [vmem:[#allocation2 + $0x40] sm:$0xff] %vm1514_vm9, %v3257_v50  ;;  %4263 = vmatmul.mubr.msk.f32.gmra.mrb[6].mxu1 %vm1729_vm11, %v3508_v49  ;;  %3148 = vrot.lane.b32.xlu1 %v6192_v28, %s4364_s8  ;;  %v7605_v28 = vld [vmem:[#allocation14_spill] sm:$0xff]  ;;  %v2838_v50 = vrot.slane %v6593_v43, 1 }
 0x4c2   : > { %3146 = vrot.lane.b32.xlu0 %v6195_v13, %s4364_s8 }
 0x4c3   : > { %v3390_v60 = vpop.permute.xlu1 %3389  ;;  %v3259_v23 = vpop.permute.xlu0 %3258 }
 0x4c4   : > { %3477 = vst.msk [vmem:[#allocation2 + $0x40] sm:$0xff] %vm1648_vm10, %v3390_v60 }
 0x4c5   : > { %3345 = vst.msk [vmem:[#allocation2 + $0x48] sm:$0xff] %vm1514_vm9, %v3259_v23  ;;  %2887 = vrot.lane.b32.xlu1 %v7604_v11, %s4362_s30  ;;  %v2972_v23 = vrot.slane %v6591_v63, 2 }
 0x4c6   : > { %3280 = vrot.lane.b32.xlu0 %v7604_v11, %s4365_s9  ;;  %v2971_v11 = vrot.slane %v6593_v43, 2 }
 0x4c7   : > { %v2997_v32 = vpop.permute.xlu1 %2996  ;;  %v2866_v17 = vpop.permute.xlu0 %2865 }
 0x4c8   : > { %3082 = vst.msk [vmem:[#allocation2 + $0x50] sm:$0xff] %vm1248_vm7, %v2997_v32 }
 0x4c9   : > { %2950 = vst.msk [vmem:[#allocation2 + $0x58] sm:$0xff] %vm1114_vm6, %v2866_v17  ;;  %3413 = vrot.lane.b32.xlu1 %v6462_v39, %s4366_s14 }
 0x4ca   : > { %3282 = vrot.lane.b32.xlu0 %v7605_v28, %s4365_s9 }
 0x4cb   : > { %v2999_v13 = vpop.permute.xlu1 %2998  ;;  %v3392_v41 = vpop.permute.xlu0 %3391  ;;  %v3509_v44 = vld [vmem:[#allocation2 + $0x40] sm:$0xff] }
 0x4cc   : > { %3083 = vst.msk [vmem:[#allocation2 + $0x58] sm:$0xff] %vm1248_vm7, %v2999_v13  ;;  %4265 = vmatprep.mubr.msk.f32.mxu1 %vm1729_vm11, %v3509_v44 }
 0x4cd   : > { %3478 = vst.msk [vmem:[#allocation2 + $0x48] sm:$0xff] %vm1648_vm10, %v3392_v41  ;;  %3020 = vrot.lane.b32.xlu1 %v6462_v39, %s4363_s7 }
 0x4ce   : > { %2889 = vrot.lane.b32.xlu0 %v7605_v28, %s4362_s30 }
 0x4cf   : > { %v3129_v37 = vpop.permute.xlu1 %3128  ;;  %v3127_v46 = vpop.permute.xlu0 %3126 }
 0x4d0   : > { %3213 = vst.msk [vmem:[#allocation2 + $0x58] sm:$0xff] %vm1379_vm8, %v3129_v37  ;;  %3212 = vst.msk [vmem:[#allocation2 + $0x50] sm:$0xff] %vm1379_vm8, %v3127_v46 }
 0x4d1   : > { %3022 = vrot.lane.b32.xlu1 %v7606_v14, %s4363_s7 }
 0x4d2   : > { %3415 = vrot.lane.b32.xlu0 %v7606_v14, %s4366_s14 }
 0x4d3   : > { %v2868_v0 = vpop.permute.xlu1 %2867  ;;  %v3261_v2 = vpop.permute.xlu0 %3260 }
 0x4d4   : > { %v3510_v54 = vld [vmem:[#allocation2 + $0x48] sm:$0xff]  ;;  %2951 = vst.msk [vmem:[#allocation2 + $0x60] sm:$0xff] %vm1114_vm6, %v2868_v0 }
 0x4d5   : > { %3346 = vst.msk [vmem:[#allocation2 + $0x50] sm:$0xff] %vm1514_vm9, %v3261_v2  ;;  %4266 = vmatmul.mubr.msk.f32.gmra.mrb[8].mxu1 %vm1729_vm11, %v3510_v54  ;;  %3152 = vrot.lane.b32.xlu1 %v6219_v42, %s4364_s8  ;;  %v7608_v42 = vld [vmem:[#allocation16_spill] sm:$0xff]  ;;  %v2208_v2 = vld [vmem:[#allocation3 + $0x198] sm:$0xff]  ;;  %v2209_v54 = vld [vmem:[#allocation3 + $0x1a0] sm:$0xff] }
 0x4d6   : > { %3150 = vrot.lane.b32.xlu0 %v6222_v22, %s4364_s8 }
 0x4d7   : > { %v3394_v39 = vpop.permute.xlu1 %3393  ;;  %v3263_v9 = vpop.permute.xlu0 %3262 }
 0x4d8   : > { %3479 = vst.msk [vmem:[#allocation2 + $0x50] sm:$0xff] %vm1648_vm10, %v3394_v39  ;;  %v2210_v39 = vld [vmem:[#allocation3 + $0x1a8] sm:$0x3] }
 0x4d9   : > { %3347 = vst.msk [vmem:[#allocation2 + $0x58] sm:$0xff] %vm1514_vm9, %v3263_v9  ;;  %2891 = vrot.lane.b32.xlu1 %v7607_v25, %s4362_s30 }
 0x4da   : > { %3284 = vrot.lane.b32.xlu0 %v7607_v25, %s4365_s9  ;;  %v3235_v25 = vrot.slane %v2208_v2, 1 }
 0x4db   : > { %v3001_v51 = vpop.permute.xlu1 %3000  ;;  %v2870_v18 = vpop.permute.xlu0 %2869 }
 0x4dc   : > { %3084 = vst.msk [vmem:[#allocation2 + $0x60] sm:$0xff] %vm1248_vm7, %v3001_v51  ;;  %v3236_v51 = vrot.slane %v2209_v54, 1 }
 0x4dd   : > { %2952 = vst.msk [vmem:[#allocation2 + $0x68] sm:$0xff] %vm1114_vm6, %v2870_v18  ;;  %3417 = vrot.lane.b32.xlu1 %v6479_v20, %s4366_s14  ;;  %v3238_v18 = vrot.slane %v2210_v39, 1 }
 0x4de   : > { %3286 = vrot.lane.b32.xlu0 %v7608_v42, %s4365_s9 }
 0x4df   : > { %v3003_v22 = vpop.permute.xlu1 %3002  ;;  %v3396_v62 = vpop.permute.xlu0 %3395  ;;  %v3511_v34 = vld [vmem:[#allocation2 + $0x50] sm:$0xff] }
 0x4e0   : > { %3085 = vst.msk [vmem:[#allocation2 + $0x68] sm:$0xff] %vm1248_vm7, %v3003_v22  ;;  %4268 = vmatprep.mubr.msk.f32.mxu1 %vm1729_vm11, %v3511_v34  ;;  %v3368_v34 = vrot.slane %v2208_v2, 2 }
 0x4e1   : > { %3480 = vst.msk [vmem:[#allocation2 + $0x58] sm:$0xff] %vm1648_vm10, %v3396_v62  ;;  %3024 = vrot.lane.b32.xlu1 %v6479_v20, %s4363_s7 }
 0x4e2   : > { %2893 = vrot.lane.b32.xlu0 %v7608_v42, %s4362_s30 }
 0x4e3   : > { %v3133_v36 = vpop.permute.xlu1 %3132  ;;  %v3131_v57 = vpop.permute.xlu0 %3130 }
 0x4e4   : > { %3215 = vst.msk [vmem:[#allocation2 + $0x68] sm:$0xff] %vm1379_vm8, %v3133_v36  ;;  %3214 = vst.msk [vmem:[#allocation2 + $0x60] sm:$0xff] %vm1379_vm8, %v3131_v57  ;;  %v3369_v36 = vrot.slane %v2209_v54, 2  ;;  %v3237_v57 = vsel %vm461_vm0, %v3235_v25, %v3236_v51 }
 0x4e5   : > { %3026 = vrot.lane.b32.xlu1 %v7609_v33, %s4363_s7 }
 0x4e6   : > { %3419 = vrot.lane.b32.xlu0 %v7609_v33, %s4366_s14  ;;  %v3239_v33 = vsel %vm461_vm0, %v3236_v51, %v3238_v18 }
 0x4e7   : > { %v2872_v38 = vpop.permute.xlu1 %2871  ;;  %v3265_v3 = vpop.permute.xlu0 %3264 }
 0x4e8   : > { %v3512_v15 = vld [vmem:[#allocation2 + $0x58] sm:$0xff]  ;;  %2953 = vst.msk [vmem:[#allocation2 + $0x70] sm:$0xff] %vm1114_vm6, %v2872_v38  ;;  %v3371_v38 = vrot.slane %v2210_v39, 2 }
 0x4e9   : > { %3348 = vst.msk [vmem:[#allocation2 + $0x60] sm:$0xff] %vm1514_vm9, %v3265_v3  ;;  %4269 = vmatmul.mubr.msk.f32.gmra.mrb[10].mxu1 %vm1729_vm11, %v3512_v15  ;;  %3156 = vrot.lane.b32.xlu1 %v6246_v6, %s4364_s8  ;;  %v7611_v6 = vld [vmem:[#allocation18_spill] sm:$0xff] }
 0x4ea   : > { %3154 = vrot.lane.b32.xlu0 %v6249_v12, %s4364_s8 }
 0x4eb   : > { %v3398_v20 = vpop.permute.xlu1 %3397  ;;  %v3267_v40 = vpop.permute.xlu0 %3266 }
 0x4ec   : > { %3481 = vst.msk [vmem:[#allocation2 + $0x60] sm:$0xff] %vm1648_vm10, %v3398_v20  ;;  %v3370_v20 = vsel %vm671_vm2, %v3368_v34, %v3369_v36 }
 0x4ed   : > { %3349 = vst.msk [vmem:[#allocation2 + $0x68] sm:$0xff] %vm1514_vm9, %v3267_v40  ;;  %2895 = vrot.lane.b32.xlu1 %v7610_v26, %s4362_s30  ;;  %v3372_v40 = vsel %vm671_vm2, %v3369_v36, %v3371_v38 }
 0x4ee   : > { %3288 = vrot.lane.b32.xlu0 %v7610_v26, %s4365_s9 }
 0x4ef   : > { %v3005_v52 = vpop.permute.xlu1 %3004  ;;  %v2874_v29 = vpop.permute.xlu0 %2873 }
 0x4f0   : > { %3086 = vst.msk [vmem:[#allocation2 + $0x70] sm:$0xff] %vm1248_vm7, %v3005_v52 }
 0x4f1   : > { %2954 = vst.msk [vmem:[#allocation2 + $0x78] sm:$0xff] %vm1114_vm6, %v2874_v29  ;;  %3421 = vrot.lane.b32.xlu1 %v6492_v5, %s4366_s14 }
 0x4f2   : > { %3290 = vrot.lane.b32.xlu0 %v7611_v6, %s4365_s9 }
 0x4f3   : > { %v3007_v12 = vpop.permute.xlu1 %3006  ;;  %v3400_v35 = vpop.permute.xlu0 %3399  ;;  %v3513_v4 = vld [vmem:[#allocation2 + $0x60] sm:$0xff] }
 0x4f4   : > { %3087 = vst.msk [vmem:[#allocation2 + $0x78] sm:$0xff] %vm1248_vm7, %v3007_v12  ;;  %4271 = vmatprep.mubr.msk.f32.mxu1 %vm1729_vm11, %v3513_v4 }
 0x4f5   : > { %3482 = vst.msk [vmem:[#allocation2 + $0x68] sm:$0xff] %vm1648_vm10, %v3400_v35  ;;  %3028 = vrot.lane.b32.xlu1 %v6492_v5, %s4363_s7 }
 0x4f6   : > { %2897 = vrot.lane.b32.xlu0 %v7611_v6, %s4362_s30 }
 0x4f7   : > { %v3137_v21 = vpop.permute.xlu1 %3136  ;;  %v3135_v47 = vpop.permute.xlu0 %3134 }
 0x4f8   : > { %3217 = vst.msk [vmem:[#allocation2 + $0x78] sm:$0xff] %vm1379_vm8, %v3137_v21  ;;  %3216 = vst.msk [vmem:[#allocation2 + $0x70] sm:$0xff] %vm1379_vm8, %v3135_v47 }
 0x4f9   : > { %3030 = vrot.lane.b32.xlu1 %v6487_v1, %s4363_s7 }
 0x4fa   : > { %3423 = vrot.lane.b32.xlu0 %v6487_v1, %s4366_s14  ;;  %v7612_v1 = vld [vmem:[#allocation20_spill] sm:$0xff] }
 0x4fb   : > { %v2876_v45 = vpop.permute.xlu1 %2875  ;;  %v3269_v7 = vpop.permute.xlu0 %3268 }
 0x4fc   : > { %v3514_v31 = vld [vmem:[#allocation2 + $0x68] sm:$0xff]  ;;  %2955 = vst.msk [vmem:[#allocation2 + $0x80] sm:$0xff] %vm1114_vm6, %v2876_v45 }
 0x4fd   : > { %3350 = vst.msk [vmem:[#allocation2 + $0x70] sm:$0xff] %vm1514_vm9, %v3269_v7  ;;  %4272 = vmatmul.mubr.msk.f32.gmra.mrb[12].mxu1 %vm1729_vm11, %v3514_v31  ;;  %3160 = vrot.lane.b32.xlu1 %v6272_v16, %s4364_s8  ;;  %v7613_v16 = vld [vmem:[#allocation37_spill] sm:$0xff] }
 0x4fe   : > { %3158 = vrot.lane.b32.xlu0 %v6275_v24, %s4364_s8 }
 0x4ff   : > { %v3402_v5 = vpop.permute.xlu1 %3401  ;;  %v3271_v58 = vpop.permute.xlu0 %3270 }
 0x500   : > { %3483 = vst.msk [vmem:[#allocation2 + $0x70] sm:$0xff] %vm1648_vm10, %v3402_v5 }
 0x501   : > { %3351 = vst.msk [vmem:[#allocation2 + $0x78] sm:$0xff] %vm1514_vm9, %v3271_v58  ;;  %2899 = vrot.lane.b32.xlu1 %v7612_v1, %s4362_s30 }
 0x502   : > { %3292 = vrot.lane.b32.xlu0 %v7612_v1, %s4365_s9 }
 0x503   : > { %v3009_v27 = vpop.permute.xlu1 %3008  ;;  %v2878_v59 = vpop.permute.xlu0 %2877 }
 0x504   : > { %3088 = vst.msk [vmem:[#allocation2 + $0x80] sm:$0xff] %vm1248_vm7, %v3009_v27 }
 0x505   : > { %2956 = vst.msk [vmem:[#allocation2 + $0x88] sm:$0xff] %vm1114_vm6, %v2878_v59  ;;  %3425 = vrot.lane.b32.xlu1 %v6507_v19, %s4366_s14 }
 0x506   : > { %3294 = vrot.lane.b32.xlu0 %v7613_v16, %s4365_s9 }
 0x507   : > { %v3011_v24 = vpop.permute.xlu1 %3010  ;;  %v3404_v8 = vpop.permute.xlu0 %3403  ;;  %v3515_v55 = vld [vmem:[#allocation2 + $0x70] sm:$0xff] }
 0x508   : > { %3089 = vst.msk [vmem:[#allocation2 + $0x88] sm:$0xff] %vm1248_vm7, %v3011_v24  ;;  %4274 = vmatprep.mubr.msk.f32.mxu1 %vm1729_vm11, %v3515_v55 }
 0x509   : > { %3484 = vst.msk [vmem:[#allocation2 + $0x78] sm:$0xff] %vm1648_vm10, %v3404_v8  ;;  %3032 = vrot.lane.b32.xlu1 %v6507_v19, %s4363_s7  ;;  %v2839_v19 = vrot.slane %v6591_v63, 1 }
 0x50a   : > { %2901 = vrot.lane.b32.xlu0 %v7613_v16, %s4362_s30 }
 0x50b   : > { %v3141_v10 = vpop.permute.xlu1 %3140  ;;  %v3139_v48 = vpop.permute.xlu0 %3138  ;;  %v2840_v32 = vsel %vm461_vm0, %v2838_v50, %v2839_v19 }
 0x50c   : > { %3219 = vst.msk [vmem:[#allocation2 + $0x88] sm:$0xff] %vm1379_vm8, %v3141_v10  ;;  %3218 = vst.msk [vmem:[#allocation2 + $0x80] sm:$0xff] %vm1379_vm8, %v3139_v48 }
 0x50d   : > { %3034 = vrot.lane.b32.xlu1 %v6504_v61, %s4363_s7 }
 0x50e   : > { %3427 = vrot.lane.b32.xlu0 %v6504_v61, %s4366_s14  ;;  %v2207_v61 = vld [vmem:[#allocation3 + $0x190] sm:$0x3] }
 0x50f   : > { %v2880_v53 = vpop.permute.xlu1 %2879  ;;  %v3273_v56 = vpop.permute.xlu0 %3272  ;;  %v2841_v17 = vrot.slane %v2207_v61, 1  ;;  %v2974_v46 = vrot.slane %v2207_v61, 2 }
 0x510   : > { %v3516_v30 = vld [vmem:[#allocation2 + $0x78] sm:$0xff]  ;;  %2957 = vst.msk [vmem:[#allocation2 + $0x90] sm:$0xff] %vm1114_vm6, %v2880_v53 }
 0x511   : > { %3352 = vst.msk [vmem:[#allocation2 + $0x80] sm:$0xff] %vm1514_vm9, %v3273_v56  ;;  %4275 = vmatmul.mubr.msk.f32.gmra.mrb[14].mxu1 %vm1729_vm11, %v3516_v30  ;;  %3164 = vrot.lane.b32.xlu1 %v6591_v63, %s4364_s8  ;;  %v2973_v63 = vsel %vm671_vm2, %v2971_v11, %v2972_v23  ;;  %v2975_v9 = vsel %vm671_vm2, %v2972_v23, %v2974_v46 }
 0x512   : > { %3162 = vrot.lane.b32.xlu0 %v6593_v43, %s4364_s8  ;;  %v2842_v43 = vsel %vm461_vm0, %v2839_v19, %v2841_v17 }
 0x513   : > { %v3406_v49 = vpop.permute.xlu1 %3405  ;;  %v3275_v60 = vpop.permute.xlu0 %3274 }
 0x514   : > { %3485 = vst.msk [vmem:[#allocation2 + $0x80] sm:$0xff] %vm1648_vm10, %v3406_v49  ;;  %v7154_v49 = vld [vmem:[%s7248_s5] ss:$0 sm:$0xff] }
 0x515   : > { %3353 = vst.msk [vmem:[#allocation2 + $0x88] sm:$0xff] %vm1514_vm9, %v3275_v60  ;;  %2903 = vrot.lane.b32.xlu1 %v2840_v32, %s4362_s30 }
 0x516   : > { %3296 = vrot.lane.b32.xlu0 %v2840_v32, %s4365_s9 }
 0x517   : > { %v3013_v28 = vpop.permute.xlu1 %3012  ;;  %v2882_v13 = vpop.permute.xlu0 %2881 }
 0x518   : > { %3090 = vst.msk [vmem:[#allocation2 + $0x90] sm:$0xff] %vm1248_vm7, %v3013_v28 }
 0x519   : > { %2958 = vst.msk [vmem:[#allocation2 + $0x98] sm:$0xff] %vm1114_vm6, %v2882_v13  ;;  %3429 = vrot.lane.b32.xlu1 %v2973_v63, %s4366_s14 }
 0x51a   : > { %3298 = vrot.lane.b32.xlu0 %v2842_v43, %s4365_s9 }
 0x51b   : > { %v3015_v41 = vpop.permute.xlu1 %3014  ;;  %v3408_v44 = vpop.permute.xlu0 %3407  ;;  %v3517_v37 = vld [vmem:[#allocation2 + $0x80] sm:$0xff] }
 0x51c   : > { %3091 = vst.msk [vmem:[#allocation2 + $0x98] sm:$0xff] %vm1248_vm7, %v3015_v41  ;;  %4277 = vmatprep.mubr.msk.f32.mxu1 %vm1729_vm11, %v3517_v37 }
 0x51d   : > { %3486 = vst.msk [vmem:[#allocation2 + $0x88] sm:$0xff] %vm1648_vm10, %v3408_v44  ;;  %3036 = vrot.lane.b32.xlu1 %v2973_v63, %s4363_s7 }
 0x51e   : > { %2905 = vrot.lane.b32.xlu0 %v2842_v43, %s4362_s30 }
 0x51f   : > { %v3145_v14 = vpop.permute.xlu1 %3144 }
 0x520   : > { %v3143_v0 = vpop.permute.xlu0 %3142  ;;  %3221 = vst.msk [vmem:[#allocation2 + $0x98] sm:$0xff] %vm1379_vm8, %v3145_v14 }
 0x521   : > { %3220 = vst.msk [vmem:[#allocation2 + $0x90] sm:$0xff] %vm1379_vm8, %v3143_v0  ;;  %3038 = vrot.lane.b32.xlu1 %v2975_v9, %s4363_s7 }
 0x522   : > { %3431 = vrot.lane.b32.xlu0 %v2975_v9, %s4366_s14 }
 0x523   : > { %v2884_v42 = vpop.permute.xlu1 %2883 }
 0x524   : > { %v3277_v22 = vpop.permute.xlu0 %3276  ;;  %v3518_v62 = vld [vmem:[#allocation2 + $0x88] sm:$0xff]  ;;  %2959 = vst.msk [vmem:[#allocation2 + $0xa0] sm:$0xff] %vm1114_vm6, %v2884_v42 }
 0x525   : > { %3354 = vst.msk [vmem:[#allocation2 + $0x90] sm:$0xff] %vm1514_vm9, %v3277_v22  ;;  %4278 = vmatmul.mubr.msk.f32.gmra.mrb[16].mxu1 %vm1729_vm11, %v3518_v62  ;;  %3168 = vrot.lane.b32.xlu1 %v2209_v54, %s4364_s8 }
 0x526   : > { %3166 = vrot.lane.b32.xlu0 %v2208_v2, %s4364_s8  ;;  %s4085_s8 = sshll.u32 %s7615_s22, 4 }
 0x527   : > { %v3410_v3 = vpop.permute.xlu1 %3409  ;;  %s266_s28 = scalar_lea.vmem %s7244_s1, %s4085_s8  ;;  %s271_s17 = scalar_lea.vmem %s7249_s6, %s4085_s8 }
 0x528   : > { %v3279_v15 = vpop.permute.xlu0 %3278  ;;  %3487 = vst.msk [vmem:[#allocation2 + $0x90] sm:$0xff] %vm1648_vm10, %v3410_v3 }
 0x529   : > { %3355 = vst.msk [vmem:[#allocation2 + $0x98] sm:$0xff] %vm1514_vm9, %v3279_v15  ;;  %3302 = vrot.lane.b32.xlu1 %v3239_v33, %s4365_s9 }
 0x52a   : > { %3300 = vrot.lane.b32.xlu0 %v3237_v57, %s4365_s9 }
 0x52b   : > { %v3017_v26 = vpop.permute.xlu1 %3016 }
 0x52c   : > { %v2886_v52 = vpop.permute.xlu0 %2885  ;;  %3092 = vst.msk [vmem:[#allocation2 + $0xa0] sm:$0xff] %vm1248_vm7, %v3017_v26 }
 0x52d   : > { %2960 = vst.msk [vmem:[#allocation2 + $0xa8] sm:$0xff] %vm1114_vm6, %v2886_v52  ;;  %3435 = vrot.lane.b32.xlu1 %v3372_v40, %s4366_s14 }
 0x52e   : > { %3433 = vrot.lane.b32.xlu0 %v3370_v20, %s4366_s14 }
 0x52f   : > { %v3019_v29 = vpop.permute.xlu1 %3018  ;;  %v3519_v12 = vld [vmem:[#allocation2 + $0x90] sm:$0xff] }
 0x530   : > { %v3412_v6 = vpop.permute.xlu0 %3411  ;;  %3093 = vst.msk [vmem:[#allocation2 + $0xa8] sm:$0xff] %vm1248_vm7, %v3019_v29  ;;  %4280 = vmatprep.mubr.msk.f32.mxu1 %vm1729_vm11, %v3519_v12 }
 0x531   : > { %3488 = vst.msk [vmem:[#allocation2 + $0x98] sm:$0xff] %vm1648_vm10, %v3412_v6 }
 0x533   : > { %v3149_v35 = vpop.permute.xlu1 %3148 }
 0x534   : > { %v3147_v4 = vpop.permute.xlu0 %3146  ;;  %3223 = vst.msk [vmem:[#allocation2 + $0xa8] sm:$0xff] %vm1379_vm8, %v3149_v35 }
 0x535   : > { %3222 = vst.msk [vmem:[#allocation2 + $0xa0] sm:$0xff] %vm1379_vm8, %v3147_v4 }
 0x537   : > { %v2888_v21 = vpop.permute.xlu1 %2887 }
 0x538   : > { %v3281_v47 = vpop.permute.xlu0 %3280  ;;  %v3520_v45 = vld [vmem:[#allocation2 + $0x98] sm:$0xff]  ;;  %2961 = vst.msk [vmem:[#allocation2 + $0xb0] sm:$0xff] %vm1114_vm6, %v2888_v21 }
 0x539   : > { %3356 = vst.msk [vmem:[#allocation2 + $0xa0] sm:$0xff] %vm1514_vm9, %v3281_v47  ;;  %4281 = vmatmul.mubr.msk.f32.gmra.mrb[18].mxu1 %vm1729_vm11, %v3520_v45 }
 0x53b   : > { %v3414_v7 = vpop.permute.xlu1 %3413 }
 0x53c   : > { %v3283_v31 = vpop.permute.xlu0 %3282  ;;  %3489 = vst.msk [vmem:[#allocation2 + $0xa0] sm:$0xff] %vm1648_vm10, %v3414_v7 }
 0x53d   : > { %3357 = vst.msk [vmem:[#allocation2 + $0xa8] sm:$0xff] %vm1514_vm9, %v3283_v31 }
 0x53f   : > { %v3021_v5 = vpop.permute.xlu1 %3020 }
 0x540   : > { %v2890_v58 = vpop.permute.xlu0 %2889  ;;  %3094 = vst.msk [vmem:[#allocation2 + $0xb0] sm:$0xff] %vm1248_vm7, %v3021_v5 }
 0x541   : > { %2962 = vst.msk [vmem:[#allocation2 + $0xb8] sm:$0xff] %vm1114_vm6, %v2890_v58 }
 0x543   : > { %v3023_v1 = vpop.permute.xlu1 %3022  ;;  %v3521_v59 = vld [vmem:[#allocation2 + $0xa0] sm:$0xff] }
 0x544   : > { %v3416_v27 = vpop.permute.xlu0 %3415  ;;  %3095 = vst.msk [vmem:[#allocation2 + $0xb8] sm:$0xff] %vm1248_vm7, %v3023_v1  ;;  %4283 = vmatprep.mubr.msk.f32.mxu1 %vm1729_vm11, %v3521_v59 }
 0x545   : > { %3490 = vst.msk [vmem:[#allocation2 + $0xa8] sm:$0xff] %vm1648_vm10, %v3416_v27 }
 0x547   : > { %v3153_v16 = vpop.permute.xlu1 %3152 }
 0x548   : > { %v3151_v24 = vpop.permute.xlu0 %3150  ;;  %3225 = vst.msk [vmem:[#allocation2 + $0xb8] sm:$0xff] %vm1379_vm8, %v3153_v16 }
 0x549   : > { %3224 = vst.msk [vmem:[#allocation2 + $0xb0] sm:$0xff] %vm1379_vm8, %v3151_v24 }
 0x54b   : > { %v2892_v8 = vpop.permute.xlu1 %2891 }
 0x54c   : > { %v3285_v55 = vpop.permute.xlu0 %3284  ;;  %v3522_v10 = vld [vmem:[#allocation2 + $0xa8] sm:$0xff]  ;;  %2963 = vst.msk [vmem:[#allocation2 + $0xc0] sm:$0xff] %vm1114_vm6, %v2892_v8 }
 0x54d   : > { %3358 = vst.msk [vmem:[#allocation2 + $0xb0] sm:$0xff] %vm1514_vm9, %v3285_v55  ;;  %4284 = vmatmul.mubr.msk.f32.gmra.mrb[20].mxu1 %vm1729_vm11, %v3522_v10 }
 0x54f   : > { %v3418_v48 = vpop.permute.xlu1 %3417 }
 0x550   : > { %v3287_v53 = vpop.permute.xlu0 %3286  ;;  %3491 = vst.msk [vmem:[#allocation2 + $0xb0] sm:$0xff] %vm1648_vm10, %v3418_v48 }
 0x551   : > { %3359 = vst.msk [vmem:[#allocation2 + $0xb8] sm:$0xff] %vm1514_vm9, %v3287_v53 }
 0x553   : > { %v3025_v56 = vpop.permute.xlu1 %3024 }
 0x554   : > { %v2894_v30 = vpop.permute.xlu0 %2893  ;;  %3096 = vst.msk [vmem:[#allocation2 + $0xc0] sm:$0xff] %vm1248_vm7, %v3025_v56 }
 0x555   : > { %2964 = vst.msk [vmem:[#allocation2 + $0xc8] sm:$0xff] %vm1114_vm6, %v2894_v30 }
 0x557   : > { %v3027_v19 = vpop.permute.xlu1 %3026  ;;  %v3523_v61 = vld [vmem:[#allocation2 + $0xb0] sm:$0xff] }
 0x558   : > { %v3420_v50 = vpop.permute.xlu0 %3419  ;;  %3097 = vst.msk [vmem:[#allocation2 + $0xc8] sm:$0xff] %vm1248_vm7, %v3027_v19  ;;  %4286 = vmatprep.mubr.msk.f32.mxu1 %vm1729_vm11, %v3523_v61 }
 0x559   : > { %3492 = vst.msk [vmem:[#allocation2 + $0xb8] sm:$0xff] %vm1648_vm10, %v3420_v50 }
 0x55b   : > { %v3157_v60 = vpop.permute.xlu1 %3156  ;;  %v4255_v23 = vpop.f32.mrb[0].mxu1 }
 0x55c   : > { %3227 = vst.msk [vmem:[#allocation2 + $0xc8] sm:$0xff] %vm1379_vm8, %v3157_v60  ;;  %v3155_v11 = vpop.permute.xlu0 %3154  ;;  %v3711_v32 = vpop.f32.mrb[1].mxu1  ;;  %v3717_v43 = vadd.f32 %v4255_v23, %v7154_v49 }
 0x55d   : > { %3226 = vst.msk [vmem:[#allocation2 + $0xc0] sm:$0xff] %vm1379_vm8, %v3155_v11  ;;  %v3712_v17 = vadd.f32 %v7154_v49, %v3711_v32 }
 0x55f   : > { %v2896_v28 = vpop.permute.xlu1 %2895  ;;  %3870 = vxpose.xlu0.b32.start [1/16] (narrow) %v3712_v17, 8 }
 0x560   : > { %v3524_v13 = vld [vmem:[#allocation2 + $0xb8] sm:$0xff]  ;;  %2965 = vst.msk [vmem:[#allocation2 + $0xd0] sm:$0xff] %vm1114_vm6, %v2896_v28  ;;  %v3289_v63 = vpop.permute.xlu0 %3288 }
 0x561   : > { %4287 = vmatmul.mubr.msk.f32.gmra.mrb[22].mxu1 %vm1729_vm11, %v3524_v13  ;;  %3360 = vst.msk [vmem:[#allocation2 + $0xc0] sm:$0xff] %vm1514_vm9, %v3289_v63 }
 0x563   : > { %v3422_v41 = vpop.permute.xlu1 %3421  ;;  %3871 = vxpose.xlu0.b32.cont [2/16] (narrow) %v3717_v43, 8 }
 0x564   : > { %3493 = vst.msk [vmem:[#allocation2 + $0xc0] sm:$0xff] %vm1648_vm10, %v3422_v41  ;;  %v3291_v44 = vpop.permute.xlu0 %3290 }
 0x565   : > { %3361 = vst.msk [vmem:[#allocation2 + $0xc8] sm:$0xff] %vm1514_vm9, %v3291_v44 }
 0x567   : > { %v3029_v37 = vpop.permute.xlu1 %3028 }
 0x568   : > { %3098 = vst.msk [vmem:[#allocation2 + $0xd0] sm:$0xff] %vm1248_vm7, %v3029_v37  ;;  %v2898_v46 = vpop.permute.xlu0 %2897 }
 0x569   : > { %2966 = vst.msk [vmem:[#allocation2 + $0xd8] sm:$0xff] %vm1114_vm6, %v2898_v46 }
 0x56b   : > { %v3031_v14 = vpop.permute.xlu1 %3030  ;;  %v4258_v0 = vpop.f32.mrb[2].mxu1  ;;  %v3525_v2 = vld [vmem:[#allocation2 + $0xc0] sm:$0xff] }
 0x56c   : > { %3099 = vst.msk [vmem:[#allocation2 + $0xd8] sm:$0xff] %vm1248_vm7, %v3031_v14  ;;  %v3424_v54 = vpop.permute.xlu0 %3423  ;;  %v3721_v39 = vpop.f32.mrb[3].mxu1  ;;  %4289 = vmatprep.mubr.msk.f32.mxu1 %vm1729_vm11, %v3525_v2  ;;  %v3727_v18 = vadd.f32 %v4258_v0, %v7154_v49 }
 0x56d   : > { %3494 = vst.msk [vmem:[#allocation2 + $0xc8] sm:$0xff] %vm1648_vm10, %v3424_v54  ;;  %v3722_v9 = vadd.f32 %v7154_v49, %v3721_v39 }
 0x56f   : > { %v3161_v25 = vpop.permute.xlu1 %3160  ;;  %3872 = vxpose.xlu0.b32.cont [3/16] (narrow) %v3722_v9, 8 }
 0x570   : > { %3229 = vst.msk [vmem:[#allocation2 + $0xd8] sm:$0xff] %vm1379_vm8, %v3161_v25  ;;  %v3159_v51 = vpop.permute.xlu0 %3158 }
 0x571   : > { %3228 = vst.msk [vmem:[#allocation2 + $0xd0] sm:$0xff] %vm1379_vm8, %v3159_v51 }
 0x573   : > { %v2900_v42 = vpop.permute.xlu1 %2899  ;;  %3873 = vxpose.xlu0.b32.cont [4/16] (narrow) %v3727_v18, 8 }
 0x574   : > { %2967 = vst.msk [vmem:[#allocation2 + $0xe0] sm:$0xff] %vm1114_vm6, %v2900_v42  ;;  %v3293_v22 = vpop.permute.xlu0 %3292  ;;  %v3526_v62 = vld [vmem:[#allocation2 + $0xc8] sm:$0xff] }
 0x575   : > { %3362 = vst.msk [vmem:[#allocation2 + $0xd0] sm:$0xff] %vm1514_vm9, %v3293_v22  ;;  %4290 = vmatmul.mubr.msk.f32.gmra.mrb[24].mxu1 %vm1729_vm11, %v3526_v62 }
 0x577   : > { %v3426_v34 = vpop.permute.xlu1 %3425 }
 0x578   : > { %3495 = vst.msk [vmem:[#allocation2 + $0xd0] sm:$0xff] %vm1648_vm10, %v3426_v34  ;;  %v3295_v36 = vpop.permute.xlu0 %3294 }
 0x579   : > { %3363 = vst.msk [vmem:[#allocation2 + $0xd8] sm:$0xff] %vm1514_vm9, %v3295_v36 }
 0x57b   : > { %v3033_v57 = vpop.permute.xlu1 %3032 }
 0x57c   : > { %3100 = vst.msk [vmem:[#allocation2 + $0xe0] sm:$0xff] %vm1248_vm7, %v3033_v57  ;;  %v2902_v33 = vpop.permute.xlu0 %2901 }
 0x57d   : > { %2968 = vst.msk [vmem:[#allocation2 + $0xe8] sm:$0xff] %vm1114_vm6, %v2902_v33 }
 0x57f   : > { %v3035_v38 = vpop.permute.xlu1 %3034  ;;  %v3527_v15 = vld [vmem:[#allocation2 + $0xd0] sm:$0xff] }
 0x580   : > { %v4261_v3 = vpop.f32.mrb[4].mxu1  ;;  %3101 = vst.msk [vmem:[#allocation2 + $0xe8] sm:$0xff] %vm1248_vm7, %v3035_v38  ;;  %v3428_v20 = vpop.permute.xlu0 %3427  ;;  %4292 = vmatprep.mubr.msk.f32.mxu1 %vm1729_vm11, %v3527_v15 }
 0x581   : > { %v3731_v40 = vpop.f32.mrb[5].mxu1  ;;  %3496 = vst.msk [vmem:[#allocation2 + $0xd8] sm:$0xff] %vm1648_vm10, %v3428_v20  ;;  %v3737_v6 = vadd.f32 %v4261_v3, %v7154_v49  ;;  %v3934_v20 = vld [vmem:[%s266_s28] sm:$0xff] }
 0x582   : > { %v3732_v26 = vadd.f32 %v7154_v49, %v3731_v40 }
 0x583   : > { %v3165_v52 = vpop.permute.xlu1 %3164 }
 0x584   : > { %3874 = vxpose.xlu0.b32.cont [5/16] (narrow) %v3732_v26, 8  ;;  %3231 = vst.msk [vmem:[#allocation2 + $0xe8] sm:$0xff] %vm1379_vm8, %v3165_v52  ;;  %v3163_v29 = vpop.permute.xlu0 %3162 }
 0x585   : > { %3230 = vst.msk [vmem:[#allocation2 + $0xe0] sm:$0xff] %vm1379_vm8, %v3163_v29 }
 0x587   : > { %v2904_v12 = vpop.permute.xlu1 %2903 }
 0x588   : > { %3875 = vxpose.xlu0.b32.cont [6/16] (narrow) %v3737_v6, 8  ;;  %2969 = vst.msk [vmem:[#allocation2 + $0xf0] sm:$0xff] %vm1114_vm6, %v2904_v12  ;;  %v3297_v35 = vpop.permute.xlu0 %3296  ;;  %v3528_v4 = vld [vmem:[#allocation2 + $0xd8] sm:$0xff] }
 0x589   : > { %3364 = vst.msk [vmem:[#allocation2 + $0xe0] sm:$0xff] %vm1514_vm9, %v3297_v35  ;;  %4293 = vmatmul.mubr.msk.f32.gmra.mrb[26].mxu1 %vm1729_vm11, %v3528_v4 }
 0x58b   : > { %v3430_v21 = vpop.permute.xlu1 %3429 }
 0x58c   : > { %3497 = vst.msk [vmem:[#allocation2 + $0xe0] sm:$0xff] %vm1648_vm10, %v3430_v21  ;;  %v3299_v47 = vpop.permute.xlu0 %3298 }
 0x58d   : > { %3365 = vst.msk [vmem:[#allocation2 + $0xe8] sm:$0xff] %vm1514_vm9, %v3299_v47 }
 0x58f   : > { %v3037_v45 = vpop.permute.xlu1 %3036 }
 0x590   : > { %3102 = vst.msk [vmem:[#allocation2 + $0xf0] sm:$0xff] %vm1248_vm7, %v3037_v45  ;;  %v2906_v7 = vpop.permute.xlu0 %2905 }
 0x591   : > { %2970 = vst.msk [vmem:[#allocation2 + $0xf8] sm:$0xff] %vm1114_vm6, %v2906_v7 }
 0x593   : > { %v3039_v31 = vpop.permute.xlu1 %3038  ;;  %v3529_v58 = vld [vmem:[#allocation2 + $0xe0] sm:$0xff] }
 0x594   : > { %v4264_v5 = vpop.f32.mrb[6].mxu1  ;;  %3103 = vst.msk [vmem:[#allocation2 + $0xf8] sm:$0xff] %vm1248_vm7, %v3039_v31  ;;  %v3432_v1 = vpop.permute.xlu0 %3431  ;;  %4295 = vmatprep.mubr.msk.f32.mxu1 %vm1729_vm11, %v3529_v58 }
 0x595   : > { %v3741_v27 = vpop.f32.mrb[7].mxu1  ;;  %3498 = vst.msk [vmem:[#allocation2 + $0xe8] sm:$0xff] %vm1648_vm10, %v3432_v1  ;;  %v3747_v8 = vadd.f32 %v4264_v5, %v7154_v49 }
 0x596   : > { %v3742_v59 = vadd.f32 %v7154_v49, %v3741_v27  ;;  %v3935_v27 = vld [vmem:[%s266_s28 + $0x8] sm:$0xff] }
 0x597   : > { %v3169_v16 = vpop.permute.xlu1 %3168 }
 0x598   : > { %3876 = vxpose.xlu0.b32.cont [7/16] (narrow) %v3742_v59, 8  ;;  %v3167_v24 = vpop.permute.xlu0 %3166  ;;  %3233 = vst.msk [vmem:[#allocation2 + $0xf8] sm:$0xff] %vm1379_vm8, %v3169_v16 }
 0x599   : > { %3232 = vst.msk [vmem:[#allocation2 + $0xf0] sm:$0xff] %vm1379_vm8, %v3167_v24 }
 0x59b   : > { %v3303_v55 = vpop.permute.xlu1 %3302 }
 0x59c   : > { %3877 = vxpose.xlu0.b32.cont [8/16] (narrow) %v3747_v8, 8  ;;  %v3301_v10 = vpop.permute.xlu0 %3300  ;;  %3367 = vst.msk [vmem:[#allocation2 + $0xf8] sm:$0xff] %vm1514_vm9, %v3303_v55  ;;  %v3530_v48 = vld [vmem:[#allocation2 + $0xe8] sm:$0xff] }
 0x59d   : > { %3366 = vst.msk [vmem:[#allocation2 + $0xf0] sm:$0xff] %vm1514_vm9, %v3301_v10  ;;  %4296 = vmatmul.mubr.msk.f32.gmra.mrb[28].mxu1 %vm1729_vm11, %v3530_v48 }
 0x59f   : > { %v3436_v53 = vpop.permute.xlu1 %3435 }
 0x5a0   : > { %v3434_v56 = vpop.permute.xlu0 %3433  ;;  %3500 = vst.msk [vmem:[#allocation2 + $0xf8] sm:$0xff] %vm1648_vm10, %v3436_v53 }
 0x5a1   : > { %3499 = vst.msk [vmem:[#allocation2 + $0xf0] sm:$0xff] %vm1648_vm10, %v3434_v56 }
 0x5a7   : > { %v3532_v19 = vld [vmem:[#allocation2 + $0xf8] sm:$0xff] }
 0x5a8   : > { %v4267_v30 = vpop.f32.mrb[8].mxu1  ;;  %v3531_v61 = vld [vmem:[#allocation2 + $0xf0] sm:$0xff] }
 0x5a9   : > { %v3751_v50 = vpop.f32.mrb[9].mxu1  ;;  %4298 = vmatprep.mubr.msk.f32.mxu1 %vm1729_vm11, %v3531_v61  ;;  %v3757_v23 = vadd.f32 %v4267_v30, %v7154_v49 }
 0x5aa   : > { %v3752_v60 = vadd.f32 %v7154_v49, %v3751_v50  ;;  %4299 = vmatmul.mubr.msk.f32.gmra.mrb[30].mxu1 %vm1729_vm11, %v3532_v19 }
 0x5ac   : > { %3878 = vxpose.xlu0.b32.cont [9/16] (narrow) %v3752_v60, 8 }
 0x5b0   : > { %3879 = vxpose.xlu0.b32.cont [10/16] (narrow) %v3757_v23, 8 }
 0x5bc   : > { %v4270_v11 = vpop.f32.mrb[10].mxu1 }
 0x5bd   : > { %v3761_v32 = vpop.f32.mrb[11].mxu1  ;;  %v3767_v28 = vadd.f32 %v4270_v11, %v7154_v49 }
 0x5be   : > { %v3762_v17 = vadd.f32 %v7154_v49, %v3761_v32 }
 0x5c0   : > { %3880 = vxpose.xlu0.b32.cont [11/16] (narrow) %v3762_v17, 8 }
 0x5c4   : > { %3881 = vxpose.xlu0.b32.cont [12/16] (narrow) %v3767_v28, 8 }
 0x5d0   : > { %v4273_v13 = vpop.f32.mrb[12].mxu1 }
 0x5d1   : > { %v3771_v63 = vpop.f32.mrb[13].mxu1  ;;  %v3777_v41 = vadd.f32 %v4273_v13, %v7154_v49 }
 0x5d2   : > { %v3772_v43 = vadd.f32 %v7154_v49, %v3771_v63 }
 0x5d4   : > { %3882 = vxpose.xlu0.b32.cont [13/16] (narrow) %v3772_v43, 8 }
 0x5d8   : > { %3883 = vxpose.xlu0.b32.cont [14/16] (narrow) %v3777_v41, 8 }
 0x5e4   : > { %v4276_v44 = vpop.f32.mrb[14].mxu1 }
 0x5e5   : > { %v3781_v37 = vpop.f32.mrb[15].mxu1  ;;  %v3787_v14 = vadd.f32 %v4276_v44, %v7154_v49 }
 0x5e6   : > { %v3782_v46 = vadd.f32 %v7154_v49, %v3781_v37 }
 0x5e8   : > { %3884 = vxpose.xlu0.b32.cont [15/16] (narrow) %v3782_v46, 8 }
 0x5ec   : > { %3885 = vxpose.xlu0.b32.end [16/16] (narrow) %v3787_v14, 8 }
 0x5f8   : > { %v4279_v0 = vpop.f32.mrb[16].mxu1 }
 0x5f9   : > { %v3791_v2 = vpop.f32.mrb[17].mxu1  ;;  %v3797_v39 = vadd.f32 %v4279_v0, %v7154_v49 }
 0x5fa   : > { %v3792_v54 = vadd.f32 %v7154_v49, %v3791_v2 }
 0x5fc   : > { %3902 = vxpose.xlu1.b32.start [1/16] (narrow) %v3792_v54, 8 }
 0x600   : > { %3903 = vxpose.xlu1.b32.cont [2/16] (narrow) %v3797_v39, 8 }
 0x60c   : > { %v4282_v9 = vpop.f32.mrb[18].mxu1 }
 0x60d   : > { %v3801_v25 = vpop.f32.mrb[19].mxu1  ;;  %v3807_v18 = vadd.f32 %v4282_v9, %v7154_v49 }
 0x60e   : > { %v3802_v51 = vadd.f32 %v7154_v49, %v3801_v25 }
 0x610   : > { %3904 = vxpose.xlu1.b32.cont [3/16] (narrow) %v3802_v51, 8 }
 0x614   : > { %3905 = vxpose.xlu1.b32.cont [4/16] (narrow) %v3807_v18, 8 }
 0x620   : > { %v4285_v42 = vpop.f32.mrb[20].mxu1 }
 0x621   : > { %v3811_v22 = vpop.f32.mrb[21].mxu1  ;;  %v3817_v34 = vadd.f32 %v4285_v42, %v7154_v49 }
 0x622   : > { %v3812_v62 = vadd.f32 %v7154_v49, %v3811_v22 }
 0x624   : > { %3906 = vxpose.xlu1.b32.cont [5/16] (narrow) %v3812_v62, 8 }
 0x628   : > { %3907 = vxpose.xlu1.b32.cont [6/16] (narrow) %v3817_v34, 8 }
 0x630   : > { %v3886_v40 = vpop.trf.xlu0 }
 0x631   : > { %v3936_v52 = vadd.f32 %v3934_v20, %v3886_v40 }
 0x633   : > { %3938 = vst [vmem:[%s271_s17] sm:$0xff] %v3936_v52 }
 0x634   : > { %v4288_v36 = vpop.f32.mrb[22].mxu1 }
 0x635   : > { %v3821_v57 = vpop.f32.mrb[23].mxu1  ;;  %v3827_v38 = vadd.f32 %v4288_v36, %v7154_v49 }
 0x636   : > { %v3822_v33 = vadd.f32 %v7154_v49, %v3821_v57 }
 0x638   : > { %3908 = vxpose.xlu1.b32.cont [7/16] (narrow) %v3822_v33, 8 }
 0x63c   : > { %3909 = vxpose.xlu1.b32.cont [8/16] (narrow) %v3827_v38, 8 }
 0x648   : > { %v4291_v3 = vpop.f32.mrb[24].mxu1 }
 0x649   : > { %v3831_v15 = vpop.f32.mrb[25].mxu1  ;;  %v3837_v29 = vadd.f32 %v4291_v3, %v7154_v49 }
 0x64a   : > { %v3832_v26 = vadd.f32 %v7154_v49, %v3831_v15 }
 0x64c   : > { %3910 = vxpose.xlu1.b32.cont [9/16] (narrow) %v3832_v26, 8 }
 0x650   : > { %3911 = vxpose.xlu1.b32.cont [10/16] (narrow) %v3837_v29, 8 }
 0x65c   : > { %v4294_v6 = vpop.f32.mrb[26].mxu1 }
 0x65d   : > { %v3841_v12 = vpop.f32.mrb[27].mxu1  ;;  %v3847_v4 = vadd.f32 %v4294_v6, %v7154_v49 }
 0x65e   : > { %v3842_v35 = vadd.f32 %v7154_v49, %v3841_v12 }
 0x660   : > { %3912 = vxpose.xlu1.b32.cont [11/16] (narrow) %v3842_v35, 8 }
 0x664   : > { %3913 = vxpose.xlu1.b32.cont [12/16] (narrow) %v3847_v4, 8 }
 0x670   : > { %v4297_v21 = vpop.f32.mrb[28].mxu1 }
 0x671   : > { %v3851_v47 = vpop.f32.mrb[29].mxu1  ;;  %v3857_v7 = vadd.f32 %v4297_v21, %v7154_v49 }
 0x672   : > { %v3852_v45 = vadd.f32 %v7154_v49, %v3851_v47 }
 0x674   : > { %3914 = vxpose.xlu1.b32.cont [13/16] (narrow) %v3852_v45, 8 }
 0x678   : > { %3915 = vxpose.xlu1.b32.cont [14/16] (narrow) %v3857_v7, 8 }
 0x67d   : > { %v4300_v31 = vpop.f32.mrb[30].mxu1 }
 0x67e   : > { %v3861_v5 = vpop.f32.mrb[31].mxu1  ;;  %v3867_v1 = vadd.f32 %v4300_v31, %v7154_v49 }
 0x67f   : > { %v3862_v58 = vadd.f32 %v7154_v49, %v3861_v5 }
 0x681   : > { %3916 = vxpose.xlu1.b32.cont [15/16] (narrow) %v3862_v58, 8 }
 0x685   : > { %3917 = vxpose.xlu1.b32.end [16/16] (narrow) %v3867_v1, 8 }
 0x6c9   : > { %v3918_v59 = vpop.trf.xlu1 }
 0x6ca   : > { %v3937_v16 = vadd.f32 %v3935_v27, %v3918_v59 }
 0x6cc   : > { %3939 = vst [vmem:[%s271_s17 + $0x8] sm:$0xff] %v3937_v16 }
 0x6cd PF: > { %s16_s21 = sadd.s32 1, %s4357_s21  }
 0x6ce   : > { %p13_p4 = scmp.ge.s32.totalorder %s16_s21, 4  }
 0x6d0   :  { %15 = sbr.rel (!%p13_p4) target bundleno = 1 (0x1), region = 79 }

</bundles_post_ra>
